<compile_context>
chip_gen: v6e
topology: v6e:2x2x1
jax: 0.10.0
libtpu: 0.0.40
codegen_flags: <defaults>
</compile_context>

<pallas_src>
import functools
import numpy as np
import jax
import jax.numpy as jnp
from jax.experimental import pallas as pl
from jax.experimental.pallas import tpu as pltpu


# ----------------------------- Pallas kernel -----------------------------
def _roi_head_kernel(x_ref, w1_ref, b1_ref, w2_ref, b2_ref, o_ref, acc_ref, *,
                     inv_hw):
    """One (batch-tile, channel-tile) grid step.

    x_ref  : (TB, TC, HW)  input feature-map chunk (HW on lanes)
    w1_ref : (TC, D)       chunk of the first Linear weight
    b1_ref : (1, D)        first Linear bias
    w2_ref : (D, D)        second Linear weight
    b2_ref : (1, D)        second Linear bias
    o_ref  : (TB, D)       output tile (same tile for every channel step)
    acc_ref: (TB, D) f32   accumulator for pooled @ w1 over channel tiles
    """
    c = pl.program_id(1)

    @pl.when(c == 0)
    def _():
        acc_ref[...] = jnp.zeros_like(acc_ref)

    # Spatial mean pool of this channel chunk: sum over the lane axis, scale once.
    pooled = jnp.sum(x_ref[...], axis=-1) * inv_hw            # (TB, TC) f32

    # Partial first Linear: accumulate pooled-chunk @ w1-chunk on the MXU.
    acc_ref[...] += jnp.dot(pooled, w1_ref[...],
                            preferred_element_type=jnp.float32)

    # Finalize on the last channel tile: bias + ReLU + second Linear + bias.
    @pl.when(c == pl.num_programs(1) - 1)
    def _():
        h = jnp.maximum(acc_ref[...] + b1_ref[...], 0.0)      # (TB, D)
        out = jnp.dot(h, w2_ref[...],
                      preferred_element_type=jnp.float32) + b2_ref[...]
        o_ref[...] = out.astype(o_ref.dtype)


# ----------------------------- wrapper -----------------------------
def roi_head_pallas(x, w1, b1, w2, b2, *, tb=8, tc=None):
    """x: (B, C, H, W);  w1: (C, D);  b1: (D,);  w2: (D, D);  b2: (D,) -> (B, D)."""
    B, C, H, W = x.shape
    D = w1.shape[1]
    HW = H * W

    if tc is None:
        tc = min(C, 512)
    assert C % tc == 0, "in_channels must be divisible by the channel tile"

    # Pad batch to a multiple of the batch tile (sublane-friendly), lane-dense HW.
    B_pad = ((B + tb - 1) // tb) * tb
    xr = x.astype(jnp.float32).reshape(B, C, HW)
    if B_pad != B:
        xr = jnp.pad(xr, ((0, B_pad - B), (0, 0), (0, 0)))

    w1f = w1.astype(jnp.float32)
    w2f = w2.astype(jnp.float32)
    b1f = b1.reshape(1, D).astype(jnp.float32)
    b2f = b2.reshape(1, D).astype(jnp.float32)

    kernel = functools.partial(_roi_head_kernel, inv_hw=1.0 / float(HW))

    out = pl.pallas_call(
        kernel,
        grid=(B_pad // tb, C // tc),
        in_specs=[
            pl.BlockSpec((tb, tc, HW), lambda b, c: (b, c, 0)),   # x chunk
            pl.BlockSpec((tc, D), lambda b, c: (c, 0)),           # w1 chunk
            pl.BlockSpec((1, D), lambda b, c: (0, 0)),            # b1
            pl.BlockSpec((D, D), lambda b, c: (0, 0)),            # w2
            pl.BlockSpec((1, D), lambda b, c: (0, 0)),            # b2
        ],
        out_specs=pl.BlockSpec((tb, D), lambda b, c: (b, 0)),     # output tile
        out_shape=jax.ShapeDtypeStruct((B_pad, D), jnp.float32),
        scratch_shapes=[pltpu.VMEM((tb, D), jnp.float32)],
        compiler_params=pltpu.CompilerParams(
            dimension_semantics=("parallel", "arbitrary")),
    )(xr, w1f, b1f, w2f, b2f)

    return out[:B]


# --------------------- pure-JAX reference (for checking) ---------------------
def roi_head_reference(x, w1, b1, w2, b2):
    pooled = x.astype(jnp.float32).mean(axis=(2, 3))              # (B, C)
    h = jnp.maximum(pooled @ w1 + b1, 0.0)
    return h @ w2 + b2


# ----------------------------- main -----------------------------
if __name__ == "__main__":
    key = jax.random.PRNGKey(0)
    kx, kw1, kb1, kw2, kb2 = jax.random.split(key, 5)

    # Small but TPU-friendly shapes consistent with RoIHead:
    #   batch=2, in_channels=512 (tiled as 2 x 256), spatial=16x16, hidden D=128.
    B, C, H, W = 2, 512, 16, 16
    D = 128  # args.mask_head_out_channel

    x = jax.random.normal(kx, (B, C, H, W), jnp.float32)
    w1 = jax.random.normal(kw1, (C, D), jnp.float32) * (1.0 / np.sqrt(C))
    b1 = jax.random.normal(kb1, (D,), jnp.float32) * 0.02
    w2 = jax.random.normal(kw2, (D, D), jnp.float32) * (1.0 / np.sqrt(D))
    b2 = jax.random.normal(kb2, (D,), jnp.float32) * 0.02

    out = roi_head_pallas(x, w1, b1, w2, b2, tb=8, tc=256)
    out = jax.block_until_ready(out)

    ref = jax.block_until_ready(roi_head_reference(x, w1, b1, w2, b2))
    np.testing.assert_allclose(np.asarray(out), np.asarray(ref),
                               rtol=2e-3, atol=2e-3)

    print("KERNEL_OK")
</pallas_src>

<mosaic_0001>
module attributes {stable_mosaic.version = 11 : i64} {
  func.func @_roi_head_kernel(%arg0: i32, %arg1: i32, %arg2: memref<8x256x256xf32, #tpu.memory_space<vmem>>, %arg3: memref<256x128xf32, #tpu.memory_space<vmem>>, %arg4: memref<1x128xf32, #tpu.memory_space<vmem>>, %arg5: memref<128x128xf32, #tpu.memory_space<vmem>>, %arg6: memref<1x128xf32, #tpu.memory_space<vmem>>, %arg7: memref<8x128xf32, #tpu.memory_space<vmem>>, %arg8: memref<8x128xf32, #tpu.memory_space<vmem>>) attributes {dimension_semantics = [#tpu.dimension_semantics<parallel>, #tpu.dimension_semantics<arbitrary>], iteration_bounds = array<i64: 1, 2>, scalar_prefetch = 0 : i64, scratch_operands = 1 : i64, tpu.core_type = #tpu.core_type<tc>, window_params = [{transform_indices = @transform_0, window_bounds = array<i64: 8, 256, 256>}, {transform_indices = @transform_1, window_bounds = array<i64: 256, 128>}, {pipeline_mode = #tpu.pipeline_mode<synchronous>, transform_indices = @transform_2, window_bounds = array<i64: 1, 128>}, {pipeline_mode = #tpu.pipeline_mode<synchronous>, transform_indices = @transform_3, window_bounds = array<i64: 128, 128>}, {pipeline_mode = #tpu.pipeline_mode<synchronous>, transform_indices = @transform_4, window_bounds = array<i64: 1, 128>}, {transform_indices = @transform_5, window_bounds = array<i64: 8, 128>}]} {
    %c0_i32 = arith.constant 0 : i32
    %0 = arith.cmpi eq, %arg1, %c0_i32 : i32
    %1 = arith.extui %0 : i1 to i32
    %c0_i32_0 = arith.constant 0 : i32
    %2 = arith.cmpi ne, %1, %c0_i32_0 : i32
    scf.if %2 {
      %cst_12 = arith.constant 0.000000e+00 : f32
      %15 = vector.broadcast %cst_12 : f32 to vector<8x128xf32>
      %c0_13 = arith.constant 0 : index
      %c0_14 = arith.constant 0 : index
      %16 = vector.load %arg8[%c0_13, %c0_14] : memref<8x128xf32, #tpu.memory_space<vmem>>, vector<8x128xf32>
      tpu.vector_store %arg8[%c0_13, %c0_14], %15 {strides = array<i32>} : memref<8x128xf32, #tpu.memory_space<vmem>>, vector<8x128xf32>,
    } else {
    }
    %c0 = arith.constant 0 : index
    %c0_1 = arith.constant 0 : index
    %c0_2 = arith.constant 0 : index
    %3 = vector.load %arg2[%c0, %c0_1, %c0_2] : memref<8x256x256xf32, #tpu.memory_space<vmem>>, vector<8x256x256xf32>
    %cst = arith.constant dense<0.000000e+00> : vector<8x256xf32>
    %4 = vector.multi_reduction <add>, %3, %cst [2] : vector<8x256x256xf32> to vector<8x256xf32>
    %cst_3 = arith.constant 3.906250e-03 : f32
    %5 = vector.broadcast %cst_3 : f32 to vector<8x256xf32>
    %6 = arith.mulf %4, %5 : vector<8x256xf32>
    %c0_4 = arith.constant 0 : index
    %c0_5 = arith.constant 0 : index
    %7 = vector.load %arg8[%c0_4, %c0_5] : memref<8x128xf32, #tpu.memory_space<vmem>>, vector<8x128xf32>
    %c0_6 = arith.constant 0 : index
    %c0_7 = arith.constant 0 : index
    %8 = vector.load %arg3[%c0_6, %c0_7] : memref<256x128xf32, #tpu.memory_space<vmem>>, vector<256x128xf32>
    %cst_8 = arith.constant dense<0.000000e+00> : vector<8x128xf32>
    %9 = tpu.matmul %6, %8, %cst_8 {dimension_numbers = #tpu.dot_dimension_numbers<[1], [0], [0], [1], [0, 0, 1, 1], [], []>} : vector<8x256xf32>, vector<256x128xf32>, vector<8x128xf32> -> vector<8x128xf32>
    %10 = arith.addf %7, %9 : vector<8x128xf32>
    %c0_9 = arith.constant 0 : index
    %c0_10 = arith.constant 0 : index
    %11 = vector.load %arg8[%c0_9, %c0_10] : memref<8x128xf32, #tpu.memory_space<vmem>>, vector<8x128xf32>
    tpu.vector_store %arg8[%c0_9, %c0_10], %10 {strides = array<i32>} : memref<8x128xf32, #tpu.memory_space<vmem>>, vector<8x128xf32>,
    %c1_i32 = arith.constant 1 : i32
    %12 = arith.cmpi eq, %arg1, %c1_i32 : i32
    %13 = arith.extui %12 : i1 to i32
    %c0_i32_11 = arith.constant 0 : i32
    %14 = arith.cmpi ne, %13, %c0_i32_11 : i32
    scf.if %14 {
      %c0_12 = arith.constant 0 : index
      %c0_13 = arith.constant 0 : index
      %15 = vector.load %arg8[%c0_12, %c0_13] : memref<8x128xf32, #tpu.memory_space<vmem>>, vector<8x128xf32>
      %c0_14 = arith.constant 0 : index
      %c0_15 = arith.constant 0 : index
      %16 = vector.load %arg4[%c0_14, %c0_15] : memref<1x128xf32, #tpu.memory_space<vmem>>, vector<1x128xf32>
      %17 = vector.broadcast %16 : vector<1x128xf32> to vector<8x128xf32>
      %18 = arith.addf %15, %17 : vector<8x128xf32>
      %cst_16 = arith.constant 0.000000e+00 : f32
      %19 = vector.broadcast %cst_16 : f32 to vector<8x128xf32>
      %20 = arith.maximumf %18, %19 : vector<8x128xf32>
      %c0_17 = arith.constant 0 : index
      %c0_18 = arith.constant 0 : index
      %21 = vector.load %arg5[%c0_17, %c0_18] : memref<128x128xf32, #tpu.memory_space<vmem>>, vector<128x128xf32>
      %cst_19 = arith.constant dense<0.000000e+00> : vector<8x128xf32>
      %22 = tpu.matmul %20, %21, %cst_19 {dimension_numbers = #tpu.dot_dimension_numbers<[1], [0], [0], [1], [0, 0, 1, 1], [], []>} : vector<8x128xf32>, vector<128x128xf32>, vector<8x128xf32> -> vector<8x128xf32>
      %c0_20 = arith.constant 0 : index
      %c0_21 = arith.constant 0 : index
      %23 = vector.load %arg6[%c0_20, %c0_21] : memref<1x128xf32, #tpu.memory_space<vmem>>, vector<1x128xf32>
      %24 = vector.broadcast %23 : vector<1x128xf32> to vector<8x128xf32>
      %25 = arith.addf %22, %24 : vector<8x128xf32>
      %c0_22 = arith.constant 0 : index
      %c0_23 = arith.constant 0 : index
      %26 = vector.load %arg7[%c0_22, %c0_23] : memref<8x128xf32, #tpu.memory_space<vmem>>, vector<8x128xf32>
      tpu.vector_store %arg7[%c0_22, %c0_23], %25 {strides = array<i32>} : memref<8x128xf32, #tpu.memory_space<vmem>>, vector<8x128xf32>,
    } else {
    }
    return
  }
  func.func @transform_0(%arg0: i32, %arg1: i32) -> (i32, i32, i32) {
    %c0_i32 = arith.constant 0 : i32
    %c0_i32_0 = arith.constant 0 : i32
    return %arg0, %arg1, %c0_i32 : i32, i32, i32
  }
  func.func @transform_1(%arg0: i32, %arg1: i32) -> (i32, i32) {
    %c0_i32 = arith.constant 0 : i32
    %c0_i32_0 = arith.constant 0 : i32
    return %arg1, %c0_i32 : i32, i32
  }
  func.func @transform_2(%arg0: i32, %arg1: i32) -> (i32, i32) {
    %c0_i32 = arith.constant 0 : i32
    %c0_i32_0 = arith.constant 0 : i32
    %c0_i32_1 = arith.constant 0 : i32
    return %c0_i32, %c0_i32_0 : i32, i32
  }
  func.func @transform_3(%arg0: i32, %arg1: i32) -> (i32, i32) {
    %c0_i32 = arith.constant 0 : i32
    %c0_i32_0 = arith.constant 0 : i32
    %c0_i32_1 = arith.constant 0 : i32
    return %c0_i32, %c0_i32_0 : i32, i32
  }
  func.func @transform_4(%arg0: i32, %arg1: i32) -> (i32, i32) {
    %c0_i32 = arith.constant 0 : i32
    %c0_i32_0 = arith.constant 0 : i32
    %c0_i32_1 = arith.constant 0 : i32
    return %c0_i32, %c0_i32_0 : i32, i32
  }
  func.func @transform_5(%arg0: i32, %arg1: i32) -> (i32, i32) {
    %c0_i32 = arith.constant 0 : i32
    %c0_i32_0 = arith.constant 0 : i32
    return %arg0, %c0_i32 : i32, i32
  }
}

</mosaic_0001>

<bundles_post_ra>
// kernel: tpu_custom_call.1
= control target key start
LH: loop header
LB: loop body
LE: loop exit
PB: predicated region body
PF: predicated region fallthrough
CT: control target
= control target key end

     0   :  { %s5789_s0 = inlined_call_operand.hbm [shape: f32[8,512,256], index: 0, kind: input, shape index: {}]   ;;  %s5790_s1 = inlined_call_operand.hbm [shape: f32[512,128], index: 1, kind: input, shape index: {}]   ;;  %s5791_s2 = inlined_call_operand.hbm [shape: f32[1,128], index: 2, kind: input, shape index: {}]   ;;  %s5792_s3 = inlined_call_operand.hbm [shape: f32[128,128], index: 3, kind: input, shape index: {}]   ;;  %s5793_s4 = inlined_call_operand.hbm [shape: f32[1,128], index: 4, kind: input, shape index: {}]   ;;  %s5794_s5 = inlined_call_operand.hbm [shape: f32[8,128], index: 5, kind: output, shape index: {}]  }
   0x1   :  { %5795 = sst [smem:[#allocation21_spill]] %s5789_s0 }
   0x2   :  { %5796 = sst [smem:[#allocation22_spill]] %s5791_s2 }
   0x3   :  { %5797 = sst [smem:[#allocation23_spill]] %s5792_s3 }
   0x4   :  { %10 = vsyncpa [#allocation4], 0 }
   0x5   :  { %12 = vsyncpa [#allocation4 + $0x1], 0 }
   0x6   :  { %13 = vsyncpa [#allocation7], 0 }
   0x7   :  { %15 = vsyncpa [#allocation7 + $0x1], 0 }
   0x8   :  { %16 = vsyncpa [#allocation10], 0 }
   0x9   :  { %17 = vsyncpa [#allocation5], 0  ;;  %s4287_s18 = smov 0   ;;  %s4289_s19 = smov 0  }
   0xa   :  { %s4291_s20 = smov 0   ;;  %s4293_s21 = smov 0  }
   0xb   :  { %s4295_s22 = smov 0   ;;  %s4297_s23 = smov 0  }
   0xc LB: > { %s4316_s24 = sadd.s32 4294967295, %s4237_s23   ;;  %s32_s25 = sadd.s32 1, %s4233_s22  ;;  %s4237_s23 = sphi %s4297_s23, %s23_s23   ;;  %s4233_s22 = sphi %s4295_s22, %s5809_s22   ;;  %s4229_s21 = sphi %s4293_s21, %s5808_s21   ;;  %s4225_s20 = sphi %s4291_s20, %s5807_s20   ;;  %s4221_s19 = sphi %s4289_s19, %s5806_s19   ;;  %s4217_s18 = sphi %s4287_s18, %s5805_s18  }
   0xd   : > { %p33_p0 = scmp.ge.s32.totalorder %s32_s25, 2  ;;  %s44_s26 = sadd.s32 1, %s4225_s20 }
   0xe   : > { %p51_p1 = scmp.ne.s32.totalorder %s4225_s20, %s4221_s19  ;;  %p52_p2 = scmp.eq.s32.totalorder %s4237_s23, 0 }
   0xf   : > { %s5811_s25 = smov (%p33_p0, %s32_s25), 0  ;;  %p57_p4 = scmp.ne.s32.totalorder %s4221_s19, %s4217_s18 }
  0x10   : > { %p4325_p3 = por %p52_p2, %p51_p1  ;;  %s40_s28 = ssub.s32 %s4233_s22, %s5811_s25 }
  0x11   : > { %p58_p5 = scmp.eq.s32.totalorder %s4316_s24, 0  ;;  %p42_p6 = scmp.eq.s32.totalorder %s40_s28, 0 }
  0x12   : > { %p3815_p7 = scmp.ge.s32.totalorder %s4237_s23, 1  ;;  %p183_p9 = scmp.lt.s32.totalorder %s4237_s23, 3 }
  0x13   : > { %p4336_p8 = por %p58_p5, %p57_p4  ;;  %s4239_s7 = smov [#allocation9]  }
  0x14   : > { %s4342_s30 = scalar_select %p42_p6, %s4225_s20, %s44_s26  }
  0x15   : > { %p4344_p10 = pnand %p3815_p7, %p183_p9  ;;  %s206_s8 = sshll.u32 %s4239_s7, 4  ;;  %s207_s8 = int_to_ptr.vmem [resolvable:$true] %s206_s8 }
  0x16   : > { %s4240_s10 = smov [#allocation8]   ;;  %s4054_s12 = scalar_lea.vmem %s207_s8, 2048 }
  0x17   : > { %p3960_p11 = pneg %p4344_p10  ;;  %s196_s11 = sshll.u32 %s4240_s10, 4  ;;  %s197_s11 = int_to_ptr.vmem [resolvable:$true] %s196_s11 }
  0x18   : > { %p4055_p0 = scmp.ne.s32.totalorder %s207_s8, %s4054_s12  ;;  %p4062_p4 = scmp.lt.s32.totalorder %s207_s8, %s207_s8 }
  0x19   : > { %p4352_p12 = pnand %p3960_p11, %p58_p5  ;;  %p4063_p6 = scmp.lt.s32.totalorder %s4054_s12, %s4054_s12 }
  0x1b   : > { %p4045_p13 = pneg %p4352_p12  ;;  %p4064_p7 = por %p4063_p6, %p4062_p4 }
  0x1d   : > { %p4057_p1 = pnand %p4055_p0, %p4045_p13 }
  0x1f   : > { %p4058_p2 = pneg %p4057_p1 }
  0x21   : > { %p4065_p9 = pnand %p4064_p7, %p4058_p2 }
  0x23   : > { %4068 = shalt.err (!%p4065_p9)
}
  0x24   : > { %s4241_s13 = smov 128   ;;  %s4242_s14 = smov 8  }
  0x25   : > { %s5802_s3 = sld [smem:[#allocation23_spill]]  ;;  %s4080_s17 = scalar_lea.vmem %s197_s11, 16 }
  0x26   : > { %p4081_p11 = scmp.ne.s32.totalorder %s197_s11, %s4080_s17  ;;  %s4087_s18 = scalar_lea.vmem %s197_s11, 32 }
  0x27   : > { %p4088_p4 = scmp.lt.s32.totalorder %s197_s11, %s197_s11  ;;  %p4089_p2 = scmp.lt.s32.totalorder %s4087_s18, %s4080_s17 }
  0x28   : > { %p4083_p0 = pnand %p4081_p11, %p4045_p13 }
  0x29   : > { %p4090_p6 = por %p4089_p2, %p4088_p4 }
  0x2a   : > { %p4084_p1 = pneg %p4083_p0 }
  0x2b   : > { %3966 = dma.hbm_to_vmem [thread:$0]  (!%p4352_p12), %s5802_s3, 2048, %s207_s8, [#allocation10], %s4241_s13, %s4241_s13, %s4242_s14  }
  0x2c   : > { %p4091_p7 = pnand %p4090_p6, %p4084_p1 }
  0x2e   : > { %4094 = shalt.err (!%p4091_p7)
}
  0x2f   : > { %s5803_s2 = sld [smem:[#allocation22_spill]]  ;;  %s4243_s7 = smov [#allocation11]  }
  0x30   : > { %s220_s8 = sshll.u32 %s4243_s7, 4  ;;  %s221_s8 = int_to_ptr.vmem [resolvable:$true] %s220_s8 }
  0x31   : > { %s4106_s10 = scalar_lea.vmem %s221_s8, 16  ;;  %s4113_s12 = scalar_lea.vmem %s221_s8, 32 }
  0x32   : > { %p4107_p9 = scmp.ne.s32.totalorder %s221_s8, %s4106_s10  ;;  %p4114_p4 = scmp.lt.s32.totalorder %s221_s8, %s221_s8 }
  0x33   : > { %p4115_p1 = scmp.lt.s32.totalorder %s4113_s12, %s4106_s10 }
  0x34   : > { %p4109_p11 = pnand %p4107_p9, %p4045_p13 }
  0x35   : > { %3963 = dma.hbm_to_vmem [thread:$0]  (!%p4352_p12), %s5803_s2, 16, %s197_s11, [#allocation7]  }
  0x36   : > { %p4110_p0 = pneg %p4109_p11  ;;  %p4116_p2 = por %p4115_p1, %p4114_p4 }
  0x38   : > { %p4117_p6 = pnand %p4116_p2, %p4110_p0 }
  0x3a   : > { %4120 = shalt.err (!%p4117_p6)
}
  0x3b   : > { %3969 = dma.hbm_to_vmem [thread:$0]  (!%p4352_p12), %s5793_s4, 16, %s221_s8, [#allocation10]  }
  0x3c   : > { %p3819_p7 = scmp.ge.s32.totalorder %s4237_s23, 2 }
  0x3e   : > { %227 = sbr.rel (%p3819_p7) target bundleno = 96 (0x60), region = 28 }
  0x43   : > { %s231_s11 = sand.u32 1, %s4225_s20   ;;  %s3844_s15 = sshll.u32 %s4233_s22, 13 }
  0x44   : > { %s3820_s16 = sshll.u32 %s231_s11, 12  ;;  %s5804_s0 = sld [smem:[#allocation21_spill]] }
  0x45   : > { %s3939_s26 = scalar_select %p4325_p3, [#allocation0], [#allocation15] }
  0x46   : > { %s235_s28 = scalar_lea.vmem [#allocation3], %s3820_s16  ;;  %s4244_s10 = smov 16384  }
  0x47   : > { %s258_s7 = sshll.u32 %s235_s28, 4  ;;  %s250_s8 = sld [smem:[%s3939_s26]]   ;;  %s259_s7 = int_to_ptr.vmem [resolvable:$true] %s258_s7 }
  0x48   : > { %3940 = sst [smem:[#allocation14]] (%p4325_p3), %s4244_s10  ;;  %s4245_s12 = smov 8192  }
  0x49   : > { %3941 = sst [smem:[#allocation14 + $0x1]] (%p4325_p3), %s4245_s12  ;;  %s4246_s13 = smov 32  }
  0x4a   : > { %s245_s18 = scalar_lea.hbm %s5804_s0, %s3844_s15  ;;  %3942 = sst [smem:[#allocation14 + $0x2]] (%p4325_p3), %s4246_s13 }
  0x4b   : > { %s4247_s14 = smov 256   ;;  %s4248_s16 = smov 16  }
  0x4c   : > { %3943 = sst [smem:[#allocation14 + $0x3]] (%p4325_p3), %s4247_s14  ;;  %s232_s9 = scalar_lea.sflag [#allocation4], %s231_s11 }
  0x4d   : > { %3944 = sst [smem:[#allocation14 + $0x4]] (%p4325_p3), %s4247_s14  ;;  %s3824_s15 = sshll.u32 %s250_s8, 26 }
  0x4e   : > { %3945 = sst [smem:[#allocation14 + $0x5]] (%p4325_p3), %s4248_s16  ;;  %s3825_s17 = sadd.s32 134217728, %s3824_s15 }
  0x4f   : > { %s4249_s26 = smov 131072   ;;  %s281_s28 = sand.u32 1, %s4237_s23  }
  0x50   : > { %3946 = dma.general (%p4325_p3), %s245_s18, 65536, %s259_s7, %s232_s9, %s4249_s26, [#allocation14], %s3825_s17, 0  }
  0x51   : > { %s3826_s10 = sshll.u32 %s231_s11, 8  ;;  %s3845_s12 = sshll.u32 %s4233_s22, 12 }
  0x52   : > { %s285_s13 = scalar_lea.vmem [#allocation6], %s3826_s10  ;;  %s291_s8 = scalar_lea.hbm %s5790_s1, %s3845_s12 }
  0x53   : > { %s292_s0 = sshll.u32 %s285_s13, 4  ;;  %s282_s14 = scalar_lea.sflag [#allocation7], %s281_s28  ;;  %s293_s0 = int_to_ptr.vmem [resolvable:$true] %s292_s0 }
  0x54   : > { %s4133_s16 = scalar_lea.vmem %s293_s0, 4096  ;;  %s4250_s18 = smov [#allocation6]  }
  0x55   : > { %p4134_p12 = scmp.ne.s32.totalorder %s293_s0, %s4133_s16  ;;  %s4137_s7 = sshll.u32 %s4250_s18, 4  ;;  %s4138_s7 = int_to_ptr.vmem [resolvable:$false] %s4137_s7 }
  0x56   : > { %s4139_s15 = scalar_lea.vmem %s4138_s7, 8192  ;;  %p4140_p11 = scmp.lt.s32.totalorder %s293_s0, %s4138_s7 }
  0x57   : > { %p4135_p13 = pnand %p4134_p12, %p4325_p3  ;;  %p4141_p0 = scmp.lt.s32.totalorder %s4139_s15, %s4133_s16 }
  0x59   : > { %p4136_p9 = pneg %p4135_p13  ;;  %p4142_p4 = por %p4141_p0, %p4140_p11 }
  0x5b   : > { %p4143_p1 = pnand %p4142_p4, %p4136_p9 }
  0x5d   : > { %4146 = shalt.err (!%p4143_p1)
}
  0x5e   : > { %s4251_s11 = smov 128   ;;  %s4252_s2 = smov 8  }
  0x5f   : > { %3947 = dma.hbm_to_vmem [thread:$0]  (%p4325_p3), %s291_s8, 4096, %s293_s0, %s282_s14, %s4251_s11, %s4251_s11, %s4252_s2  }
  0x60 PF: > { %304 = sbr.rel (%p4344_p10) target bundleno = 1219 (0x4c3), region = 40  ;;  %s306_s3 = sand.u32 (!%p4344_p10), 1, %s4221_s19  }
  0x61   : > { %s3830_s17 = sshll.u32 (!%p4344_p10), %s306_s3, 12  ;;  %s307_s9 = scalar_lea.sflag (!%p4344_p10), [#allocation4], %s306_s3 }
  0x62   : > { %s4416_s26 = scalar_lea.vmem (!%p4344_p10), [#allocation3], %s3830_s17 }
  0x65   : > { %4196 = dma.done.wait (%p4336_p8), %s307_s9, 65536  }
  0x66   : > { %4198 = vsyncadd (%p4336_p8), %s307_s9, 4294901760  ;;  %s315_s27 = sand.u32 1, %s4316_s24   ;;  %s3831_s0 = sshll.u32 %s306_s3, 8 }
  0x67   : > { %s316_s28 = scalar_lea.sflag [#allocation7], %s315_s27  ;;  %s4423_s10 = scalar_lea.vmem [#allocation6], %s3831_s0 }
  0x68   : > { %4200 = dma.done.wait (%p4336_p8), %s316_s28, 4096  }
  0x69   : > { %4202 = vsyncadd (%p4336_p8), %s316_s28, 4294963200 }
  0x6a   : > { %4204 = dma.done.wait (%p58_p5), [#allocation7], 16  }
  0x6b   : > { %4206 = vsyncadd (%p58_p5), [#allocation7], 4294967280 }
  0x6c   : > { %4208 = dma.done.wait (%p58_p5), [#allocation10], 2064  }
  0x6d   : > { %4210 = vsyncadd (%p58_p5), [#allocation10], 4294965232  ;;  %p3835_p3 = scmp.ne.s32.totalorder %s4229_s21, 0 }
  0x6f   : > { %364 = sbr.rel (%p3835_p3) target bundleno = 118 (0x76), region = 64 }
  0x74   : > { %v4253_v0 = vmov 0.0  }
  0x75   : > { %365 = vst [vmem:[#allocation2] sm:$0xff] %v4253_v0 }
  0x76 PF: > { %v370_v1 = vld [vmem:[%s4416_s26 + $0x20] sm:$0xff]  ;;  %v371_v2 = vld [vmem:[%s4416_s26 + $0x28] sm:$0xff]  ;;  %v372_v6 = vld [vmem:[%s4416_s26 + $0x30] sm:$0xff]  ;;  %vm2202_vm0 = vcmask 130112   ;;  %vm2209_vm1 = vcmask 195712   ;;  %vm2216_vm2 = vcmask 261312  }
  0x77   : > { %v366_v3 = vld [vmem:[%s4416_s26] sm:$0xff]  ;;  %v884_v4 = vadd.f32 %v371_v2, %v370_v1  ;;  %v367_v5 = vld [vmem:[%s4416_s26 + $0x8] sm:$0xff]  ;;  %v373_v7 = vld [vmem:[%s4416_s26 + $0x38] sm:$0xff]  ;;  %vm2223_vm3 = vcmask 326912   ;;  %vm2230_vm4 = vcmask 392512   ;;  %vm2237_vm5 = vcmask 458112  }
  0x78   : > { %v878_v8 = vadd.f32 %v367_v5, %v366_v3  ;;  %v368_v9 = vld [vmem:[%s4416_s26 + $0x10] sm:$0xff]  ;;  %v369_v10 = vld [vmem:[%s4416_s26 + $0x18] sm:$0xff]  ;;  %v887_v11 = vadd.f32 %v373_v7, %v372_v6  ;;  %v374_v15 = vld [vmem:[%s4416_s26 + $0x40] sm:$0xff]  ;;  %vm2244_vm6 = vcmask 523712   ;;  %vm2251_vm7 = vcmask 589312   ;;  %p3836_p5 = scmp.ne.s32.totalorder %s4229_s21, 1 }
  0x79   : > { %885 = vadd.xlane.f32.xlu1 %v884_v4  ;;  %v881_v12 = vadd.f32 %v369_v10, %v368_v9  ;;  %v376_v13 = vld [vmem:[%s4416_s26 + $0x50] sm:$0xff]  ;;  %v377_v14 = vld [vmem:[%s4416_s26 + $0x58] sm:$0xff]  ;;  %v375_v16 = vld [vmem:[%s4416_s26 + $0x48] sm:$0xff]  ;;  %vm2258_vm8 = vcmask 654912   ;;  %vm2265_vm9 = vcmask 720512   ;;  %vm2272_vm10 = vcmask 786112  }
  0x7a   : > { %879 = vadd.xlane.f32.xlu0 %v878_v8  ;;  %v893_v17 = vadd.f32 %v377_v14, %v376_v13  ;;  %v890_v18 = vadd.f32 %v375_v16, %v374_v15  ;;  %v380_v19 = vld [vmem:[%s4416_s26 + $0x70] sm:$0xff]  ;;  %v381_v20 = vld [vmem:[%s4416_s26 + $0x78] sm:$0xff]  ;;  %v378_v21 = vld [vmem:[%s4416_s26 + $0x60] sm:$0xff]  ;;  %vm2279_vm11 = vcmask 851712   ;;  %vm2286_vm12 = vcmask 917312  }
  0x7b   : > { %v379_v22 = vld [vmem:[%s4416_s26 + $0x68] sm:$0xff]  ;;  %v899_v23 = vadd.f32 %v381_v20, %v380_v19  ;;  %v384_v25 = vld [vmem:[%s4416_s26 + $0x90] sm:$0xff]  ;;  %v385_v26 = vld [vmem:[%s4416_s26 + $0x98] sm:$0xff]  ;;  %vm2293_vm13 = vcmask 982912   ;;  %vm2300_vm14 = vcmask 1048512   ;;  %vm3487_vm15 = vcmask 1041409  }
  0x7c   : > { %v896_v24 = vadd.f32 %v379_v22, %v378_v21  ;;  %v382_v27 = vld [vmem:[%s4416_s26 + $0x80] sm:$0xff]  ;;  %v383_v28 = vld [vmem:[%s4416_s26 + $0x88] sm:$0xff]  ;;  %v905_v29 = vadd.f32 %v385_v26, %v384_v25  ;;  %v388_v31 = vld [vmem:[%s4416_s26 + $0xb0] sm:$0xff] }
  0x7d   : > { %888 = vadd.xlane.f32.xlu1 %v887_v11  ;;  %v902_v30 = vadd.f32 %v383_v28, %v382_v27  ;;  %v389_v32 = vld [vmem:[%s4416_s26 + $0xb8] sm:$0xff]  ;;  %v386_v33 = vld [vmem:[%s4416_s26 + $0xa0] sm:$0xff]  ;;  %v387_v34 = vld [vmem:[%s4416_s26 + $0xa8] sm:$0xff] }
  0x7e   : > { %882 = vadd.xlane.f32.xlu0 %v881_v12  ;;  %v911_v35 = vadd.f32 %v389_v32, %v388_v31  ;;  %v908_v36 = vadd.f32 %v387_v34, %v386_v33  ;;  %v392_v37 = vld [vmem:[%s4416_s26 + $0xd0] sm:$0xff]  ;;  %v393_v38 = vld [vmem:[%s4416_s26 + $0xd8] sm:$0xff]  ;;  %v390_v39 = vld [vmem:[%s4416_s26 + $0xc0] sm:$0xff] }
  0x7f   : > { %v391_v40 = vld [vmem:[%s4416_s26 + $0xc8] sm:$0xff]  ;;  %v917_v41 = vadd.f32 %v393_v38, %v392_v37  ;;  %v396_v43 = vld [vmem:[%s4416_s26 + $0xf0] sm:$0xff]  ;;  %v397_v44 = vld [vmem:[%s4416_s26 + $0xf8] sm:$0xff] }
  0x80   : > { %v914_v42 = vadd.f32 %v391_v40, %v390_v39  ;;  %v394_v45 = vld [vmem:[%s4416_s26 + $0xe0] sm:$0xff]  ;;  %v395_v46 = vld [vmem:[%s4416_s26 + $0xe8] sm:$0xff]  ;;  %v923_v47 = vadd.f32 %v397_v44, %v396_v43  ;;  %v400_v49 = vld [vmem:[%s4416_s26 + $0x110] sm:$0xff] }
  0x81   : > { %894 = vadd.xlane.f32.xlu1 %v893_v17  ;;  %v920_v48 = vadd.f32 %v395_v46, %v394_v45  ;;  %v401_v50 = vld [vmem:[%s4416_s26 + $0x118] sm:$0xff]  ;;  %v398_v51 = vld [vmem:[%s4416_s26 + $0x100] sm:$0xff]  ;;  %v399_v52 = vld [vmem:[%s4416_s26 + $0x108] sm:$0xff] }
  0x82   : > { %891 = vadd.xlane.f32.xlu0 %v890_v18  ;;  %v929_v53 = vadd.f32 %v401_v50, %v400_v49  ;;  %v926_v54 = vadd.f32 %v399_v52, %v398_v51  ;;  %v404_v55 = vld [vmem:[%s4416_s26 + $0x130] sm:$0xff]  ;;  %v405_v56 = vld [vmem:[%s4416_s26 + $0x138] sm:$0xff]  ;;  %v402_v57 = vld [vmem:[%s4416_s26 + $0x120] sm:$0xff] }
  0x83   : > { %v403_v58 = vld [vmem:[%s4416_s26 + $0x128] sm:$0xff]  ;;  %v935_v59 = vadd.f32 %v405_v56, %v404_v55  ;;  %v408_v61 = vld [vmem:[%s4416_s26 + $0x150] sm:$0xff]  ;;  %v409_v62 = vld [vmem:[%s4416_s26 + $0x158] sm:$0xff] }
  0x84   : > { %v932_v60 = vadd.f32 %v403_v58, %v402_v57  ;;  %v406_v63 = vld [vmem:[%s4416_s26 + $0x140] sm:$0xff]  ;;  %v407_v0 = vld [vmem:[%s4416_s26 + $0x148] sm:$0xff]  ;;  %v941_v1 = vadd.f32 %v409_v62, %v408_v61  ;;  %v412_v3 = vld [vmem:[%s4416_s26 + $0x170] sm:$0xff] }
  0x85   : > { %900 = vadd.xlane.f32.xlu1 %v899_v23  ;;  %v938_v2 = vadd.f32 %v407_v0, %v406_v63  ;;  %v413_v4 = vld [vmem:[%s4416_s26 + $0x178] sm:$0xff]  ;;  %v410_v5 = vld [vmem:[%s4416_s26 + $0x160] sm:$0xff]  ;;  %v411_v6 = vld [vmem:[%s4416_s26 + $0x168] sm:$0xff] }
  0x86   : > { %897 = vadd.xlane.f32.xlu0 %v896_v24  ;;  %v947_v7 = vadd.f32 %v413_v4, %v412_v3  ;;  %v944_v8 = vadd.f32 %v411_v6, %v410_v5  ;;  %v416_v9 = vld [vmem:[%s4416_s26 + $0x190] sm:$0xff]  ;;  %v417_v10 = vld [vmem:[%s4416_s26 + $0x198] sm:$0xff]  ;;  %v414_v11 = vld [vmem:[%s4416_s26 + $0x180] sm:$0xff] }
  0x87   : > { %v415_v12 = vld [vmem:[%s4416_s26 + $0x188] sm:$0xff]  ;;  %v953_v13 = vadd.f32 %v417_v10, %v416_v9  ;;  %v420_v15 = vld [vmem:[%s4416_s26 + $0x1b0] sm:$0xff]  ;;  %v421_v16 = vld [vmem:[%s4416_s26 + $0x1b8] sm:$0xff] }
  0x88   : > { %v950_v14 = vadd.f32 %v415_v12, %v414_v11  ;;  %v418_v17 = vld [vmem:[%s4416_s26 + $0x1a0] sm:$0xff]  ;;  %v419_v18 = vld [vmem:[%s4416_s26 + $0x1a8] sm:$0xff]  ;;  %v959_v19 = vadd.f32 %v421_v16, %v420_v15  ;;  %v424_v21 = vld [vmem:[%s4416_s26 + $0x1d0] sm:$0xff] }
  0x89   : > { %906 = vadd.xlane.f32.xlu1 %v905_v29  ;;  %v956_v20 = vadd.f32 %v419_v18, %v418_v17  ;;  %v425_v22 = vld [vmem:[%s4416_s26 + $0x1d8] sm:$0xff]  ;;  %v422_v23 = vld [vmem:[%s4416_s26 + $0x1c0] sm:$0xff]  ;;  %v423_v24 = vld [vmem:[%s4416_s26 + $0x1c8] sm:$0xff] }
  0x8a   : > { %903 = vadd.xlane.f32.xlu0 %v902_v30  ;;  %v965_v25 = vadd.f32 %v425_v22, %v424_v21  ;;  %v962_v26 = vadd.f32 %v423_v24, %v422_v23  ;;  %v428_v27 = vld [vmem:[%s4416_s26 + $0x1f0] sm:$0xff]  ;;  %v429_v28 = vld [vmem:[%s4416_s26 + $0x1f8] sm:$0xff]  ;;  %v426_v29 = vld [vmem:[%s4416_s26 + $0x1e0] sm:$0xff] }
  0x8b   : > { %v427_v30 = vld [vmem:[%s4416_s26 + $0x1e8] sm:$0xff]  ;;  %v971_v31 = vadd.f32 %v429_v28, %v428_v27  ;;  %v432_v33 = vld [vmem:[%s4416_s26 + $0x210] sm:$0xff]  ;;  %v433_v34 = vld [vmem:[%s4416_s26 + $0x218] sm:$0xff] }
  0x8c   : > { %v968_v32 = vadd.f32 %v427_v30, %v426_v29  ;;  %v977_v37 = vadd.f32 %v433_v34, %v432_v33  ;;  %v436_v39 = vld [vmem:[%s4416_s26 + $0x230] sm:$0xff]  ;;  %v437_v40 = vld [vmem:[%s4416_s26 + $0x238] sm:$0xff] }
  0x8d   : > { %912 = vadd.xlane.f32.xlu1 %v911_v35  ;;  %v430_v35 = vld [vmem:[%s4416_s26 + $0x200] sm:$0xff]  ;;  %v983_v43 = vadd.f32 %v437_v40, %v436_v39  ;;  %v440_v45 = vld [vmem:[%s4416_s26 + $0x250] sm:$0xff]  ;;  %v441_v46 = vld [vmem:[%s4416_s26 + $0x258] sm:$0xff] }
  0x8e   : > { %909 = vadd.xlane.f32.xlu0 %v908_v36  ;;  %v431_v36 = vld [vmem:[%s4416_s26 + $0x208] sm:$0xff]  ;;  %v989_v49 = vadd.f32 %v441_v46, %v440_v45  ;;  %v444_v51 = vld [vmem:[%s4416_s26 + $0x270] sm:$0xff]  ;;  %v445_v52 = vld [vmem:[%s4416_s26 + $0x278] sm:$0xff] }
  0x8f   : > { %v974_v38 = vadd.f32 %v431_v36, %v430_v35  ;;  %v995_v55 = vadd.f32 %v445_v52, %v444_v51  ;;  %v448_v57 = vld [vmem:[%s4416_s26 + $0x290] sm:$0xff]  ;;  %v449_v58 = vld [vmem:[%s4416_s26 + $0x298] sm:$0xff] }
  0x90   : > { %v1001_v61 = vadd.f32 %v449_v58, %v448_v57  ;;  %v452_v63 = vld [vmem:[%s4416_s26 + $0x2b0] sm:$0xff]  ;;  %v453_v0 = vld [vmem:[%s4416_s26 + $0x2b8] sm:$0xff] }
  0x91   : > { %918 = vadd.xlane.f32.xlu1 %v917_v41  ;;  %v434_v41 = vld [vmem:[%s4416_s26 + $0x220] sm:$0xff]  ;;  %v1007_v3 = vadd.f32 %v453_v0, %v452_v63  ;;  %v456_v5 = vld [vmem:[%s4416_s26 + $0x2d0] sm:$0xff]  ;;  %v457_v6 = vld [vmem:[%s4416_s26 + $0x2d8] sm:$0xff] }
  0x92   : > { %915 = vadd.xlane.f32.xlu0 %v914_v42  ;;  %v435_v42 = vld [vmem:[%s4416_s26 + $0x228] sm:$0xff]  ;;  %v1013_v9 = vadd.f32 %v457_v6, %v456_v5  ;;  %v460_v11 = vld [vmem:[%s4416_s26 + $0x2f0] sm:$0xff]  ;;  %v461_v12 = vld [vmem:[%s4416_s26 + $0x2f8] sm:$0xff] }
  0x93   : > { %v980_v44 = vadd.f32 %v435_v42, %v434_v41  ;;  %v1019_v15 = vadd.f32 %v461_v12, %v460_v11  ;;  %v464_v17 = vld [vmem:[%s4416_s26 + $0x310] sm:$0xff]  ;;  %v465_v18 = vld [vmem:[%s4416_s26 + $0x318] sm:$0xff] }
  0x94   : > { %v1025_v21 = vadd.f32 %v465_v18, %v464_v17  ;;  %v468_v23 = vld [vmem:[%s4416_s26 + $0x330] sm:$0xff]  ;;  %v469_v24 = vld [vmem:[%s4416_s26 + $0x338] sm:$0xff]  ;;  %v2191_v17 = vlaneseq }
  0x95   : > { %924 = vadd.xlane.f32.xlu1 %v923_v47  ;;  %v438_v47 = vld [vmem:[%s4416_s26 + $0x240] sm:$0xff]  ;;  %v1031_v27 = vadd.f32 %v469_v24, %v468_v23  ;;  %v472_v29 = vld [vmem:[%s4416_s26 + $0x350] sm:$0xff]  ;;  %v473_v30 = vld [vmem:[%s4416_s26 + $0x358] sm:$0xff] }
  0x96   : > { %921 = vadd.xlane.f32.xlu0 %v920_v48  ;;  %v439_v48 = vld [vmem:[%s4416_s26 + $0x248] sm:$0xff]  ;;  %v1037_v33 = vadd.f32 %v473_v30, %v472_v29  ;;  %v476_v35 = vld [vmem:[%s4416_s26 + $0x370] sm:$0xff]  ;;  %v477_v36 = vld [vmem:[%s4416_s26 + $0x378] sm:$0xff] }
  0x97   : > { %v986_v50 = vadd.f32 %v439_v48, %v438_v47  ;;  %v1043_v39 = vadd.f32 %v477_v36, %v476_v35  ;;  %v480_v41 = vld [vmem:[%s4416_s26 + $0x390] sm:$0xff]  ;;  %v481_v42 = vld [vmem:[%s4416_s26 + $0x398] sm:$0xff]  ;;  %v506_v23 = vld [vmem:[%s4416_s26 + $0x460] sm:$0xff] }
  0x98   : > { %v1049_v45 = vadd.f32 %v481_v42, %v480_v41  ;;  %v484_v47 = vld [vmem:[%s4416_s26 + $0x3b0] sm:$0xff]  ;;  %v485_v48 = vld [vmem:[%s4416_s26 + $0x3b8] sm:$0xff]  ;;  %v507_v24 = vld [vmem:[%s4416_s26 + $0x468] sm:$0xff] }
  0x99   : > { %930 = vadd.xlane.f32.xlu1 %v929_v53  ;;  %v442_v53 = vld [vmem:[%s4416_s26 + $0x260] sm:$0xff]  ;;  %v1055_v51 = vadd.f32 %v485_v48, %v484_v47  ;;  %v511_v36 = vld [vmem:[%s4416_s26 + $0x488] sm:$0xff]  ;;  %v517_v47 = vld [vmem:[%s4416_s26 + $0x4b8] sm:$0xff] }
  0x9a   : > { %927 = vadd.xlane.f32.xlu0 %v926_v54  ;;  %v443_v54 = vld [vmem:[%s4416_s26 + $0x268] sm:$0xff]  ;;  %v510_v35 = vld [vmem:[%s4416_s26 + $0x480] sm:$0xff] }
  0x9b   : > { %v992_v56 = vadd.f32 %v443_v54, %v442_v53  ;;  %v488_v53 = vld [vmem:[%s4416_s26 + $0x3d0] sm:$0xff]  ;;  %v489_v54 = vld [vmem:[%s4416_s26 + $0x3d8] sm:$0xff] }
  0x9c   : > { %v1061_v57 = vadd.f32 %v489_v54, %v488_v53  ;;  %v515_v53 = vld [vmem:[%s4416_s26 + $0x4a8] sm:$0xff] }
  0x9d   : > { %936 = vadd.xlane.f32.xlu1 %v935_v59  ;;  %v446_v59 = vld [vmem:[%s4416_s26 + $0x280] sm:$0xff] }
  0x9e   : > { %933 = vadd.xlane.f32.xlu0 %v932_v60  ;;  %v447_v60 = vld [vmem:[%s4416_s26 + $0x288] sm:$0xff] }
  0x9f   : > { %v998_v62 = vadd.f32 %v447_v60, %v446_v59  ;;  %v492_v59 = vld [vmem:[%s4416_s26 + $0x3f0] sm:$0xff]  ;;  %v493_v60 = vld [vmem:[%s4416_s26 + $0x3f8] sm:$0xff] }
  0xa0   : > { %v1067_v63 = vadd.f32 %v493_v60, %v492_v59 }
  0xa1   : > { %942 = vadd.xlane.f32.xlu1 %v941_v1  ;;  %v450_v1 = vld [vmem:[%s4416_s26 + $0x2a0] sm:$0xff] }
  0xa2   : > { %939 = vadd.xlane.f32.xlu0 %v938_v2  ;;  %v451_v2 = vld [vmem:[%s4416_s26 + $0x2a8] sm:$0xff] }
  0xa3   : > { %v1004_v4 = vadd.f32 %v451_v2, %v450_v1  ;;  %v496_v1 = vld [vmem:[%s4416_s26 + $0x410] sm:$0xff]  ;;  %v497_v2 = vld [vmem:[%s4416_s26 + $0x418] sm:$0xff] }
  0xa4   : > { %v1073_v5 = vadd.f32 %v497_v2, %v496_v1  ;;  %v520_v1 = vld [vmem:[%s4416_s26 + $0x4d0] sm:$0xff]  ;;  %v521_v2 = vld [vmem:[%s4416_s26 + $0x4d8] sm:$0xff] }
  0xa5   : > { %948 = vadd.xlane.f32.xlu1 %v947_v7  ;;  %v454_v7 = vld [vmem:[%s4416_s26 + $0x2c0] sm:$0xff] }
  0xa6   : > { %945 = vadd.xlane.f32.xlu0 %v944_v8  ;;  %v455_v8 = vld [vmem:[%s4416_s26 + $0x2c8] sm:$0xff] }
  0xa7   : > { %v1010_v10 = vadd.f32 %v455_v8, %v454_v7  ;;  %v500_v7 = vld [vmem:[%s4416_s26 + $0x430] sm:$0xff]  ;;  %v501_v8 = vld [vmem:[%s4416_s26 + $0x438] sm:$0xff] }
  0xa8   : > { %v1079_v11 = vadd.f32 %v501_v8, %v500_v7  ;;  %v519_v7 = vld [vmem:[%s4416_s26 + $0x4c8] sm:$0xff] }
  0xa9   : > { %954 = vadd.xlane.f32.xlu1 %v953_v13  ;;  %v458_v13 = vld [vmem:[%s4416_s26 + $0x2e0] sm:$0xff] }
  0xaa   : > { %951 = vadd.xlane.f32.xlu0 %v950_v14  ;;  %v459_v14 = vld [vmem:[%s4416_s26 + $0x2e8] sm:$0xff] }
  0xab   : > { %v1016_v16 = vadd.f32 %v459_v14, %v458_v13  ;;  %v504_v13 = vld [vmem:[%s4416_s26 + $0x450] sm:$0xff]  ;;  %v505_v14 = vld [vmem:[%s4416_s26 + $0x458] sm:$0xff] }
  0xac   : > { %v1085_v18 = vadd.f32 %v505_v14, %v504_v13 }
  0xad   : > { %960 = vadd.xlane.f32.xlu1 %v959_v19  ;;  %v462_v19 = vld [vmem:[%s4416_s26 + $0x300] sm:$0xff] }
  0xae   : > { %957 = vadd.xlane.f32.xlu0 %v956_v20  ;;  %v463_v20 = vld [vmem:[%s4416_s26 + $0x308] sm:$0xff] }
  0xaf   : > { %v1022_v22 = vadd.f32 %v463_v20, %v462_v19  ;;  %v508_v20 = vld [vmem:[%s4416_s26 + $0x470] sm:$0xff] }
  0xb1   : > { %966 = vadd.xlane.f32.xlu1 %v965_v25  ;;  %v466_v25 = vld [vmem:[%s4416_s26 + $0x320] sm:$0xff] }
  0xb2   : > { %963 = vadd.xlane.f32.xlu0 %v962_v26  ;;  %v467_v26 = vld [vmem:[%s4416_s26 + $0x328] sm:$0xff] }
  0xb3   : > { %v1028_v28 = vadd.f32 %v467_v26, %v466_v25  ;;  %v4584_v25 = vshrl.u32 %v2191_v17, 7 }
  0xb5   : > { %972 = vadd.xlane.f32.xlu1 %v971_v31  ;;  %v470_v31 = vld [vmem:[%s4416_s26 + $0x340] sm:$0xff] }
  0xb6   : > { %969 = vadd.xlane.f32.xlu0 %v968_v32  ;;  %v471_v32 = vld [vmem:[%s4416_s26 + $0x348] sm:$0xff] }
  0xb7   : > { %v1034_v34 = vadd.f32 %v471_v32, %v470_v31  ;;  %v512_v31 = vld [vmem:[%s4416_s26 + $0x490] sm:$0xff]  ;;  %v513_v32 = vld [vmem:[%s4416_s26 + $0x498] sm:$0xff] }
  0xb9   : > { %978 = vadd.xlane.f32.xlu1 %v977_v37  ;;  %v474_v37 = vld [vmem:[%s4416_s26 + $0x360] sm:$0xff] }
  0xba   : > { %975 = vadd.xlane.f32.xlu0 %v974_v38  ;;  %v475_v38 = vld [vmem:[%s4416_s26 + $0x368] sm:$0xff] }
  0xbb   : > { %v1040_v40 = vadd.f32 %v475_v38, %v474_v37 }
  0xbd   : > { %984 = vadd.xlane.f32.xlu1 %v983_v43  ;;  %v478_v43 = vld [vmem:[%s4416_s26 + $0x380] sm:$0xff] }
  0xbe   : > { %981 = vadd.xlane.f32.xlu0 %v980_v44  ;;  %v479_v44 = vld [vmem:[%s4416_s26 + $0x388] sm:$0xff] }
  0xbf   : > { %v1046_v46 = vadd.f32 %v479_v44, %v478_v43 }
  0xc1   : > { %990 = vadd.xlane.f32.xlu1 %v989_v49  ;;  %v482_v49 = vld [vmem:[%s4416_s26 + $0x3a0] sm:$0xff] }
  0xc2   : > { %987 = vadd.xlane.f32.xlu0 %v986_v50  ;;  %v483_v50 = vld [vmem:[%s4416_s26 + $0x3a8] sm:$0xff] }
  0xc3   : > { %v1052_v52 = vadd.f32 %v483_v50, %v482_v49 }
  0xc5   : > { %996 = vadd.xlane.f32.xlu1 %v995_v55  ;;  %v486_v55 = vld [vmem:[%s4416_s26 + $0x3c0] sm:$0xff] }
  0xc6   : > { %993 = vadd.xlane.f32.xlu0 %v992_v56  ;;  %v487_v56 = vld [vmem:[%s4416_s26 + $0x3c8] sm:$0xff] }
  0xc7   : > { %v1058_v58 = vadd.f32 %v487_v56, %v486_v55 }
  0xc9   : > { %1002 = vadd.xlane.f32.xlu1 %v1001_v61  ;;  %v490_v61 = vld [vmem:[%s4416_s26 + $0x3e0] sm:$0xff] }
  0xca   : > { %999 = vadd.xlane.f32.xlu0 %v998_v62  ;;  %v491_v62 = vld [vmem:[%s4416_s26 + $0x3e8] sm:$0xff] }
  0xcb   : > { %v1064_v0 = vadd.f32 %v491_v62, %v490_v61 }
  0xcd   : > { %1008 = vadd.xlane.f32.xlu1 %v1007_v3  ;;  %v494_v3 = vld [vmem:[%s4416_s26 + $0x400] sm:$0xff] }
  0xce   : > { %1005 = vadd.xlane.f32.xlu0 %v1004_v4  ;;  %v495_v4 = vld [vmem:[%s4416_s26 + $0x408] sm:$0xff] }
  0xcf   : > { %v1070_v6 = vadd.f32 %v495_v4, %v494_v3 }
  0xd1   : > { %1014 = vadd.xlane.f32.xlu1 %v1013_v9  ;;  %v498_v9 = vld [vmem:[%s4416_s26 + $0x420] sm:$0xff] }
  0xd2   : > { %1011 = vadd.xlane.f32.xlu0 %v1010_v10  ;;  %v499_v10 = vld [vmem:[%s4416_s26 + $0x428] sm:$0xff] }
  0xd3   : > { %v1076_v12 = vadd.f32 %v499_v10, %v498_v9 }
  0xd5   : > { %1020 = vadd.xlane.f32.xlu1 %v1019_v15  ;;  %v502_v15 = vld [vmem:[%s4416_s26 + $0x440] sm:$0xff] }
  0xd6   : > { %1017 = vadd.xlane.f32.xlu0 %v1016_v16  ;;  %v503_v16 = vld [vmem:[%s4416_s26 + $0x448] sm:$0xff] }
  0xd7   : > { %v1082_v19 = vadd.f32 %v503_v16, %v502_v15  ;;  %v1109_v15 = vadd.f32 %v521_v2, %v520_v1  ;;  %v532_v1 = vld [vmem:[%s4416_s26 + $0x530] sm:$0xff]  ;;  %v533_v2 = vld [vmem:[%s4416_s26 + $0x538] sm:$0xff] }
  0xd9   : > { %1026 = vadd.xlane.f32.xlu1 %v1025_v21  ;;  %v509_v21 = vld [vmem:[%s4416_s26 + $0x478] sm:$0xff] }
  0xda   : > { %1023 = vadd.xlane.f32.xlu0 %v1022_v22  ;;  %v4580_v22 = vand.u32 127, %v2191_v17  ;;  %v1091_v26 = vadd.f32 %v509_v21, %v508_v20  ;;  %v524_v21 = vld [vmem:[%s4416_s26 + $0x4f0] sm:$0xff] }
  0xdc   : > { %v2211_v29 = vadd.s32 4294967272, %v4580_v22  ;;  %v2197_v30 = vadd.s32 4294967288, %v4580_v22  ;;  %v2218_v37 = vadd.s32 4294967264, %v4580_v22  ;;  %v4596_v38 = vsub.s32 %v4580_v22, %v4584_v25 }
  0xdd   : > { %1032 = vadd.xlane.f32.xlu1 %v1031_v27  ;;  %v2232_v56 = vadd.s32 4294967248, %v4580_v22  ;;  %v2239_v59 = vadd.s32 4294967240, %v4580_v22  ;;  %v2246_v20 = vadd.s32 4294967232, %v4580_v22 }
  0xde   : > { %1029 = vadd.xlane.f32.xlu0 %v1028_v28  ;;  %v1088_v28 = vadd.f32 %v507_v24, %v506_v23  ;;  %v4600_v42 = vsub.s32 %v2211_v29, %v4584_v25  ;;  %v4603_v44 = vsub.s32 %v2197_v30, %v4584_v25  ;;  %v4613_v55 = vsub.s32 %v2218_v37, %v4584_v25  ;;  %v525_v23 = vld [vmem:[%s4416_s26 + $0x4f8] sm:$0xff] }
  0xdf   : > { %v4630_v10 = vsub.s32 %v2232_v56, %v4584_v25  ;;  %v4636_v14 = vsub.s32 %v2239_v59, %v4584_v25 }
  0xe1   : > { %1038 = vadd.xlane.f32.xlu1 %v1037_v33  ;;  %v2204_v33 = vadd.s32 4294967280, %v4580_v22 }
  0xe2   : > { %1035 = vadd.xlane.f32.xlu0 %v1034_v34 }
  0xe3   : > { %v4608_v48 = vsub.s32 %v2204_v33, %v4584_v25 }
  0xe5   : > { %1044 = vadd.xlane.f32.xlu1 %v1043_v39  ;;  %v1097_v39 = vadd.f32 %v513_v32, %v512_v31 }
  0xe6   : > { %1041 = vadd.xlane.f32.xlu0 %v1040_v40  ;;  %v2225_v40 = vadd.s32 4294967256, %v4580_v22 }
  0xe9   : > { %1050 = vadd.xlane.f32.xlu1 %v1049_v45  ;;  %v1094_v45 = vadd.f32 %v511_v36, %v510_v35  ;;  %v2267_v35 = vadd.s32 4294967208, %v4580_v22 }
  0xea   : > { %1047 = vadd.xlane.f32.xlu0 %v1046_v46  ;;  %v516_v46 = vld [vmem:[%s4416_s26 + $0x4b0] sm:$0xff] }
  0xed   : > { %1056 = vadd.xlane.f32.xlu1 %v1055_v51 }
  0xee   : > { %1053 = vadd.xlane.f32.xlu0 %v1052_v52  ;;  %v514_v52 = vld [vmem:[%s4416_s26 + $0x4a0] sm:$0xff] }
  0xf1   : > { %1062 = vadd.xlane.f32.xlu1 %v1061_v57  ;;  %v4617_v57 = vsub.s32 %v2225_v40, %v4584_v25 }
  0xf2   : > { %1059 = vadd.xlane.f32.xlu0 %v1058_v58  ;;  %v1103_v58 = vadd.f32 %v517_v47, %v516_v46 }
  0xf5   : > { %1068 = vadd.xlane.f32.xlu1 %v1067_v63 }
  0xf6   : > { %1065 = vadd.xlane.f32.xlu0 %v1064_v0  ;;  %v1100_v0 = vadd.f32 %v515_v53, %v514_v52  ;;  %v2281_v53 = vadd.s32 4294967192, %v4580_v22 }
  0xf9   : > { %1074 = vadd.xlane.f32.xlu1 %v1073_v5 }
  0xfa   : > { %1071 = vadd.xlane.f32.xlu0 %v1070_v6  ;;  %v518_v6 = vld [vmem:[%s4416_s26 + $0x4c0] sm:$0xff] }
  0xfd   : > { %1080 = vadd.xlane.f32.xlu1 %v1079_v11  ;;  %v2253_v11 = vadd.s32 4294967224, %v4580_v22 }
  0xfe   : > { %1077 = vadd.xlane.f32.xlu0 %v1076_v12 }
  0xff   : > { %v4647_v31 = vsub.s32 %v2253_v11, %v4584_v25 }
 0x101   : > { %1086 = vadd.xlane.f32.xlu1 %v1085_v18 }
 0x102   : > { %1083 = vadd.xlane.f32.xlu0 %v1082_v19  ;;  %v886_v27 = vpop.xlane.xlu1 %885  ;;  %v1106_v19 = vadd.f32 %v519_v7, %v518_v6  ;;  %v531_v6 = vld [vmem:[%s4416_s26 + $0x528] sm:$0xff] }
 0x103   : > { %v880_v34 = vpop.xlane.xlu0 %879  ;;  %v1648_v49 = vmul.f32 0.00390625, %v886_v27  ;;  %v522_v27 = vld [vmem:[%s4416_s26 + $0x4e0] sm:$0xff] }
 0x104   : > { %v1646_v41 = vmul.f32 0.00390625, %v880_v34  ;;  %v1115_v34 = vadd.f32 %v525_v23, %v524_v21  ;;  %v536_v21 = vld [vmem:[%s4416_s26 + $0x550] sm:$0xff]  ;;  %v537_v23 = vld [vmem:[%s4416_s26 + $0x558] sm:$0xff] }
 0x105   : > { %1092 = vadd.xlane.f32.xlu1 %v1091_v26  ;;  %v2208_v3 = vrot.slane %v1648_v49, %v4608_v48  ;;  %v526_v49 = vld [vmem:[%s4416_s26 + $0x500] sm:$0xff] }
 0x106   : > { %1089 = vadd.xlane.f32.xlu0 %v1088_v28  ;;  %v889_v43 = vpop.xlane.xlu1 %888  ;;  %v2196_v60 = vrot.slane %v1646_v41, %v4596_v38  ;;  %v523_v28 = vld [vmem:[%s4416_s26 + $0x4e8] sm:$0xff]  ;;  %v2260_v41 = vadd.s32 4294967216, %v4580_v22 }
 0x107   : > { %v1649_v50 = vmul.f32 0.00390625, %v889_v43  ;;  %v883_v51 = vpop.xlane.xlu0 %882  ;;  %v1112_v40 = vadd.f32 %v523_v28, %v522_v27  ;;  %v528_v43 = vld [vmem:[%s4416_s26 + $0x510] sm:$0xff]  ;;  %v534_v27 = vld [vmem:[%s4416_s26 + $0x540] sm:$0xff]  ;;  %v535_v28 = vld [vmem:[%s4416_s26 + $0x548] sm:$0xff] }
 0x108   : > { %v1647_v54 = vmul.f32 0.00390625, %v883_v51 }
 0x109   : > { %1098 = vadd.xlane.f32.xlu1 %v1097_v39  ;;  %v2215_v61 = vrot.slane %v1649_v50, %v4600_v42  ;;  %v4654_v39 = vsub.s32 %v2246_v20, %v4584_v25  ;;  %v527_v50 = vld [vmem:[%s4416_s26 + $0x508] sm:$0xff]  ;;  %v2288_v20 = vadd.s32 4294967184, %v4580_v22 }
 0x10a   : > { %v2201_v62 = vrot.slane %v1647_v54, %v4603_v44  ;;  %1095 = vadd.xlane.f32.xlu0 %v1094_v45  ;;  %v895_v63 = vpop.xlane.xlu1 %894  ;;  %v529_v45 = vld [vmem:[%s4416_s26 + $0x518] sm:$0xff] }
 0x10b   : > { %v1651_v4 = vmul.f32 0.00390625, %v895_v63  ;;  %v892_v5 = vpop.xlane.xlu0 %891  ;;  %v1121_v59 = vadd.f32 %v529_v45, %v528_v43  ;;  %v1118_v63 = vadd.f32 %v527_v50, %v526_v49  ;;  %v541_v43 = vld [vmem:[%s4416_s26 + $0x578] sm:$0xff]  ;;  %v539_v49 = vld [vmem:[%s4416_s26 + $0x568] sm:$0xff] }
 0x10c   : > { %v2203_v8 = vsel %vm2202_vm0, %v2201_v62, %v2196_v60  ;;  %v1650_v9 = vmul.f32 0.00390625, %v892_v5  ;;  %v4670_v62 = vsub.s32 %v2260_v41, %v4584_v25  ;;  %v530_v5 = vld [vmem:[%s4416_s26 + $0x520] sm:$0xff]  ;;  %v540_v41 = vld [vmem:[%s4416_s26 + $0x570] sm:$0xff] }
 0x10d   : > { %v2210_v12 = vsel %vm2209_vm1, %v2208_v3, %v2203_v8  ;;  %v2229_v13 = vrot.slane %v1651_v4, %v4617_v57  ;;  %1104 = vadd.xlane.f32.xlu1 %v1103_v58  ;;  %v4666_v58 = vsub.s32 %v2267_v35, %v4584_v25 }
 0x10e   : > { %v2217_v16 = vsel %vm2216_vm2, %v2215_v61, %v2210_v12  ;;  %v2222_v17 = vrot.slane %v1650_v9, %v4613_v55  ;;  %1101 = vadd.xlane.f32.xlu0 %v1100_v0  ;;  %v901_v18 = vpop.xlane.xlu1 %900  ;;  %v2274_v0 = vadd.s32 4294967200, %v4580_v22  ;;  %v4679_v9 = vsub.s32 %v2281_v53, %v4584_v25 }
 0x10f   : > { %v1653_v24 = vmul.f32 0.00390625, %v901_v18  ;;  %v898_v26 = vpop.xlane.xlu0 %897 }
 0x110   : > { %v2224_v29 = vsel %vm2223_vm3, %v2222_v17, %v2217_v16  ;;  %v1652_v30 = vmul.f32 0.00390625, %v898_v26  ;;  %v4686_v18 = vsub.s32 %v2274_v0, %v4584_v25 }
 0x111   : > { %v2243_v32 = vrot.slane %v1653_v24, %v4636_v14  ;;  %v2231_v33 = vsel %vm2230_vm4, %v2229_v13, %v2224_v29  ;;  %1110 = vadd.xlane.f32.xlu1 %v1109_v15  ;;  %v1127_v13 = vadd.f32 %v533_v2, %v532_v1  ;;  %v2295_v15 = vadd.s32 4294967176, %v4580_v22  ;;  %v542_v1 = vld [vmem:[%s4416_s26 + $0x580] sm:$0xff]  ;;  %v543_v2 = vld [vmem:[%s4416_s26 + $0x588] sm:$0xff] }
 0x112   : > { %v2236_v36 = vrot.slane %v1652_v30, %v4630_v10  ;;  %1107 = vadd.xlane.f32.xlu0 %v1106_v19  ;;  %v907_v37 = vpop.xlane.xlu1 %906  ;;  %v1124_v19 = vadd.f32 %v531_v6, %v530_v5 }
 0x113   : > { %v1655_v46 = vmul.f32 0.00390625, %v907_v37  ;;  %v904_v47 = vpop.xlane.xlu0 %903  ;;  %v4697_v22 = vsub.s32 %v2295_v15, %v4584_v25  ;;  %v4701_v37 = vsub.s32 %v2288_v20, %v4584_v25  ;;  %v1139_v25 = vadd.f32 %v541_v43, %v540_v41  ;;  %v549_v15 = vld [vmem:[%s4416_s26 + $0x5b8] sm:$0xff]  ;;  %v547_v20 = vld [vmem:[%s4416_s26 + $0x5a8] sm:$0xff] }
 0x114   : > { %v2238_v51 = vsel %vm2237_vm5, %v2236_v36, %v2231_v33  ;;  %v1654_v52 = vmul.f32 0.00390625, %v904_v47  ;;  %v538_v47 = vld [vmem:[%s4416_s26 + $0x560] sm:$0xff] }
 0x115   : > { %v2257_v54 = vrot.slane %v1655_v46, %v4647_v31  ;;  %v2245_v56 = vsel %vm2244_vm6, %v2243_v32, %v2238_v51  ;;  %1116 = vadd.xlane.f32.xlu1 %v1115_v34  ;;  %v1133_v34 = vadd.f32 %v537_v23, %v536_v21 }
 0x116   : > { %v2250_v60 = vrot.slane %v1654_v52, %v4654_v39  ;;  %1113 = vadd.xlane.f32.xlu0 %v1112_v40  ;;  %v913_v61 = vpop.xlane.xlu1 %912  ;;  %v1130_v40 = vadd.f32 %v535_v28, %v534_v27 }
 0x117   : > { %v1657_v3 = vmul.f32 0.00390625, %v913_v61  ;;  %v910_v4 = vpop.xlane.xlu0 %909  ;;  %v545_v61 = vld [vmem:[%s4416_s26 + $0x598] sm:$0xff] }
 0x118   : > { %v2252_v7 = vsel %vm2251_vm7, %v2250_v60, %v2245_v56  ;;  %v1656_v8 = vmul.f32 0.00390625, %v910_v4  ;;  %v544_v60 = vld [vmem:[%s4416_s26 + $0x590] sm:$0xff] }
 0x119   : > { %v2271_v11 = vrot.slane %v1657_v3, %v4666_v58  ;;  %v2259_v12 = vsel %vm2258_vm8, %v2257_v54, %v2252_v7  ;;  %1122 = vadd.xlane.f32.xlu1 %v1121_v59  ;;  %v1136_v59 = vadd.f32 %v539_v49, %v538_v47  ;;  %v1145_v7 = vadd.f32 %v545_v61, %v544_v60 }
 0x11a   : > { %v2264_v16 = vrot.slane %v1656_v8, %v4670_v62  ;;  %1119 = vadd.xlane.f32.xlu0 %v1118_v63  ;;  %v919_v17 = vpop.xlane.xlu1 %918 }
 0x11b   : > { %v1659_v24 = vmul.f32 0.00390625, %v919_v17  ;;  %v916_v26 = vpop.xlane.xlu0 %915 }
 0x11c   : > { %v2266_v29 = vsel %vm2265_vm9, %v2264_v16, %v2259_v12  ;;  %v1658_v30 = vmul.f32 0.00390625, %v916_v26  ;;  %v1142_v12 = vadd.f32 %v543_v2, %v542_v1 }
 0x11d   : > { %v2285_v32 = vrot.slane %v1659_v24, %v4679_v9  ;;  %v2273_v33 = vsel %vm2272_vm10, %v2271_v11, %v2266_v29  ;;  %1128 = vadd.xlane.f32.xlu1 %v1127_v13  ;;  %v548_v13 = vld [vmem:[%s4416_s26 + $0x5b0] sm:$0xff] }
 0x11e   : > { %v2278_v35 = vrot.slane %v1658_v30, %v4686_v18  ;;  %1125 = vadd.xlane.f32.xlu0 %v1124_v19  ;;  %v925_v36 = vpop.xlane.xlu1 %924  ;;  %v546_v19 = vld [vmem:[%s4416_s26 + $0x5a0] sm:$0xff]  ;;  %v1151_v26 = vadd.f32 %v549_v15, %v548_v13  ;;  %v552_v30 = vld [vmem:[%s4416_s26 + $0x5d0] sm:$0xff] }
 0x11f   : > { %v1661_v45 = vmul.f32 0.00390625, %v925_v36  ;;  %v922_v46 = vpop.xlane.xlu0 %921  ;;  %v1148_v29 = vadd.f32 %v547_v20, %v546_v19  ;;  %v551_v36 = vld [vmem:[%s4416_s26 + $0x5c8] sm:$0xff] }
 0x120   : > { %v2280_v50 = vsel %vm2279_vm11, %v2278_v35, %v2273_v33  ;;  %v1660_v51 = vmul.f32 0.00390625, %v922_v46  ;;  %v550_v35 = vld [vmem:[%s4416_s26 + $0x5c0] sm:$0xff] }
 0x121   : > { %v2299_v52 = vrot.slane %v1661_v45, %v4697_v22  ;;  %v2287_v53 = vsel %vm2286_vm12, %v2285_v32, %v2280_v50  ;;  %1134 = vadd.xlane.f32.xlu1 %v1133_v34  ;;  %v553_v32 = vld [vmem:[%s4416_s26 + $0x5d8] sm:$0xff]  ;;  %v1154_v50 = vadd.f32 %v551_v36, %v550_v35 }
 0x122   : > { %v2292_v54 = vrot.slane %v1660_v51, %v4701_v37  ;;  %1131 = vadd.xlane.f32.xlu0 %v1130_v40  ;;  %v931_v56 = vpop.xlane.xlu1 %930  ;;  %v1157_v46 = vadd.f32 %v553_v32, %v552_v30  ;;  %v556_v51 = vld [vmem:[%s4416_s26 + $0x5f0] sm:$0xff]  ;;  %v563_v30 = vld [vmem:[%s4416_s26 + $0x628] sm:$0xff] }
 0x123   : > { %v1663_v63 = vmul.f32 0.00390625, %v931_v56  ;;  %v928_v0 = vpop.xlane.xlu0 %927  ;;  %v555_v56 = vld [vmem:[%s4416_s26 + $0x5e8] sm:$0xff] }
 0x124   : > { %v2294_v3 = vsel %vm2293_vm13, %v2292_v54, %v2287_v53  ;;  %v1662_v4 = vmul.f32 0.00390625, %v928_v0  ;;  %v554_v54 = vld [vmem:[%s4416_s26 + $0x5e0] sm:$0xff] }
 0x125   : > { %v4717_v5 = vsel %vm2300_vm14, %v2299_v52, %v2294_v3  ;;  %v2309_v6 = vrot.slane %v1663_v63, %v4603_v44  ;;  %1140 = vadd.xlane.f32.xlu1 %v1139_v25  ;;  %v557_v52 = vld [vmem:[%s4416_s26 + $0x5f8] sm:$0xff]  ;;  %v1160_v3 = vadd.f32 %v555_v56, %v554_v54 }
 0x126   : > { %v2305_v8 = vrot.slane %v1662_v4, %v4596_v38  ;;  %1137 = vadd.xlane.f32.xlu0 %v1136_v59  ;;  %v937_v11 = vpop.xlane.xlu1 %936  ;;  %v1163_v0 = vadd.f32 %v557_v52, %v556_v51  ;;  %v560_v4 = vld [vmem:[%s4416_s26 + $0x610] sm:$0xff]  ;;  %v567_v51 = vld [vmem:[%s4416_s26 + $0x648] sm:$0xff] }
 0x127   : > { %v1665_v16 = vmul.f32 0.00390625, %v937_v11  ;;  %v934_v17 = vpop.xlane.xlu0 %933  ;;  %v558_v11 = vld [vmem:[%s4416_s26 + $0x600] sm:$0xff] }
 0x128   : > { %v2310_v21 = vsel %vm2202_vm0, %v2309_v6, %v2305_v8  ;;  %v1664_v23 = vmul.f32 0.00390625, %v934_v17  ;;  %v561_v6 = vld [vmem:[%s4416_s26 + $0x618] sm:$0xff] }
 0x129   : > { %v2319_v24 = vrot.slane %v1665_v16, %v4600_v42  ;;  %1146 = vadd.xlane.f32.xlu1 %v1145_v7  ;;  %v1169_v19 = vadd.f32 %v561_v6, %v560_v4  ;;  %v571_v4 = vld [vmem:[%s4416_s26 + $0x668] sm:$0xff] }
 0x12a   : > { %v2314_v27 = vrot.slane %v1664_v23, %v4608_v48  ;;  %1143 = vadd.xlane.f32.xlu0 %v1142_v12  ;;  %v943_v28 = vpop.xlane.xlu1 %942  ;;  %v559_v12 = vld [vmem:[%s4416_s26 + $0x608] sm:$0xff] }
 0x12b   : > { %v1667_v33 = vmul.f32 0.00390625, %v943_v28  ;;  %v940_v34 = vpop.xlane.xlu0 %939  ;;  %v1166_v23 = vadd.f32 %v559_v12, %v558_v11 }
 0x12c   : > { %v2315_v40 = vsel %vm2209_vm1, %v2314_v27, %v2310_v21  ;;  %v1666_v41 = vmul.f32 0.00390625, %v940_v34 }
 0x12d   : > { %v2329_v43 = vrot.slane %v1667_v33, %v4617_v57  ;;  %v2320_v45 = vsel %vm2216_vm2, %v2319_v24, %v2315_v40  ;;  %1152 = vadd.xlane.f32.xlu1 %v1151_v26  ;;  %v564_v24 = vld [vmem:[%s4416_s26 + $0x630] sm:$0xff]  ;;  %v565_v26 = vld [vmem:[%s4416_s26 + $0x638] sm:$0xff] }
 0x12e   : > { %v2324_v47 = vrot.slane %v1666_v41, %v4613_v55  ;;  %1149 = vadd.xlane.f32.xlu0 %v1148_v29  ;;  %v949_v49 = vpop.xlane.xlu1 %948  ;;  %v562_v29 = vld [vmem:[%s4416_s26 + $0x620] sm:$0xff]  ;;  %v1175_v36 = vadd.f32 %v565_v26, %v564_v24  ;;  %v575_v24 = vld [vmem:[%s4416_s26 + $0x688] sm:$0xff] }
 0x12f   : > { %v1669_v53 = vmul.f32 0.00390625, %v949_v49  ;;  %v946_v25 = vpop.xlane.xlu0 %945 }
 0x130   : > { %v2325_v59 = vsel %vm2223_vm3, %v2324_v47, %v2320_v45  ;;  %v1668_v60 = vmul.f32 0.00390625, %v946_v25  ;;  %v568_v45 = vld [vmem:[%s4416_s26 + $0x650] sm:$0xff] }
 0x131   : > { %v2339_v61 = vrot.slane %v1669_v53, %v4636_v14  ;;  %v2330_v63 = vsel %vm2230_vm4, %v2329_v43, %v2325_v59  ;;  %1158 = vadd.xlane.f32.xlu1 %v1157_v46  ;;  %v1172_v43 = vadd.f32 %v563_v30, %v562_v29  ;;  %v569_v46 = vld [vmem:[%s4416_s26 + $0x658] sm:$0xff] }
 0x132   : > { %v2334_v1 = vrot.slane %v1668_v60, %v4630_v10  ;;  %1155 = vadd.xlane.f32.xlu0 %v1154_v50  ;;  %v955_v2 = vpop.xlane.xlu1 %954  ;;  %v566_v50 = vld [vmem:[%s4416_s26 + $0x640] sm:$0xff]  ;;  %v1181_v56 = vadd.f32 %v569_v46, %v568_v45  ;;  %v579_v45 = vld [vmem:[%s4416_s26 + $0x6a8] sm:$0xff] }
 0x133   : > { %v1671_v7 = vmul.f32 0.00390625, %v955_v2  ;;  %v952_v8 = vpop.xlane.xlu0 %951 }
 0x134   : > { %v2335_v13 = vsel %vm2237_vm5, %v2334_v1, %v2330_v63  ;;  %v1670_v15 = vmul.f32 0.00390625, %v952_v8  ;;  %v572_v63 = vld [vmem:[%s4416_s26 + $0x670] sm:$0xff] }
 0x135   : > { %v2349_v16 = vrot.slane %v1671_v7, %v4647_v31  ;;  %v2340_v17 = vsel %vm2244_vm6, %v2339_v61, %v2335_v13  ;;  %1164 = vadd.xlane.f32.xlu1 %v1163_v0  ;;  %v1178_v61 = vadd.f32 %v567_v51, %v566_v50  ;;  %v573_v0 = vld [vmem:[%s4416_s26 + $0x678] sm:$0xff] }
 0x136   : > { %v2344_v20 = vrot.slane %v1670_v15, %v4654_v39  ;;  %1161 = vadd.xlane.f32.xlu0 %v1160_v3  ;;  %v961_v21 = vpop.xlane.xlu1 %960  ;;  %v570_v3 = vld [vmem:[%s4416_s26 + $0x660] sm:$0xff]  ;;  %v1187_v12 = vadd.f32 %v573_v0, %v572_v63 }
 0x137   : > { %v1673_v27 = vmul.f32 0.00390625, %v961_v21  ;;  %v958_v28 = vpop.xlane.xlu0 %957 }
 0x138   : > { %v2345_v32 = vsel %vm2251_vm7, %v2344_v20, %v2340_v17  ;;  %v1672_v33 = vmul.f32 0.00390625, %v958_v28  ;;  %v576_v17 = vld [vmem:[%s4416_s26 + $0x690] sm:$0xff] }
 0x139   : > { %v2359_v34 = vrot.slane %v1673_v27, %v4666_v58  ;;  %v2350_v35 = vsel %vm2258_vm8, %v2349_v16, %v2345_v32  ;;  %1170 = vadd.xlane.f32.xlu1 %v1169_v19  ;;  %v1184_v16 = vadd.f32 %v571_v4, %v570_v3  ;;  %v577_v19 = vld [vmem:[%s4416_s26 + $0x698] sm:$0xff] }
 0x13a   : > { %v2354_v40 = vrot.slane %v1672_v33, %v4670_v62  ;;  %1167 = vadd.xlane.f32.xlu0 %v1166_v23  ;;  %v967_v41 = vpop.xlane.xlu1 %966  ;;  %v574_v23 = vld [vmem:[%s4416_s26 + $0x680] sm:$0xff]  ;;  %v1193_v30 = vadd.f32 %v577_v19, %v576_v17 }
 0x13b   : > { %v1675_v47 = vmul.f32 0.00390625, %v967_v41  ;;  %v964_v49 = vpop.xlane.xlu0 %963 }
 0x13c   : > { %v2355_v52 = vsel %vm2265_vm9, %v2354_v40, %v2350_v35  ;;  %v1674_v53 = vmul.f32 0.00390625, %v964_v49  ;;  %v580_v35 = vld [vmem:[%s4416_s26 + $0x6b0] sm:$0xff] }
 0x13d   : > { %v2369_v25 = vrot.slane %v1675_v47, %v4679_v9  ;;  %v2360_v54 = vsel %vm2272_vm10, %v2359_v34, %v2355_v52  ;;  %1176 = vadd.xlane.f32.xlu1 %v1175_v36  ;;  %v1190_v34 = vadd.f32 %v575_v24, %v574_v23  ;;  %v581_v36 = vld [vmem:[%s4416_s26 + $0x6b8] sm:$0xff] }
 0x13e   : > { %v2364_v59 = vrot.slane %v1674_v53, %v4686_v18  ;;  %1173 = vadd.xlane.f32.xlu0 %v1172_v43  ;;  %v973_v60 = vpop.xlane.xlu1 %972  ;;  %v578_v43 = vld [vmem:[%s4416_s26 + $0x6a0] sm:$0xff]  ;;  %v1199_v50 = vadd.f32 %v581_v36, %v580_v35  ;;  %v655_v35 = vld [vmem:[%s4416_s26 + $0x908] sm:$0xff] }
 0x13f   : > { %v1677_v1 = vmul.f32 0.00390625, %v973_v60  ;;  %v970_v2 = vpop.xlane.xlu0 %969  ;;  %v1196_v53 = vadd.f32 %v579_v45, %v578_v43  ;;  %v582_v60 = vld [vmem:[%s4416_s26 + $0x6c0] sm:$0xff] }
 0x140   : > { %v2365_v6 = vsel %vm2279_vm11, %v2364_v59, %v2360_v54  ;;  %v1676_v7 = vmul.f32 0.00390625, %v970_v2  ;;  %v591_v54 = vld [vmem:[%s4416_s26 + $0x708] sm:$0xff] }
 0x141   : > { %v2379_v8 = vrot.slane %v1677_v1, %v4697_v22  ;;  %v2370_v11 = vsel %vm2286_vm12, %v2369_v25, %v2365_v6  ;;  %1182 = vadd.xlane.f32.xlu1 %v1181_v56  ;;  %v590_v25 = vld [vmem:[%s4416_s26 + $0x700] sm:$0xff] }
 0x142   : > { %v2374_v13 = vrot.slane %v1676_v7, %v4701_v37  ;;  %1179 = vadd.xlane.f32.xlu0 %v1178_v61  ;;  %v979_v15 = vpop.xlane.xlu1 %978  ;;  %v583_v61 = vld [vmem:[%s4416_s26 + $0x6c8] sm:$0xff]  ;;  %v1214_v3 = vadd.f32 %v591_v54, %v590_v25  ;;  %v596_v25 = vld [vmem:[%s4416_s26 + $0x730] sm:$0xff]  ;;  %v597_v54 = vld [vmem:[%s4416_s26 + $0x738] sm:$0xff] }
 0x143   : > { %v1679_v20 = vmul.f32 0.00390625, %v979_v15  ;;  %v976_v21 = vpop.xlane.xlu0 %975  ;;  %v1202_v7 = vadd.f32 %v583_v61, %v582_v60  ;;  %v592_v15 = vld [vmem:[%s4416_s26 + $0x710] sm:$0xff] }
 0x144   : > { %v2375_v26 = vsel %vm2293_vm13, %v2374_v13, %v2370_v11  ;;  %v1678_v27 = vmul.f32 0.00390625, %v976_v21  ;;  %v595_v11 = vld [vmem:[%s4416_s26 + $0x728] sm:$0xff] }
 0x145   : > { %v4782_v28 = vsel %vm2300_vm14, %v2379_v8, %v2375_v26  ;;  %v2388_v29 = vrot.slane %v1679_v20, %v4603_v44  ;;  %1188 = vadd.xlane.f32.xlu1 %v1187_v12  ;;  %v594_v8 = vld [vmem:[%s4416_s26 + $0x720] sm:$0xff] }
 0x146   : > { %v2384_v32 = vrot.slane %v1678_v27, %v4596_v38  ;;  %1185 = vadd.xlane.f32.xlu0 %v1184_v16  ;;  %v985_v33 = vpop.xlane.xlu1 %984  ;;  %v593_v16 = vld [vmem:[%s4416_s26 + $0x718] sm:$0xff]  ;;  %v1220_v23 = vadd.f32 %v595_v11, %v594_v8  ;;  %v624_v8 = vld [vmem:[%s4416_s26 + $0x810] sm:$0xff] }
 0x147   : > { %v1681_v40 = vmul.f32 0.00390625, %v985_v33  ;;  %v982_v41 = vpop.xlane.xlu0 %981  ;;  %v1217_v27 = vadd.f32 %v593_v16, %v592_v15  ;;  %v625_v11 = vld [vmem:[%s4416_s26 + $0x818] sm:$0xff] }
 0x148   : > { %v2389_v46 = vsel %vm2202_vm0, %v2388_v29, %v2384_v32  ;;  %v1680_v47 = vmul.f32 0.00390625, %v982_v41  ;;  %v656_v29 = vld [vmem:[%s4416_s26 + $0x910] sm:$0xff] }
 0x149   : > { %v2398_v49 = vrot.slane %v1681_v40, %v4600_v42  ;;  %1194 = vadd.xlane.f32.xlu1 %v1193_v30  ;;  %v657_v30 = vld [vmem:[%s4416_s26 + $0x918] sm:$0xff] }
 0x14a   : > { %v2393_v51 = vrot.slane %v1680_v47, %v4608_v48  ;;  %1191 = vadd.xlane.f32.xlu0 %v1190_v34  ;;  %v991_v52 = vpop.xlane.xlu1 %990  ;;  %v654_v34 = vld [vmem:[%s4416_s26 + $0x900] sm:$0xff]  ;;  %v1313_v45 = vadd.f32 %v657_v30, %v656_v29  ;;  %v719_v30 = vld [vmem:[%s4416_s26 + $0xb08] sm:$0xff] }
 0x14b   : > { %v1683_v56 = vmul.f32 0.00390625, %v991_v52  ;;  %v988_v59 = vpop.xlane.xlu0 %987  ;;  %v718_v29 = vld [vmem:[%s4416_s26 + $0xb00] sm:$0xff] }
 0x14c   : > { %v2394_v63 = vsel %vm2209_vm1, %v2393_v51, %v2389_v46  ;;  %v1682_v0 = vmul.f32 0.00390625, %v988_v59  ;;  %v623_v51 = vld [vmem:[%s4416_s26 + $0x808] sm:$0xff] }
 0x14d   : > { %v2408_v1 = vrot.slane %v1683_v56, %v4617_v57  ;;  %v2399_v2 = vsel %vm2216_vm2, %v2398_v49, %v2394_v63  ;;  %1200 = vadd.xlane.f32.xlu1 %v1199_v50  ;;  %v1310_v49 = vadd.f32 %v655_v35, %v654_v34  ;;  %v622_v50 = vld [vmem:[%s4416_s26 + $0x800] sm:$0xff] }
 0x14e   : > { %v2403_v4 = vrot.slane %v1682_v0, %v4613_v55  ;;  %1197 = vadd.xlane.f32.xlu0 %v1196_v53  ;;  %v997_v6 = vpop.xlane.xlu1 %996  ;;  %v1262_v63 = vadd.f32 %v623_v51, %v622_v50  ;;  %v598_v50 = vld [vmem:[%s4416_s26 + $0x740] sm:$0xff]  ;;  %v599_v51 = vld [vmem:[%s4416_s26 + $0x748] sm:$0xff] }
 0x14f   : > { %v1685_v12 = vmul.f32 0.00390625, %v997_v6  ;;  %v994_v13 = vpop.xlane.xlu0 %993 }
 0x150   : > { %v2404_v17 = vsel %vm2223_vm3, %v2403_v4, %v2399_v2  ;;  %v1684_v19 = vmul.f32 0.00390625, %v994_v13  ;;  %v1223_v2 = vadd.f32 %v597_v54, %v596_v25  ;;  %v659_v4 = vld [vmem:[%s4416_s26 + $0x928] sm:$0xff] }
 0x151   : > { %v2418_v20 = vrot.slane %v1685_v12, %v4636_v14  ;;  %v2409_v21 = vsel %vm2230_vm4, %v2408_v1, %v2404_v17  ;;  %1215 = vadd.xlane.f32.xlu1 %v1214_v3  ;;  %v658_v3 = vld [vmem:[%s4416_s26 + $0x920] sm:$0xff] }
 0x152   : > { %v2413_v24 = vrot.slane %v1684_v19, %v4630_v10  ;;  %1203 = vadd.xlane.f32.xlu0 %v1202_v7  ;;  %v1003_v26 = vpop.xlane.xlu1 %1002  ;;  %v1316_v17 = vadd.f32 %v659_v4, %v658_v3  ;;  %v660_v4 = vld [vmem:[%s4416_s26 + $0x930] sm:$0xff] }
 0x153   : > { %v1687_v32 = vmul.f32 0.00390625, %v1003_v26  ;;  %v1000_v33 = vpop.xlane.xlu0 %999 }
 0x154   : > { %v2414_v36 = vsel %vm2237_vm5, %v2413_v24, %v2409_v21  ;;  %v1686_v40 = vmul.f32 0.00390625, %v1000_v33  ;;  %v1265_v21 = vadd.f32 %v625_v11, %v624_v8  ;;  %v721_v24 = vld [vmem:[%s4416_s26 + $0xb18] sm:$0xff] }
 0x155   : > { %v2428_v41 = vrot.slane %v1687_v32, %v4647_v31  ;;  %v2419_v43 = vsel %vm2244_vm6, %v2418_v20, %v2414_v36  ;;  %1221 = vadd.xlane.f32.xlu1 %v1220_v23  ;;  %v720_v23 = vld [vmem:[%s4416_s26 + $0xb10] sm:$0xff] }
 0x156   : > { %v2423_v46 = vrot.slane %v1686_v40, %v4654_v39  ;;  %1218 = vadd.xlane.f32.xlu0 %v1217_v27  ;;  %v1009_v47 = vpop.xlane.xlu1 %1008  ;;  %v1409_v36 = vadd.f32 %v721_v24, %v720_v23  ;;  %v689_v23 = vld [vmem:[%s4416_s26 + $0xa18] sm:$0xff] }
 0x157   : > { %v1689_v52 = vmul.f32 0.00390625, %v1009_v47  ;;  %v1006_v53 = vpop.xlane.xlu0 %1005 }
 0x158   : > { %v2424_v56 = vsel %vm2251_vm7, %v2423_v46, %v2419_v43  ;;  %v1688_v59 = vmul.f32 0.00390625, %v1006_v53  ;;  %v1406_v43 = vadd.f32 %v719_v30, %v718_v29  ;;  %v627_v46 = vld [vmem:[%s4416_s26 + $0x828] sm:$0xff] }
 0x159   : > { %v2438_v60 = vrot.slane %v1689_v52, %v4666_v58  ;;  %v2429_v61 = vsel %vm2258_vm8, %v2428_v41, %v2424_v56  ;;  %1314 = vadd.xlane.f32.xlu1 %v1313_v45  ;;  %v626_v45 = vld [vmem:[%s4416_s26 + $0x820] sm:$0xff] }
 0x15a   : > { %v2433_v0 = vrot.slane %v1688_v59, %v4670_v62  ;;  %1311 = vadd.xlane.f32.xlu0 %v1310_v49  ;;  %v1015_v1 = vpop.xlane.xlu1 %1014  ;;  %v1268_v56 = vadd.f32 %v627_v46, %v626_v45  ;;  %v783_v45 = vld [vmem:[%s4416_s26 + $0xd08] sm:$0xff] }
 0x15b   : > { %v1691_v6 = vmul.f32 0.00390625, %v1015_v1  ;;  %v1012_v7 = vpop.xlane.xlu0 %1011  ;;  %v687_v1 = vld [vmem:[%s4416_s26 + $0xa08] sm:$0xff] }
 0x15c   : > { %v2434_v12 = vsel %vm2265_vm9, %v2433_v0, %v2429_v61  ;;  %v1690_v13 = vmul.f32 0.00390625, %v1012_v7  ;;  %v686_v0 = vld [vmem:[%s4416_s26 + $0xa00] sm:$0xff] }
 0x15d   : > { %v2448_v15 = vrot.slane %v1691_v6, %v4679_v9  ;;  %v2439_v16 = vsel %vm2272_vm10, %v2438_v60, %v2434_v12  ;;  %1263 = vadd.xlane.f32.xlu1 %v1262_v63  ;;  %v1226_v63 = vadd.f32 %v599_v51, %v598_v50  ;;  %v661_v6 = vld [vmem:[%s4416_s26 + $0x938] sm:$0xff]  ;;  %v1358_v11 = vadd.f32 %v687_v1, %v686_v0 }
 0x15e   : > { %v2443_v19 = vrot.slane %v1690_v13, %v4686_v18  ;;  %1224 = vadd.xlane.f32.xlu0 %v1223_v2  ;;  %v1021_v20 = vpop.xlane.xlu1 %1020  ;;  %v601_v0 = vld [vmem:[%s4416_s26 + $0x758] sm:$0xff] }
 0x15f   : > { %v1693_v26 = vmul.f32 0.00390625, %v1021_v20  ;;  %v1018_v27 = vpop.xlane.xlu0 %1017 }
 0x160   : > { %v2444_v32 = vsel %vm2279_vm11, %v2443_v19, %v2439_v16  ;;  %v1692_v33 = vmul.f32 0.00390625, %v1018_v27  ;;  %v722_v16 = vld [vmem:[%s4416_s26 + $0xb20] sm:$0xff] }
 0x161   : > { %v2458_v34 = vrot.slane %v1693_v26, %v4697_v22  ;;  %v2449_v35 = vsel %vm2286_vm12, %v2448_v15, %v2444_v32  ;;  %1317 = vadd.xlane.f32.xlu1 %v1316_v17  ;;  %v1319_v15 = vadd.f32 %v661_v6, %v660_v4  ;;  %v723_v17 = vld [vmem:[%s4416_s26 + $0xb28] sm:$0xff] }
 0x162   : > { %v2453_v40 = vrot.slane %v1692_v33, %v4701_v37  ;;  %1266 = vadd.xlane.f32.xlu0 %v1265_v21  ;;  %v1027_v41 = vpop.xlane.xlu1 %1026  ;;  %v688_v21 = vld [vmem:[%s4416_s26 + $0xa10] sm:$0xff]  ;;  %v1412_v30 = vadd.f32 %v723_v17, %v722_v16  ;;  %v662_v16 = vld [vmem:[%s4416_s26 + $0x940] sm:$0xff]  ;;  %v663_v17 = vld [vmem:[%s4416_s26 + $0x948] sm:$0xff] }
 0x163   : > { %v1695_v47 = vmul.f32 0.00390625, %v1027_v41  ;;  %v1024_v49 = vpop.xlane.xlu0 %1023 }
 0x164   : > { %v2454_v52 = vsel %vm2293_vm13, %v2453_v40, %v2449_v35  ;;  %v1694_v53 = vmul.f32 0.00390625, %v1024_v49  ;;  %v784_v35 = vld [vmem:[%s4416_s26 + $0xd10] sm:$0xff] }
 0x165   : > { %v2459_v25 = vsel %vm2300_vm14, %v2458_v34, %v2454_v52  ;;  %v2467_v54 = vrot.slane %v1695_v47, %v4603_v44  ;;  %1410 = vadd.xlane.f32.xlu1 %v1409_v36  ;;  %v1361_v34 = vadd.f32 %v689_v23, %v688_v21  ;;  %v785_v36 = vld [vmem:[%s4416_s26 + $0xd18] sm:$0xff] }
 0x166   : > { %v4850_v59 = vsel %vm3487_vm15, %v2459_v25, %v4717_v5  ;;  %v2463_v60 = vrot.slane %v1694_v53, %v4596_v38  ;;  %1407 = vadd.xlane.f32.xlu0 %v1406_v43  ;;  %v1033_v61 = vpop.xlane.xlu1 %1032  ;;  %v782_v43 = vld [vmem:[%s4416_s26 + $0xd00] sm:$0xff]  ;;  %v1505_v51 = vadd.f32 %v785_v36, %v784_v35  ;;  %v724_v35 = vld [vmem:[%s4416_s26 + $0xb30] sm:$0xff]  ;;  %v725_v36 = vld [vmem:[%s4416_s26 + $0xb38] sm:$0xff] }
 0x167   : > { %v1697_v2 = vmul.f32 0.00390625, %v1033_v61  ;;  %v1030_v3 = vpop.xlane.xlu0 %1029  ;;  %v1502_v25 = vadd.f32 %v783_v45, %v782_v43 }
 0x168   : > { %v2468_v7 = vsel %vm2202_vm0, %v2467_v54, %v2463_v60  ;;  %v1696_v8 = vmul.f32 0.00390625, %v1030_v3  ;;  %v628_v54 = vld [vmem:[%s4416_s26 + $0x830] sm:$0xff] }
 0x169   : > { %v2477_v5 = vrot.slane %v1697_v2, %v4600_v42  ;;  %1269 = vadd.xlane.f32.xlu1 %v1268_v56  ;;  %v629_v56 = vld [vmem:[%s4416_s26 + $0x838] sm:$0xff] }
 0x16a   : > { %v2472_v12 = vrot.slane %v1696_v8, %v4608_v48  ;;  %1227 = vadd.xlane.f32.xlu0 %v1226_v63  ;;  %v1039_v13 = vpop.xlane.xlu1 %1038  ;;  %v600_v63 = vld [vmem:[%s4416_s26 + $0x750] sm:$0xff]  ;;  %v1271_v6 = vadd.f32 %v629_v56, %v628_v54  ;;  %v753_v56 = vld [vmem:[%s4416_s26 + $0xc18] sm:$0xff] }
 0x16b   : > { %v1699_v19 = vmul.f32 0.00390625, %v1039_v13  ;;  %v1036_v20 = vpop.xlane.xlu0 %1035  ;;  %v752_v54 = vld [vmem:[%s4416_s26 + $0xc10] sm:$0xff] }
 0x16c   : > { %v2473_v24 = vsel %vm2209_vm1, %v2472_v12, %v2468_v7  ;;  %v1698_v26 = vmul.f32 0.00390625, %v1036_v20  ;;  %v691_v12 = vld [vmem:[%s4416_s26 + $0xa28] sm:$0xff] }
 0x16d   : > { %v2487_v27 = vrot.slane %v1699_v19, %v4617_v57  ;;  %v2478_v29 = vsel %vm2216_vm2, %v2477_v5, %v2473_v24  ;;  %1359 = vadd.xlane.f32.xlu1 %v1358_v11  ;;  %v1229_v5 = vadd.f32 %v601_v0, %v600_v63  ;;  %v690_v11 = vld [vmem:[%s4416_s26 + $0xa20] sm:$0xff] }
 0x16e   : > { %v2482_v32 = vrot.slane %v1698_v26, %v4613_v55  ;;  %1320 = vadd.xlane.f32.xlu0 %v1319_v15  ;;  %v1045_v33 = vpop.xlane.xlu1 %1044  ;;  %v1364_v24 = vadd.f32 %v691_v12, %v690_v11  ;;  %v846_v11 = vld [vmem:[%s4416_s26 + $0xf00] sm:$0xff]  ;;  %v847_v12 = vld [vmem:[%s4416_s26 + $0xf08] sm:$0xff] }
 0x16f   : > { %v1701_v40 = vmul.f32 0.00390625, %v1045_v33  ;;  %v1042_v41 = vpop.xlane.xlu0 %1041 }
 0x170   : > { %v2483_v46 = vsel %vm2223_vm3, %v2482_v32, %v2478_v29  ;;  %v1700_v47 = vmul.f32 0.00390625, %v1042_v41  ;;  %v1322_v29 = vadd.f32 %v663_v17, %v662_v16  ;;  %v751_v32 = vld [vmem:[%s4416_s26 + $0xc08] sm:$0xff] }
 0x171   : > { %v2497_v49 = vrot.slane %v1701_v40, %v4636_v14  ;;  %v2488_v50 = vsel %vm2230_vm4, %v2487_v27, %v2483_v46  ;;  %1413 = vadd.xlane.f32.xlu1 %v1412_v30  ;;  %v750_v30 = vld [vmem:[%s4416_s26 + $0xc00] sm:$0xff] }
 0x172   : > { %v2492_v52 = vrot.slane %v1700_v47, %v4630_v10  ;;  %1362 = vadd.xlane.f32.xlu0 %v1361_v34  ;;  %v1051_v53 = vpop.xlane.xlu1 %1050  ;;  %v1454_v46 = vadd.f32 %v751_v32, %v750_v30  ;;  %v602_v32 = vld [vmem:[%s4416_s26 + $0x760] sm:$0xff] }
 0x173   : > { %v1703_v60 = vmul.f32 0.00390625, %v1051_v53  ;;  %v1048_v61 = vpop.xlane.xlu0 %1047 }
 0x174   : > { %v2493_v1 = vsel %vm2237_vm5, %v2492_v52, %v2488_v50  ;;  %v1702_v2 = vmul.f32 0.00390625, %v1048_v61  ;;  %v1415_v50 = vadd.f32 %v725_v36, %v724_v35  ;;  %v787_v52 = vld [vmem:[%s4416_s26 + $0xd28] sm:$0xff] }
 0x175   : > { %v2507_v3 = vrot.slane %v1703_v60, %v4647_v31  ;;  %v2498_v4 = vsel %vm2244_vm6, %v2497_v49, %v2493_v1  ;;  %1506 = vadd.xlane.f32.xlu1 %v1505_v51  ;;  %v786_v51 = vld [vmem:[%s4416_s26 + $0xd20] sm:$0xff] }
 0x176   : > { %v2502_v7 = vrot.slane %v1702_v2, %v4654_v39  ;;  %1503 = vadd.xlane.f32.xlu0 %v1502_v25  ;;  %v1057_v8 = vpop.xlane.xlu1 %1056  ;;  %v1508_v1 = vadd.f32 %v787_v52, %v786_v51  ;;  %v665_v51 = vld [vmem:[%s4416_s26 + $0x958] sm:$0xff] }
 0x177   : > { %v1705_v13 = vmul.f32 0.00390625, %v1057_v8  ;;  %v1054_v15 = vpop.xlane.xlu0 %1053 }
 0x178   : > { %v2503_v19 = vsel %vm2251_vm7, %v2502_v7, %v2498_v4  ;;  %v1704_v20 = vmul.f32 0.00390625, %v1054_v15  ;;  %v1457_v4 = vadd.f32 %v753_v56, %v752_v54  ;;  %v849_v7 = vld [vmem:[%s4416_s26 + $0xf18] sm:$0xff] }
 0x179   : > { %v2517_v21 = vrot.slane %v1705_v13, %v4666_v58  ;;  %v2508_v23 = vsel %vm2258_vm8, %v2507_v3, %v2503_v19  ;;  %1272 = vadd.xlane.f32.xlu1 %v1271_v6  ;;  %v848_v6 = vld [vmem:[%s4416_s26 + $0xf10] sm:$0xff] }
 0x17a   : > { %v2512_v26 = vrot.slane %v1704_v20, %v4670_v62  ;;  %1230 = vadd.xlane.f32.xlu0 %v1229_v5  ;;  %v1063_v27 = vpop.xlane.xlu1 %1062  ;;  %v1601_v19 = vadd.f32 %v849_v7, %v848_v6  ;;  %v727_v6 = vld [vmem:[%s4416_s26 + $0xb48] sm:$0xff] }
 0x17b   : > { %v1707_v33 = vmul.f32 0.00390625, %v1063_v27  ;;  %v1060_v34 = vpop.xlane.xlu0 %1059  ;;  %v631_v27 = vld [vmem:[%s4416_s26 + $0x848] sm:$0xff] }
 0x17c   : > { %v2513_v40 = vsel %vm2265_vm9, %v2512_v26, %v2508_v23  ;;  %v1706_v41 = vmul.f32 0.00390625, %v1060_v34  ;;  %v630_v26 = vld [vmem:[%s4416_s26 + $0x840] sm:$0xff] }
 0x17d   : > { %v2527_v43 = vrot.slane %v1707_v33, %v4679_v9  ;;  %v2518_v45 = vsel %vm2272_vm10, %v2517_v21, %v2513_v40  ;;  %1365 = vadd.xlane.f32.xlu1 %v1364_v24  ;;  %v1598_v24 = vadd.f32 %v847_v12, %v846_v11  ;;  %v603_v33 = vld [vmem:[%s4416_s26 + $0x768] sm:$0xff]  ;;  %v1274_v36 = vadd.f32 %v631_v27, %v630_v26  ;;  %v789_v26 = vld [vmem:[%s4416_s26 + $0xd38] sm:$0xff] }
 0x17e   : > { %v2522_v47 = vrot.slane %v1706_v41, %v4686_v18  ;;  %1323 = vadd.xlane.f32.xlu0 %v1322_v29  ;;  %v1069_v49 = vpop.xlane.xlu1 %1068 }
 0x17f   : > { %v1709_v53 = vmul.f32 0.00390625, %v1069_v49  ;;  %v1066_v25 = vpop.xlane.xlu0 %1065 }
 0x180   : > { %v2523_v60 = vsel %vm2279_vm11, %v2522_v47, %v2518_v45  ;;  %v1708_v61 = vmul.f32 0.00390625, %v1066_v25  ;;  %v692_v45 = vld [vmem:[%s4416_s26 + $0xa30] sm:$0xff] }
 0x181   : > { %v2537_v63 = vrot.slane %v1709_v53, %v4697_v22  ;;  %v2528_v0 = vsel %vm2286_vm12, %v2527_v43, %v2523_v60  ;;  %1455 = vadd.xlane.f32.xlu1 %v1454_v46  ;;  %v1232_v43 = vadd.f32 %v603_v33, %v602_v32  ;;  %v693_v46 = vld [vmem:[%s4416_s26 + $0xa38] sm:$0xff] }
 0x182   : > { %v2532_v2 = vrot.slane %v1708_v61, %v4701_v37  ;;  %1416 = vadd.xlane.f32.xlu0 %v1415_v50  ;;  %v1075_v3 = vpop.xlane.xlu1 %1074  ;;  %v664_v50 = vld [vmem:[%s4416_s26 + $0x950] sm:$0xff]  ;;  %v1367_v56 = vadd.f32 %v693_v46, %v692_v45  ;;  %v817_v46 = vld [vmem:[%s4416_s26 + $0xe18] sm:$0xff] }
 0x183   : > { %v1711_v8 = vmul.f32 0.00390625, %v1075_v3  ;;  %v1072_v5 = vpop.xlane.xlu0 %1071  ;;  %v816_v45 = vld [vmem:[%s4416_s26 + $0xe10] sm:$0xff] }
 0x184   : > { %v2533_v13 = vsel %vm2293_vm13, %v2532_v2, %v2528_v0  ;;  %v1710_v15 = vmul.f32 0.00390625, %v1072_v5  ;;  %v754_v0 = vld [vmem:[%s4416_s26 + $0xc20] sm:$0xff] }
 0x185   : > { %v2538_v16 = vsel %vm2300_vm14, %v2537_v63, %v2533_v13  ;;  %v2546_v17 = vrot.slane %v1711_v8, %v4603_v44  ;;  %1509 = vadd.xlane.f32.xlu1 %v1508_v1  ;;  %v1325_v63 = vadd.f32 %v665_v51, %v664_v50  ;;  %v755_v1 = vld [vmem:[%s4416_s26 + $0xc28] sm:$0xff] }
 0x186   : > { %v4917_v20 = vsel %vm3487_vm15, %v2538_v16, %v4782_v28  ;;  %v2542_v21 = vrot.slane %v1710_v15, %v4596_v38  ;;  %1458 = vadd.xlane.f32.xlu0 %v1457_v4  ;;  %v1081_v23 = vpop.xlane.xlu1 %1080  ;;  %v726_v4 = vld [vmem:[%s4416_s26 + $0xb40] sm:$0xff]  ;;  %v1460_v12 = vadd.f32 %v755_v1, %v754_v0  ;;  %v604_v0 = vld [vmem:[%s4416_s26 + $0x770] sm:$0xff]  ;;  %v605_v1 = vld [vmem:[%s4416_s26 + $0x778] sm:$0xff]  ;;  %vm3489_vm15 = vcmask 1042434  }
 0x187   : > { %v1713_v29 = vmul.f32 0.00390625, %v1081_v23  ;;  %v1078_v30 = vpop.xlane.xlu0 %1077  ;;  %v1418_v16 = vadd.f32 %v727_v6, %v726_v4 }
 0x188   : > { %v2547_v34 = vsel %vm2202_vm0, %v2546_v17, %v2542_v21  ;;  %v1712_v35 = vmul.f32 0.00390625, %v1078_v30  ;;  %v814_v17 = vld [vmem:[%s4416_s26 + $0xe00] sm:$0xff] }
 0x189   : > { %v2556_v28 = vrot.slane %v1713_v29, %v4600_v42  ;;  %1602 = vadd.xlane.f32.xlu1 %v1601_v19  ;;  %v815_v19 = vld [vmem:[%s4416_s26 + $0xe08] sm:$0xff] }
 0x18a   : > { %v2551_v40 = vrot.slane %v1712_v35, %v4608_v48  ;;  %1599 = vadd.xlane.f32.xlu0 %v1598_v24  ;;  %v1087_v41 = vpop.xlane.xlu1 %1086  ;;  %v788_v24 = vld [vmem:[%s4416_s26 + $0xd30] sm:$0xff]  ;;  %v1550_v33 = vadd.f32 %v815_v19, %v814_v17  ;;  %v666_v17 = vld [vmem:[%s4416_s26 + $0x960] sm:$0xff]  ;;  %v667_v19 = vld [vmem:[%s4416_s26 + $0x968] sm:$0xff] }
 0x18b   : > { %v1715_v47 = vmul.f32 0.00390625, %v1087_v41  ;;  %v1084_v49 = vpop.xlane.xlu0 %1083 }
 0x18c   : > { %v2552_v52 = vsel %vm2209_vm1, %v2551_v40, %v2547_v34  ;;  %v1714_v53 = vmul.f32 0.00390625, %v1084_v49  ;;  %v851_v40 = vld [vmem:[%s4416_s26 + $0xf28] sm:$0xff] }
 0x18d   : > { %v2566_v25 = vrot.slane %v1715_v47, %v4617_v57  ;;  %v2557_v54 = vsel %vm2216_vm2, %v2556_v28, %v2552_v52  ;;  %1275 = vadd.xlane.f32.xlu1 %v1274_v36  ;;  %v1511_v28 = vadd.f32 %v789_v26, %v788_v24  ;;  %v850_v36 = vld [vmem:[%s4416_s26 + $0xf20] sm:$0xff] }
 0x18e   : > { %v2561_v60 = vrot.slane %v1714_v53, %v4613_v55  ;;  %1233 = vadd.xlane.f32.xlu0 %v1232_v43  ;;  %v1093_v61 = vpop.xlane.xlu1 %1092  ;;  %v1604_v52 = vadd.f32 %v851_v40, %v850_v36  ;;  %v728_v36 = vld [vmem:[%s4416_s26 + $0xb50] sm:$0xff]  ;;  %v729_v40 = vld [vmem:[%s4416_s26 + $0xb58] sm:$0xff] }
 0x18f   : > { %v1717_v2 = vmul.f32 0.00390625, %v1093_v61  ;;  %v1090_v3 = vpop.xlane.xlu0 %1089 }
 0x190   : > { %v2562_v7 = vsel %vm2223_vm3, %v2561_v60, %v2557_v54  ;;  %v1716_v8 = vmul.f32 0.00390625, %v1090_v3  ;;  %v1553_v54 = vadd.f32 %v817_v46, %v816_v45  ;;  %v633_v60 = vld [vmem:[%s4416_s26 + $0x858] sm:$0xff] }
 0x191   : > { %v2576_v5 = vrot.slane %v1717_v2, %v4636_v14  ;;  %v2567_v11 = vsel %vm2230_vm4, %v2566_v25, %v2562_v7  ;;  %1368 = vadd.xlane.f32.xlu1 %v1367_v56  ;;  %v632_v56 = vld [vmem:[%s4416_s26 + $0x850] sm:$0xff] }
 0x192   : > { %v2571_v13 = vrot.slane %v1716_v8, %v4630_v10  ;;  %1326 = vadd.xlane.f32.xlu0 %v1325_v63  ;;  %v1099_v15 = vpop.xlane.xlu1 %1098  ;;  %v1277_v7 = vadd.f32 %v633_v60, %v632_v56  ;;  %v790_v60 = vld [vmem:[%s4416_s26 + $0xd40] sm:$0xff] }
 0x193   : > { %v1719_v21 = vmul.f32 0.00390625, %v1099_v15  ;;  %v1096_v23 = vpop.xlane.xlu0 %1095 }
 0x194   : > { %v2572_v27 = vsel %vm2237_vm5, %v2571_v13, %v2567_v11  ;;  %v1718_v29 = vmul.f32 0.00390625, %v1096_v23  ;;  %v1235_v11 = vadd.f32 %v605_v1, %v604_v0  ;;  %v695_v13 = vld [vmem:[%s4416_s26 + $0xa48] sm:$0xff] }
 0x195   : > { %v2586_v30 = vrot.slane %v1719_v21, %v4647_v31  ;;  %v2577_v32 = vsel %vm2244_vm6, %v2576_v5, %v2572_v27  ;;  %1461 = vadd.xlane.f32.xlu1 %v1460_v12  ;;  %v694_v12 = vld [vmem:[%s4416_s26 + $0xa40] sm:$0xff] }
 0x196   : > { %v2581_v34 = vrot.slane %v1718_v29, %v4654_v39  ;;  %1419 = vadd.xlane.f32.xlu0 %v1418_v16  ;;  %v1105_v35 = vpop.xlane.xlu1 %1104  ;;  %v1370_v27 = vadd.f32 %v695_v13, %v694_v12  ;;  %v853_v12 = vld [vmem:[%s4416_s26 + $0xf38] sm:$0xff] }
 0x197   : > { %v1721_v41 = vmul.f32 0.00390625, %v1105_v35  ;;  %v1102_v43 = vpop.xlane.xlu0 %1101 }
 0x198   : > { %v2582_v47 = vsel %vm2251_vm7, %v2581_v34, %v2577_v32  ;;  %v1720_v49 = vmul.f32 0.00390625, %v1102_v43  ;;  %v1328_v32 = vadd.f32 %v667_v19, %v666_v17  ;;  %v757_v34 = vld [vmem:[%s4416_s26 + $0xc38] sm:$0xff] }
 0x199   : > { %v2596_v50 = vrot.slane %v1721_v41, %v4666_v58  ;;  %v2587_v51 = vsel %vm2258_vm8, %v2586_v30, %v2582_v47  ;;  %1551 = vadd.xlane.f32.xlu1 %v1550_v33  ;;  %v756_v33 = vld [vmem:[%s4416_s26 + $0xc30] sm:$0xff] }
 0x19a   : > { %v2591_v53 = vrot.slane %v1720_v49, %v4670_v62  ;;  %1512 = vadd.xlane.f32.xlu0 %v1511_v28  ;;  %v1111_v25 = vpop.xlane.xlu1 %1110  ;;  %v1463_v47 = vadd.f32 %v757_v34, %v756_v33  ;;  %v635_v33 = vld [vmem:[%s4416_s26 + $0x868] sm:$0xff] }
 0x19b   : > { %v1723_v61 = vmul.f32 0.00390625, %v1111_v25  ;;  %v1108_v63 = vpop.xlane.xlu0 %1107 }
 0x19c   : > { %v2592_v2 = vsel %vm2265_vm9, %v2591_v53, %v2587_v51  ;;  %v1722_v3 = vmul.f32 0.00390625, %v1108_v63  ;;  %v1421_v51 = vadd.f32 %v729_v40, %v728_v36  ;;  %v819_v53 = vld [vmem:[%s4416_s26 + $0xe28] sm:$0xff] }
 0x19d   : > { %v2606_v4 = vrot.slane %v1723_v61, %v4679_v9  ;;  %v2597_v6 = vsel %vm2272_vm10, %v2596_v50, %v2592_v2  ;;  %1605 = vadd.xlane.f32.xlu1 %v1604_v52  ;;  %v818_v52 = vld [vmem:[%s4416_s26 + $0xe20] sm:$0xff]  ;;  %v791_v61 = vld [vmem:[%s4416_s26 + $0xd48] sm:$0xff] }
 0x19e   : > { %v2601_v8 = vrot.slane %v1722_v3, %v4686_v18  ;;  %1554 = vadd.xlane.f32.xlu0 %v1553_v54  ;;  %v1117_v5 = vpop.xlane.xlu1 %1116  ;;  %v1556_v2 = vadd.f32 %v819_v53, %v818_v52  ;;  %v697_v52 = vld [vmem:[%s4416_s26 + $0xa58] sm:$0xff] }
 0x19f   : > { %v1725_v15 = vmul.f32 0.00390625, %v1117_v5  ;;  %v1114_v16 = vpop.xlane.xlu0 %1113 }
 0x1a0   : > { %v2602_v21 = vsel %vm2279_vm11, %v2601_v8, %v2597_v6  ;;  %v1724_v23 = vmul.f32 0.00390625, %v1114_v16  ;;  %v1514_v6 = vadd.f32 %v791_v61, %v790_v60 }
 0x1a1   : > { %v2616_v24 = vrot.slane %v1725_v15, %v4697_v22  ;;  %v2607_v26 = vsel %vm2286_vm12, %v2606_v4, %v2602_v21  ;;  %1278 = vadd.xlane.f32.xlu1 %v1277_v7  ;;  %v607_v7 = vld [vmem:[%s4416_s26 + $0x788] sm:$0xff] }
 0x1a2   : > { %v2611_v29 = vrot.slane %v1724_v23, %v4701_v37  ;;  %1236 = vadd.xlane.f32.xlu0 %v1235_v11  ;;  %v1123_v30 = vpop.xlane.xlu1 %1122  ;;  %v852_v11 = vld [vmem:[%s4416_s26 + $0xf30] sm:$0xff] }
 0x1a3   : > { %v1727_v35 = vmul.f32 0.00390625, %v1123_v30  ;;  %v1120_v28 = vpop.xlane.xlu0 %1119 }
 0x1a4   : > { %v2612_v41 = vsel %vm2293_vm13, %v2611_v29, %v2607_v26  ;;  %v1726_v43 = vmul.f32 0.00390625, %v1120_v28  ;;  %v668_v26 = vld [vmem:[%s4416_s26 + $0x970] sm:$0xff] }
 0x1a5   : > { %v2617_v45 = vsel %vm2300_vm14, %v2616_v24, %v2612_v41  ;;  %v2625_v46 = vrot.slane %v1727_v35, %v4603_v44  ;;  %1371 = vadd.xlane.f32.xlu1 %v1370_v27  ;;  %v1607_v24 = vadd.f32 %v853_v12, %v852_v11  ;;  %v669_v27 = vld [vmem:[%s4416_s26 + $0x978] sm:$0xff] }
 0x1a6   : > { %v2621_v49 = vrot.slane %v1726_v43, %v4596_v38  ;;  %1329 = vadd.xlane.f32.xlu0 %v1328_v32  ;;  %v1129_v50 = vpop.xlane.xlu1 %1128  ;;  %v4987_v25 = vsel %vm3489_vm15, %v2617_v45, %v4850_v59  ;;  %v606_v59 = vld [vmem:[%s4416_s26 + $0x780] sm:$0xff]  ;;  %v1331_v40 = vadd.f32 %v669_v27, %v668_v26  ;;  %v820_v26 = vld [vmem:[%s4416_s26 + $0xe30] sm:$0xff]  ;;  %v821_v27 = vld [vmem:[%s4416_s26 + $0xe38] sm:$0xff] }
 0x1a7   : > { %v1729_v54 = vmul.f32 0.00390625, %v1129_v50  ;;  %v1126_v56 = vpop.xlane.xlu0 %1125  ;;  %v1238_v19 = vadd.f32 %v607_v7, %v606_v59  ;;  %v634_v32 = vld [vmem:[%s4416_s26 + $0x860] sm:$0xff]  ;;  %v759_v7 = vld [vmem:[%s4416_s26 + $0xc48] sm:$0xff] }
 0x1a8   : > { %v2626_v63 = vsel %vm2202_vm0, %v2625_v46, %v2621_v49  ;;  %v1728_v0 = vmul.f32 0.00390625, %v1126_v56  ;;  %v1280_v45 = vadd.f32 %v635_v33, %v634_v32  ;;  %v730_v46 = vld [vmem:[%s4416_s26 + $0xb60] sm:$0xff] }
 0x1a9   : > { %v2635_v1 = vrot.slane %v1729_v54, %v4600_v42  ;;  %1464 = vadd.xlane.f32.xlu1 %v1463_v47  ;;  %v731_v47 = vld [vmem:[%s4416_s26 + $0xb68] sm:$0xff]  ;;  %v758_v59 = vld [vmem:[%s4416_s26 + $0xc40] sm:$0xff] }
 0x1aa   : > { %v2630_v3 = vrot.slane %v1728_v0, %v4608_v48  ;;  %1422 = vadd.xlane.f32.xlu0 %v1421_v51  ;;  %v1135_v4 = vpop.xlane.xlu1 %1134  ;;  %v696_v51 = vld [vmem:[%s4416_s26 + $0xa50] sm:$0xff]  ;;  %v1424_v61 = vadd.f32 %v731_v47, %v730_v46  ;;  %v609_v47 = vld [vmem:[%s4416_s26 + $0x798] sm:$0xff] }
 0x1ab   : > { %v1731_v8 = vmul.f32 0.00390625, %v1135_v4  ;;  %v1132_v5 = vpop.xlane.xlu0 %1131  ;;  %v608_v46 = vld [vmem:[%s4416_s26 + $0x790] sm:$0xff] }
 0x1ac   : > { %v2631_v13 = vsel %vm2209_vm1, %v2630_v3, %v2626_v63  ;;  %v1730_v15 = vmul.f32 0.00390625, %v1132_v5  ;;  %v793_v3 = vld [vmem:[%s4416_s26 + $0xd58] sm:$0xff] }
 0x1ad   : > { %v2645_v16 = vrot.slane %v1731_v8, %v4617_v57  ;;  %v2636_v17 = vsel %vm2216_vm2, %v2635_v1, %v2631_v13  ;;  %1557 = vadd.xlane.f32.xlu1 %v1556_v2  ;;  %v1373_v1 = vadd.f32 %v697_v52, %v696_v51  ;;  %v792_v2 = vld [vmem:[%s4416_s26 + $0xd50] sm:$0xff] }
 0x1ae   : > { %v2640_v21 = vrot.slane %v1730_v15, %v4613_v55  ;;  %1515 = vadd.xlane.f32.xlu0 %v1514_v6  ;;  %v1141_v23 = vpop.xlane.xlu1 %1140  ;;  %v1517_v13 = vadd.f32 %v793_v3, %v792_v2  ;;  %v670_v2 = vld [vmem:[%s4416_s26 + $0x980] sm:$0xff]  ;;  %v671_v3 = vld [vmem:[%s4416_s26 + $0x988] sm:$0xff] }
 0x1af   : > { %v1733_v29 = vmul.f32 0.00390625, %v1141_v23  ;;  %v1138_v30 = vpop.xlane.xlu0 %1137 }
 0x1b0   : > { %v2641_v34 = vsel %vm2223_vm3, %v2640_v21, %v2636_v17  ;;  %v1732_v35 = vmul.f32 0.00390625, %v1138_v30  ;;  %v1466_v17 = vadd.f32 %v759_v7, %v758_v59  ;;  %v855_v21 = vld [vmem:[%s4416_s26 + $0xf48] sm:$0xff] }
 0x1b1   : > { %v2655_v28 = vrot.slane %v1733_v29, %v4636_v14  ;;  %v2646_v36 = vsel %vm2230_vm4, %v2645_v16, %v2641_v34  ;;  %1239 = vadd.xlane.f32.xlu1 %v1238_v19  ;;  %v854_v19 = vld [vmem:[%s4416_s26 + $0xf40] sm:$0xff] }
 0x1b2   : > { %v2650_v41 = vrot.slane %v1732_v35, %v4630_v10  ;;  %1608 = vadd.xlane.f32.xlu0 %v1607_v24  ;;  %v1147_v43 = vpop.xlane.xlu1 %1146  ;;  %v1610_v34 = vadd.f32 %v855_v21, %v854_v19  ;;  %v732_v21 = vld [vmem:[%s4416_s26 + $0xb70] sm:$0xff] }
 0x1b3   : > { %v1735_v49 = vmul.f32 0.00390625, %v1147_v43  ;;  %v1144_v50 = vpop.xlane.xlu0 %1143 }
 0x1b4   : > { %v2651_v53 = vsel %vm2237_vm5, %v2650_v41, %v2646_v36  ;;  %v1734_v54 = vmul.f32 0.00390625, %v1144_v50  ;;  %v1559_v36 = vadd.f32 %v821_v27, %v820_v26  ;;  %v637_v41 = vld [vmem:[%s4416_s26 + $0x878] sm:$0xff] }
 0x1b5   : > { %v2665_v56 = vrot.slane %v1735_v49, %v4647_v31  ;;  %v2656_v60 = vsel %vm2244_vm6, %v2655_v28, %v2651_v53  ;;  %1332 = vadd.xlane.f32.xlu1 %v1331_v40  ;;  %v636_v40 = vld [vmem:[%s4416_s26 + $0x870] sm:$0xff] }
 0x1b6   : > { %v2660_v63 = vrot.slane %v1734_v54, %v4654_v39  ;;  %1281 = vadd.xlane.f32.xlu0 %v1280_v45  ;;  %v1153_v0 = vpop.xlane.xlu1 %1152  ;;  %v1283_v53 = vadd.f32 %v637_v41, %v636_v40  ;;  %v795_v40 = vld [vmem:[%s4416_s26 + $0xd68] sm:$0xff] }
 0x1b7   : > { %v1737_v4 = vmul.f32 0.00390625, %v1153_v0  ;;  %v1150_v6 = vpop.xlane.xlu0 %1149 }
 0x1b8   : > { %v2661_v8 = vsel %vm2251_vm7, %v2660_v63, %v2656_v60  ;;  %v1736_v5 = vmul.f32 0.00390625, %v1150_v6  ;;  %v1241_v60 = vadd.f32 %v609_v47, %v608_v46  ;;  %v699_v63 = vld [vmem:[%s4416_s26 + $0xa68] sm:$0xff] }
 0x1b9   : > { %v2675_v11 = vrot.slane %v1737_v4, %v4666_v58  ;;  %v2666_v12 = vsel %vm2258_vm8, %v2665_v56, %v2661_v8  ;;  %1425 = vadd.xlane.f32.xlu1 %v1424_v61  ;;  %v698_v61 = vld [vmem:[%s4416_s26 + $0xa60] sm:$0xff] }
 0x1ba   : > { %v2670_v15 = vrot.slane %v1736_v5, %v4670_v62  ;;  %1374 = vadd.xlane.f32.xlu0 %v1373_v1  ;;  %v1159_v16 = vpop.xlane.xlu1 %1158  ;;  %v1376_v8 = vadd.f32 %v699_v63, %v698_v61  ;;  %v857_v61 = vld [vmem:[%s4416_s26 + $0xf58] sm:$0xff] }
 0x1bb   : > { %v1739_v23 = vmul.f32 0.00390625, %v1159_v16  ;;  %v1156_v24 = vpop.xlane.xlu0 %1155 }
 0x1bc   : > { %v2671_v29 = vsel %vm2265_vm9, %v2670_v15, %v2666_v12  ;;  %v1738_v30 = vmul.f32 0.00390625, %v1156_v24  ;;  %v1334_v12 = vadd.f32 %v671_v3, %v670_v2  ;;  %v761_v15 = vld [vmem:[%s4416_s26 + $0xc58] sm:$0xff] }
 0x1bd   : > { %v2685_v32 = vrot.slane %v1739_v23, %v4679_v9  ;;  %v2676_v33 = vsel %vm2272_vm10, %v2675_v11, %v2671_v29  ;;  %1518 = vadd.xlane.f32.xlu1 %v1517_v13  ;;  %v760_v13 = vld [vmem:[%s4416_s26 + $0xc50] sm:$0xff]  ;;  %v733_v23 = vld [vmem:[%s4416_s26 + $0xb78] sm:$0xff] }
 0x1be   : > { %v2680_v35 = vrot.slane %v1738_v30, %v4686_v18  ;;  %1467 = vadd.xlane.f32.xlu0 %v1466_v17  ;;  %v1165_v28 = vpop.xlane.xlu1 %1164  ;;  %v1469_v29 = vadd.f32 %v761_v15, %v760_v13  ;;  %v639_v13 = vld [vmem:[%s4416_s26 + $0x888] sm:$0xff] }
 0x1bf   : > { %v1741_v43 = vmul.f32 0.00390625, %v1165_v28  ;;  %v1162_v45 = vpop.xlane.xlu0 %1161 }
 0x1c0   : > { %v2681_v49 = vsel %vm2279_vm11, %v2680_v35, %v2676_v33  ;;  %v1740_v50 = vmul.f32 0.00390625, %v1162_v45  ;;  %v1427_v33 = vadd.f32 %v733_v23, %v732_v21 }
 0x1c1   : > { %v2695_v51 = vrot.slane %v1741_v43, %v4697_v22  ;;  %v2686_v52 = vsel %vm2286_vm12, %v2685_v32, %v2681_v49  ;;  %1611 = vadd.xlane.f32.xlu1 %v1610_v34  ;;  %v823_v34 = vld [vmem:[%s4416_s26 + $0xe48] sm:$0xff] }
 0x1c2   : > { %v2690_v54 = vrot.slane %v1740_v50, %v4701_v37  ;;  %1560 = vadd.xlane.f32.xlu0 %v1559_v36  ;;  %v1171_v56 = vpop.xlane.xlu1 %1170  ;;  %v794_v36 = vld [vmem:[%s4416_s26 + $0xd60] sm:$0xff] }
 0x1c3   : > { %v1743_v0 = vmul.f32 0.00390625, %v1171_v56  ;;  %v1168_v1 = vpop.xlane.xlu0 %1167 }
 0x1c4   : > { %v2691_v4 = vsel %vm2293_vm13, %v2690_v54, %v2686_v52  ;;  %v1742_v6 = vmul.f32 0.00390625, %v1168_v1  ;;  %v610_v52 = vld [vmem:[%s4416_s26 + $0x7a0] sm:$0xff] }
 0x1c5   : > { %v2696_v59 = vsel %vm2300_vm14, %v2695_v51, %v2691_v4  ;;  %v2704_v7 = vrot.slane %v1743_v0, %v4603_v44  ;;  %1284 = vadd.xlane.f32.xlu1 %v1283_v53  ;;  %v1520_v51 = vadd.f32 %v795_v40, %v794_v36  ;;  %v611_v53 = vld [vmem:[%s4416_s26 + $0x7a8] sm:$0xff] }
 0x1c6   : > { %v2700_v5 = vrot.slane %v1742_v6, %v4596_v38  ;;  %1242 = vadd.xlane.f32.xlu0 %v1241_v60  ;;  %v1177_v11 = vpop.xlane.xlu1 %1176  ;;  %v5054_v16 = vsel %vm3489_vm15, %v2696_v59, %v4917_v20  ;;  %v822_v20 = vld [vmem:[%s4416_s26 + $0xe40] sm:$0xff]  ;;  %v856_v60 = vld [vmem:[%s4416_s26 + $0xf50] sm:$0xff]  ;;  %v1244_v3 = vadd.f32 %v611_v53, %v610_v52  ;;  %v763_v52 = vld [vmem:[%s4416_s26 + $0xc68] sm:$0xff] }
 0x1c7   : > { %v1745_v17 = vmul.f32 0.00390625, %v1177_v11  ;;  %v1174_v19 = vpop.xlane.xlu0 %1173  ;;  %v1562_v47 = vadd.f32 %v823_v34, %v822_v20  ;;  %v1613_v59 = vadd.f32 %v857_v61, %v856_v60  ;;  %v700_v20 = vld [vmem:[%s4416_s26 + $0xa70] sm:$0xff]  ;;  %v701_v34 = vld [vmem:[%s4416_s26 + $0xa78] sm:$0xff] }
 0x1c8   : > { %v2705_v24 = vsel %vm2202_vm0, %v2704_v7, %v2700_v5  ;;  %v1744_v26 = vmul.f32 0.00390625, %v1174_v19  ;;  %v672_v7 = vld [vmem:[%s4416_s26 + $0x990] sm:$0xff] }
 0x1c9   : > { %v2714_v27 = vrot.slane %v1745_v17, %v4600_v42  ;;  %1377 = vadd.xlane.f32.xlu1 %v1376_v8  ;;  %v673_v8 = vld [vmem:[%s4416_s26 + $0x998] sm:$0xff] }
 0x1ca   : > { %v2709_v30 = vrot.slane %v1744_v26, %v4608_v48  ;;  %1335 = vadd.xlane.f32.xlu0 %v1334_v12  ;;  %v1183_v32 = vpop.xlane.xlu1 %1182  ;;  %v638_v12 = vld [vmem:[%s4416_s26 + $0x880] sm:$0xff]  ;;  %v1337_v23 = vadd.f32 %v673_v8, %v672_v7  ;;  %v825_v7 = vld [vmem:[%s4416_s26 + $0xe58] sm:$0xff] }
 0x1cb   : > { %v1747_v35 = vmul.f32 0.00390625, %v1183_v32  ;;  %v1180_v28 = vpop.xlane.xlu0 %1179 }
 0x1cc   : > { %v2710_v41 = vsel %vm2209_vm1, %v2709_v30, %v2705_v24  ;;  %v1746_v43 = vmul.f32 0.00390625, %v1180_v28  ;;  %v735_v30 = vld [vmem:[%s4416_s26 + $0xb88] sm:$0xff] }
 0x1cd   : > { %v2724_v45 = vrot.slane %v1747_v35, %v4617_v57  ;;  %v2715_v46 = vsel %vm2216_vm2, %v2714_v27, %v2710_v41  ;;  %1470 = vadd.xlane.f32.xlu1 %v1469_v29  ;;  %v1286_v27 = vadd.f32 %v639_v13, %v638_v12  ;;  %v734_v29 = vld [vmem:[%s4416_s26 + $0xb80] sm:$0xff] }
 0x1ce   : > { %v2719_v49 = vrot.slane %v1746_v43, %v4613_v55  ;;  %1428 = vadd.xlane.f32.xlu0 %v1427_v33  ;;  %v1189_v50 = vpop.xlane.xlu1 %1188  ;;  %v1430_v41 = vadd.f32 %v735_v30, %v734_v29  ;;  %v613_v29 = vld [vmem:[%s4416_s26 + $0x7b8] sm:$0xff] }
 0x1cf   : > { %v1749_v54 = vmul.f32 0.00390625, %v1189_v50  ;;  %v1186_v56 = vpop.xlane.xlu0 %1185 }
 0x1d0   : > { %v2720_v63 = vsel %vm2223_vm3, %v2719_v49, %v2715_v46  ;;  %v1748_v0 = vmul.f32 0.00390625, %v1186_v56  ;;  %v1379_v46 = vadd.f32 %v701_v34, %v700_v20  ;;  %v797_v49 = vld [vmem:[%s4416_s26 + $0xd78] sm:$0xff] }
 0x1d1   : > { %v2734_v1 = vrot.slane %v1749_v54, %v4636_v14  ;;  %v2725_v2 = vsel %vm2230_vm4, %v2724_v45, %v2720_v63  ;;  %1563 = vadd.xlane.f32.xlu1 %v1562_v47  ;;  %v796_v47 = vld [vmem:[%s4416_s26 + $0xd70] sm:$0xff] }
 0x1d2   : > { %v2729_v4 = vrot.slane %v1748_v0, %v4630_v10  ;;  %1521 = vadd.xlane.f32.xlu0 %v1520_v51  ;;  %v1195_v6 = vpop.xlane.xlu1 %1194  ;;  %v762_v51 = vld [vmem:[%s4416_s26 + $0xc60] sm:$0xff]  ;;  %v1523_v60 = vadd.f32 %v797_v49, %v796_v47 }
 0x1d3   : > { %v1751_v5 = vmul.f32 0.00390625, %v1195_v6  ;;  %v1192_v11 = vpop.xlane.xlu0 %1191 }
 0x1d4   : > { %v2730_v15 = vsel %vm2237_vm5, %v2729_v4, %v2725_v2  ;;  %v1750_v17 = vmul.f32 0.00390625, %v1192_v11  ;;  %v858_v2 = vld [vmem:[%s4416_s26 + $0xf60] sm:$0xff] }
 0x1d5   : > { %v2744_v19 = vrot.slane %v1751_v5, %v4647_v31  ;;  %v2735_v21 = vsel %vm2244_vm6, %v2734_v1, %v2730_v15  ;;  %1245 = vadd.xlane.f32.xlu1 %v1244_v3  ;;  %v1472_v1 = vadd.f32 %v763_v52, %v762_v51  ;;  %v859_v3 = vld [vmem:[%s4416_s26 + $0xf68] sm:$0xff] }
 0x1d6   : > { %v2739_v24 = vrot.slane %v1750_v17, %v4654_v39  ;;  %1614 = vadd.xlane.f32.xlu0 %v1613_v59  ;;  %v1201_v26 = vpop.xlane.xlu1 %1200  ;;  %v824_v59 = vld [vmem:[%s4416_s26 + $0xe50] sm:$0xff]  ;;  %v1616_v12 = vadd.f32 %v859_v3, %v858_v2 }
 0x1d7   : > { %v1753_v32 = vmul.f32 0.00390625, %v1201_v26  ;;  %v1198_v33 = vpop.xlane.xlu0 %1197 }
 0x1d8   : > { %v2740_v35 = vsel %vm2251_vm7, %v2739_v24, %v2735_v21  ;;  %v1752_v28 = vmul.f32 0.00390625, %v1198_v33  ;;  %v640_v21 = vld [vmem:[%s4416_s26 + $0x890] sm:$0xff] }
 0x1d9   : > { %v2754_v36 = vrot.slane %v1753_v32, %v4666_v58  ;;  %v2745_v40 = vsel %vm2258_vm8, %v2744_v19, %v2740_v35  ;;  %1338 = vadd.xlane.f32.xlu1 %v1337_v23  ;;  %v1565_v19 = vadd.f32 %v825_v7, %v824_v59  ;;  %v641_v23 = vld [vmem:[%s4416_s26 + $0x898] sm:$0xff] }
 0x1da   : > { %v2749_v43 = vrot.slane %v1752_v28, %v4670_v62  ;;  %1287 = vadd.xlane.f32.xlu0 %v1286_v27  ;;  %v1216_v45 = vpop.xlane.xlu1 %1215  ;;  %v612_v27 = vld [vmem:[%s4416_s26 + $0x7b0] sm:$0xff]  ;;  %v1289_v34 = vadd.f32 %v641_v23, %v640_v21  ;;  %v798_v21 = vld [vmem:[%s4416_s26 + $0xd80] sm:$0xff]  ;;  %v799_v23 = vld [vmem:[%s4416_s26 + $0xd88] sm:$0xff] }
 0x1db   : > { %v1204_v50 = vpop.xlane.xlu0 %1203  ;;  %v1758_v61 = vmul.f32 0.00390625, %v1216_v45  ;;  %v674_v45 = vld [vmem:[%s4416_s26 + $0x9a0] sm:$0xff] }
 0x1dc   : > { %v2750_v53 = vsel %vm2265_vm9, %v2749_v43, %v2745_v40  ;;  %v1754_v54 = vmul.f32 0.00390625, %v1204_v50  ;;  %v702_v40 = vld [vmem:[%s4416_s26 + $0xa80] sm:$0xff] }
 0x1dd   : > { %v2755_v56 = vsel %vm2272_vm10, %v2754_v36, %v2750_v53  ;;  %1431 = vadd.xlane.f32.xlu1 %v1430_v41  ;;  %v2779_v13 = vrot.slane %v1758_v61, %v4596_v38  ;;  %v1247_v36 = vadd.f32 %v613_v29, %v612_v27  ;;  %v703_v41 = vld [vmem:[%s4416_s26 + $0xa88] sm:$0xff] }
 0x1de   : > { %v2759_v63 = vrot.slane %v1754_v54, %v4686_v18  ;;  %1380 = vadd.xlane.f32.xlu0 %v1379_v46  ;;  %v1222_v0 = vpop.xlane.xlu1 %1221  ;;  %v675_v46 = vld [vmem:[%s4416_s26 + $0x9a8] sm:$0xff]  ;;  %v1382_v50 = vadd.f32 %v703_v41, %v702_v40  ;;  %v861_v40 = vld [vmem:[%s4416_s26 + $0xf78] sm:$0xff] }
 0x1df   : > { %v1760_v4 = vmul.f32 0.00390625, %v1222_v0  ;;  %v1219_v6 = vpop.xlane.xlu0 %1218  ;;  %v1340_v54 = vadd.f32 %v675_v46, %v674_v45  ;;  %v736_v0 = vld [vmem:[%s4416_s26 + $0xb90] sm:$0xff] }
 0x1e0   : > { %v5105_v8 = vsel %vm2279_vm11, %v2759_v63, %v2755_v56  ;;  %v1759_v5 = vmul.f32 0.00390625, %v1219_v6  ;;  %v764_v56 = vld [vmem:[%s4416_s26 + $0xc70] sm:$0xff] }
 0x1e1   : > { %v2788_v11 = vrot.slane %v1760_v4, %v4608_v48  ;;  %1524 = vadd.xlane.f32.xlu1 %v1523_v60  ;;  %v765_v60 = vld [vmem:[%s4416_s26 + $0xc78] sm:$0xff] }
 0x1e2   : > { %v2783_v15 = vrot.slane %v1759_v5, %v4603_v44  ;;  %1473 = vadd.xlane.f32.xlu0 %v1472_v1  ;;  %v1315_v17 = vpop.xlane.xlu1 %1314  ;;  %v737_v1 = vld [vmem:[%s4416_s26 + $0xb98] sm:$0xff]  ;;  %v1475_v6 = vadd.f32 %v765_v60, %v764_v56  ;;  %v642_v56 = vld [vmem:[%s4416_s26 + $0x8a0] sm:$0xff]  ;;  %v643_v60 = vld [vmem:[%s4416_s26 + $0x8a8] sm:$0xff] }
 0x1e3   : > { %v1791_v24 = vmul.f32 0.00390625, %v1315_v17  ;;  %v1312_v26 = vpop.xlane.xlu0 %1311 }
 0x1e4   : > { %v2784_v30 = vsel %vm2202_vm0, %v2783_v15, %v2779_v13  ;;  %v1790_v32 = vmul.f32 0.00390625, %v1312_v26  ;;  %v827_v13 = vld [vmem:[%s4416_s26 + $0xe68] sm:$0xff] }
 0x1e5   : > { %v2941_v33 = vrot.slane %v1791_v24, %v4603_v44  ;;  %1617 = vadd.xlane.f32.xlu1 %v1616_v12  ;;  %v2789_v20 = vsel %vm2209_vm1, %v2788_v11, %v2784_v30  ;;  %v1433_v11 = vadd.f32 %v737_v1, %v736_v0  ;;  %v826_v12 = vld [vmem:[%s4416_s26 + $0xe60] sm:$0xff] }
 0x1e6   : > { %v2937_v35 = vrot.slane %v1790_v32, %v4596_v38  ;;  %1566 = vadd.xlane.f32.xlu0 %v1565_v19  ;;  %v1264_v28 = vpop.xlane.xlu1 %1263  ;;  %v1568_v29 = vadd.f32 %v827_v13, %v826_v12  ;;  %v704_v12 = vld [vmem:[%s4416_s26 + $0xa90] sm:$0xff]  ;;  %v705_v13 = vld [vmem:[%s4416_s26 + $0xa98] sm:$0xff] }
 0x1e7   : > { %v1225_v43 = vpop.xlane.xlu0 %1224  ;;  %v1774_v51 = vmul.f32 0.00390625, %v1264_v28 }
 0x1e8   : > { %v2942_v47 = vsel %vm2202_vm0, %v2941_v33, %v2937_v35  ;;  %v1761_v49 = vmul.f32 0.00390625, %v1225_v43  ;;  %v1526_v33 = vadd.f32 %v799_v23, %v798_v21 }
 0x1e9   : > { %1290 = vadd.xlane.f32.xlu1 %v1289_v34  ;;  %v2858_v59 = vrot.slane %v1774_v51, %v4596_v38  ;;  %v615_v34 = vld [vmem:[%s4416_s26 + $0x7c8] sm:$0xff]  ;;  %v676_v51 = vld [vmem:[%s4416_s26 + $0x9b0] sm:$0xff] }
 0x1ea   : > { %v2793_v52 = vrot.slane %v1761_v49, %v4600_v42  ;;  %1248 = vadd.xlane.f32.xlu0 %v1247_v36  ;;  %v1318_v53 = vpop.xlane.xlu1 %1317  ;;  %v860_v36 = vld [vmem:[%s4416_s26 + $0xf70] sm:$0xff] }
 0x1eb   : > { %v1792_v61 = vmul.f32 0.00390625, %v1318_v53  ;;  %v1267_v63 = vpop.xlane.xlu0 %1266 }
 0x1ec   : > { %v2794_v2 = vsel %vm2216_vm2, %v2793_v52, %v2789_v20  ;;  %v1775_v3 = vmul.f32 0.00390625, %v1267_v63  ;;  %v614_v20 = vld [vmem:[%s4416_s26 + $0x7c0] sm:$0xff]  ;;  %v677_v52 = vld [vmem:[%s4416_s26 + $0x9b8] sm:$0xff] }
 0x1ed   : > { %v2946_v4 = vrot.slane %v1792_v61, %v4608_v48  ;;  %1383 = vadd.xlane.f32.xlu1 %v1382_v50  ;;  %v1250_v46 = vadd.f32 %v615_v34, %v614_v20  ;;  %v1619_v50 = vadd.f32 %v861_v40, %v860_v36  ;;  %v1343_v0 = vadd.f32 %v677_v52, %v676_v51  ;;  %v766_v20 = vld [vmem:[%s4416_s26 + $0xc80] sm:$0xff]  ;;  %v767_v34 = vld [vmem:[%s4416_s26 + $0xc88] sm:$0xff]  ;;  %v828_v51 = vld [vmem:[%s4416_s26 + $0xe70] sm:$0xff] }
 0x1ee   : > { %v2862_v7 = vrot.slane %v1775_v3, %v4603_v44  ;;  %1341 = vadd.xlane.f32.xlu0 %v1340_v54  ;;  %v1411_v5 = vpop.xlane.xlu1 %1410  ;;  %v829_v52 = vld [vmem:[%s4416_s26 + $0xe78] sm:$0xff] }
 0x1ef   : > { %v2947_v15 = vsel %vm2209_vm1, %v2946_v4, %v2942_v47  ;;  %v1823_v17 = vmul.f32 0.00390625, %v1411_v5  ;;  %v1408_v19 = vpop.xlane.xlu0 %1407 }
 0x1f0   : > { %v2863_v24 = vsel %vm2202_vm0, %v2862_v7, %v2858_v59  ;;  %v1822_v26 = vmul.f32 0.00390625, %v1408_v19  ;;  %v738_v59 = vld [vmem:[%s4416_s26 + $0xba0] sm:$0xff]  ;;  %v739_v7 = vld [vmem:[%s4416_s26 + $0xba8] sm:$0xff] }
 0x1f1   : > { %v3099_v27 = vrot.slane %v1823_v17, %v4603_v44  ;;  %1476 = vadd.xlane.f32.xlu1 %v1475_v6  ;;  %v1292_v6 = vadd.f32 %v643_v60, %v642_v56  ;;  %v1436_v21 = vadd.f32 %v739_v7, %v738_v59 }
 0x1f2   : > { %v3095_v30 = vrot.slane %v1822_v26, %v4596_v38  ;;  %1434 = vadd.xlane.f32.xlu0 %v1433_v11  ;;  %v1270_v32 = vpop.xlane.xlu1 %1269 }
 0x1f3   : > { %v1776_v35 = vmul.f32 0.00390625, %v1270_v32  ;;  %v1228_v28 = vpop.xlane.xlu0 %1227 }
 0x1f4   : > { %v3100_v41 = vsel %vm2202_vm0, %v3099_v27, %v3095_v30  ;;  %v1762_v43 = vmul.f32 0.00390625, %v1228_v28  ;;  %v1385_v27 = vadd.f32 %v705_v13, %v704_v12  ;;  %v801_v30 = vld [vmem:[%s4416_s26 + $0xd98] sm:$0xff] }
 0x1f5   : > { %v2867_v45 = vrot.slane %v1776_v35, %v4608_v48  ;;  %1569 = vadd.xlane.f32.xlu1 %v1568_v29  ;;  %v800_v29 = vld [vmem:[%s4416_s26 + $0xd90] sm:$0xff]  ;;  %v617_v12 = vld [vmem:[%s4416_s26 + $0x7d8] sm:$0xff] }
 0x1f6   : > { %v2798_v47 = vrot.slane %v1762_v43, %v4613_v55  ;;  %1527 = vadd.xlane.f32.xlu0 %v1526_v33  ;;  %v1360_v49 = vpop.xlane.xlu1 %1359  ;;  %v1529_v40 = vadd.f32 %v801_v30, %v800_v29 }
 0x1f7   : > { %v5150_v53 = vsel %vm2209_vm1, %v2867_v45, %v2863_v24  ;;  %v1321_v54 = vpop.xlane.xlu0 %1320  ;;  %v1806_v1 = vmul.f32 0.00390625, %v1360_v49 }
 0x1f8   : > { %v5155_v61 = vsel %vm2223_vm3, %v2798_v47, %v2794_v2  ;;  %v1793_v63 = vmul.f32 0.00390625, %v1321_v54  ;;  %v863_v47 = vld [vmem:[%s4416_s26 + $0xf88] sm:$0xff] }
 0x1f9   : > { %1251 = vadd.xlane.f32.xlu1 %v1250_v46  ;;  %v3016_v23 = vrot.slane %v1806_v1, %v4596_v38  ;;  %v1478_v46 = vadd.f32 %v767_v34, %v766_v20 }
 0x1fa   : > { %v2951_v3 = vrot.slane %v1793_v63, %v4600_v42  ;;  %1620 = vadd.xlane.f32.xlu0 %v1619_v50  ;;  %v1414_v4 = vpop.xlane.xlu1 %1413 }
 0x1fb   : > { %v1824_v5 = vmul.f32 0.00390625, %v1414_v4  ;;  %v1363_v11 = vpop.xlane.xlu0 %1362  ;;  %v644_v4 = vld [vmem:[%s4416_s26 + $0x8b0] sm:$0xff] }
 0x1fc   : > { %v5163_v2 = vsel %vm2216_vm2, %v2951_v3, %v2947_v15  ;;  %v1807_v17 = vmul.f32 0.00390625, %v1363_v11  ;;  %v1571_v3 = vadd.f32 %v829_v52, %v828_v51  ;;  %v616_v11 = vld [vmem:[%s4416_s26 + $0x7d0] sm:$0xff] }
 0x1fd   : > { %v3104_v19 = vrot.slane %v1824_v5, %v4608_v48  ;;  %1344 = vadd.xlane.f32.xlu1 %v1343_v0 }
 0x1fe   : > { %v3020_v24 = vrot.slane %v1807_v17, %v4603_v44  ;;  %1293 = vadd.xlane.f32.xlu0 %v1292_v6  ;;  %v1507_v26 = vpop.xlane.xlu1 %1506  ;;  %v645_v6 = vld [vmem:[%s4416_s26 + $0x8b8] sm:$0xff] }
 0x1ff   : > { %v5171_v15 = vsel %vm2209_vm1, %v3104_v19, %v3100_v41  ;;  %v1855_v32 = vmul.f32 0.00390625, %v1507_v26  ;;  %v1504_v33 = vpop.xlane.xlu0 %1503  ;;  %v862_v41 = vld [vmem:[%s4416_s26 + $0xf80] sm:$0xff] }
 0x200   : > { %v3021_v35 = vsel %vm2202_vm0, %v3020_v24, %v3016_v23  ;;  %v1854_v28 = vmul.f32 0.00390625, %v1504_v33  ;;  %v1622_v63 = vadd.f32 %v863_v47, %v862_v41  ;;  %v1253_v24 = vadd.f32 %v617_v12, %v616_v11  ;;  %v706_v26 = vld [vmem:[%s4416_s26 + $0xaa0] sm:$0xff]  ;;  %v740_v47 = vld [vmem:[%s4416_s26 + $0xbb0] sm:$0xff] }
 0x201   : > { %v3257_v36 = vrot.slane %v1855_v32, %v4603_v44  ;;  %1437 = vadd.xlane.f32.xlu1 %v1436_v21  ;;  %v1295_v21 = vadd.f32 %v645_v6, %v644_v4  ;;  %v679_v32 = vld [vmem:[%s4416_s26 + $0x9c8] sm:$0xff] }
 0x202   : > { %v3253_v43 = vrot.slane %v1854_v28, %v4596_v38  ;;  %1386 = vadd.xlane.f32.xlu0 %v1385_v27  ;;  %v1273_v45 = vpop.xlane.xlu1 %1272  ;;  %v707_v27 = vld [vmem:[%s4416_s26 + $0xaa8] sm:$0xff] }
 0x203   : > { %v1777_v49 = vmul.f32 0.00390625, %v1273_v45  ;;  %v1231_v50 = vpop.xlane.xlu0 %1230  ;;  %v1388_v34 = vadd.f32 %v707_v27, %v706_v26  ;;  %v769_v45 = vld [vmem:[%s4416_s26 + $0xc98] sm:$0xff] }
 0x204   : > { %v3258_v54 = vsel %vm2202_vm0, %v3257_v36, %v3253_v43  ;;  %v1763_v56 = vmul.f32 0.00390625, %v1231_v50 }
 0x205   : > { %v2872_v60 = vrot.slane %v1777_v49, %v4600_v42  ;;  %1530 = vadd.xlane.f32.xlu1 %v1529_v40  ;;  %v741_v49 = vld [vmem:[%s4416_s26 + $0xbb8] sm:$0xff] }
 0x206   : > { %v2803_v0 = vrot.slane %v1763_v56, %v4617_v57  ;;  %1479 = vadd.xlane.f32.xlu0 %v1478_v46  ;;  %v1366_v1 = vpop.xlane.xlu1 %1365 }
 0x207   : > { %v5189_v59 = vsel %vm2216_vm2, %v2872_v60, %v5150_v53  ;;  %v1808_v7 = vmul.f32 0.00390625, %v1366_v1  ;;  %v1324_v5 = vpop.xlane.xlu0 %1323  ;;  %v830_v1 = vld [vmem:[%s4416_s26 + $0xe80] sm:$0xff] }
 0x208   : > { %v5195_v13 = vsel %vm2230_vm4, %v2803_v0, %v5155_v61  ;;  %v1794_v17 = vmul.f32 0.00390625, %v1324_v5  ;;  %v678_v61 = vld [vmem:[%s4416_s26 + $0x9c0] sm:$0xff]  ;;  %v1439_v0 = vadd.f32 %v741_v49, %v740_v47  ;;  %v803_v5 = vld [vmem:[%s4416_s26 + $0xda8] sm:$0xff] }
 0x209   : > { %v3025_v19 = vrot.slane %v1808_v7, %v4608_v48  ;;  %1623 = vadd.xlane.f32.xlu1 %v1622_v63  ;;  %v1346_v43 = vadd.f32 %v679_v32, %v678_v61  ;;  %v802_v7 = vld [vmem:[%s4416_s26 + $0xda0] sm:$0xff]  ;;  %v865_v61 = vld [vmem:[%s4416_s26 + $0xf98] sm:$0xff] }
 0x20a   : > { %v2956_v23 = vrot.slane %v1794_v17, %v4613_v55  ;;  %1572 = vadd.xlane.f32.xlu0 %v1571_v3  ;;  %v1456_v53 = vpop.xlane.xlu1 %1455  ;;  %v831_v3 = vld [vmem:[%s4416_s26 + $0xe88] sm:$0xff]  ;;  %v618_v49 = vld [vmem:[%s4416_s26 + $0x7e0] sm:$0xff] }
 0x20b   : > { %v5202_v29 = vsel %vm2209_vm1, %v3025_v19, %v3021_v35  ;;  %v1417_v30 = vpop.xlane.xlu0 %1416  ;;  %v1838_v28 = vmul.f32 0.00390625, %v1456_v53  ;;  %v768_v35 = vld [vmem:[%s4416_s26 + $0xc90] sm:$0xff]  ;;  %v1574_v19 = vadd.f32 %v831_v3, %v830_v1  ;;  %v1532_v53 = vadd.f32 %v803_v5, %v802_v7  ;;  %v709_v3 = vld [vmem:[%s4416_s26 + $0xab8] sm:$0xff] }
 0x20c   : > { %v5208_v33 = vsel %vm2223_vm3, %v2956_v23, %v5163_v2  ;;  %v1825_v20 = vmul.f32 0.00390625, %v1417_v30  ;;  %v1481_v52 = vadd.f32 %v769_v45, %v768_v35  ;;  %v864_v30 = vld [vmem:[%s4416_s26 + $0xf90] sm:$0xff]  ;;  %v646_v35 = vld [vmem:[%s4416_s26 + $0x8c0] sm:$0xff]  ;;  %v647_v45 = vld [vmem:[%s4416_s26 + $0x8c8] sm:$0xff] }
 0x20d   : > { %1296 = vadd.xlane.f32.xlu1 %v1295_v21  ;;  %v3174_v56 = vrot.slane %v1838_v28, %v4596_v38  ;;  %v708_v1 = vld [vmem:[%s4416_s26 + $0xab0] sm:$0xff]  ;;  %v681_v5 = vld [vmem:[%s4416_s26 + $0x9d8] sm:$0xff] }
 0x20e   : > { %v3109_v36 = vrot.slane %v1825_v20, %v4600_v42  ;;  %1254 = vadd.xlane.f32.xlu0 %v1253_v24  ;;  %v1510_v40 = vpop.xlane.xlu1 %1509  ;;  %v585_v24 = vld [vmem:[%s4416_s26 + $0x6d8] sm:$0xff]  ;;  %v680_v7 = vld [vmem:[%s4416_s26 + $0x9d0] sm:$0xff] }
 0x20f   : > { %v1856_v46 = vmul.f32 0.00390625, %v1510_v40  ;;  %v1459_v41 = vpop.xlane.xlu0 %1458 }
 0x210   : > { %v5217_v2 = vsel %vm2216_vm2, %v3109_v36, %v5171_v15  ;;  %v1839_v50 = vmul.f32 0.00390625, %v1459_v41 }
 0x211   : > { %v3262_v51 = vrot.slane %v1856_v46, %v4608_v48  ;;  %1389 = vadd.xlane.f32.xlu1 %v1388_v34 }
 0x212   : > { %v3178_v60 = vrot.slane %v1839_v50, %v4603_v44  ;;  %1347 = vadd.xlane.f32.xlu0 %v1346_v43  ;;  %v1603_v63 = vpop.xlane.xlu1 %1602  ;;  %v1625_v43 = vadd.f32 %v865_v61, %v864_v30  ;;  %v619_v50 = vld [vmem:[%s4416_s26 + $0x7e8] sm:$0xff] }
 0x213   : > { %v5225_v15 = vsel %vm2209_vm1, %v3262_v51, %v3258_v54  ;;  %v1887_v4 = vmul.f32 0.00390625, %v1603_v63  ;;  %v1600_v6 = vpop.xlane.xlu0 %1599  ;;  %v584_v54 = vld [vmem:[%s4416_s26 + $0x6d0] sm:$0xff]  ;;  %v743_v30 = vld [vmem:[%s4416_s26 + $0xbc8] sm:$0xff] }
 0x214   : > { %v3179_v11 = vsel %vm2202_vm0, %v3178_v60, %v3174_v56  ;;  %v1886_v12 = vmul.f32 0.00390625, %v1600_v6  ;;  %v1205_v28 = vadd.f32 %v585_v24, %v584_v54  ;;  %v1298_v60 = vadd.f32 %v647_v45, %v646_v35  ;;  %v770_v54 = vld [vmem:[%s4416_s26 + $0xca0] sm:$0xff]  ;;  %v771_v24 = vld [vmem:[%s4416_s26 + $0xca8] sm:$0xff]  ;;  %v833_v35 = vld [vmem:[%s4416_s26 + $0xe98] sm:$0xff] }
 0x215   : > { %v3415_v17 = vrot.slane %v1887_v4, %v4603_v44  ;;  %1482 = vadd.xlane.f32.xlu1 %v1481_v52 }
 0x216   : > { %v3411_v21 = vrot.slane %v1886_v12, %v4596_v38  ;;  %1440 = vadd.xlane.f32.xlu0 %v1439_v0  ;;  %v1276_v23 = vpop.xlane.xlu1 %1275  ;;  %v1256_v0 = vadd.f32 %v619_v50, %v618_v49  ;;  %v805_v49 = vld [vmem:[%s4416_s26 + $0xdb8] sm:$0xff] }
 0x217   : > { %v1778_v26 = vmul.f32 0.00390625, %v1276_v23  ;;  %v1234_v27 = vpop.xlane.xlu0 %1233 }
 0x218   : > { %v5237_v32 = vsel %vm2202_vm0, %v3415_v17, %v3411_v21  ;;  %v1764_v20 = vmul.f32 0.00390625, %v1234_v27  ;;  %v1391_v21 = vadd.f32 %v709_v3, %v708_v1  ;;  %v586_v1 = vld [vmem:[%s4416_s26 + $0x6e0] sm:$0xff]  ;;  %v587_v3 = vld [vmem:[%s4416_s26 + $0x6e8] sm:$0xff] }
 0x219   : > { %v2877_v34 = vrot.slane %v1778_v26, %v4613_v55  ;;  %1575 = vadd.xlane.f32.xlu1 %v1574_v19 }
 0x21a   : > { %v2808_v36 = vrot.slane %v1764_v20, %v4630_v10  ;;  %1533 = vadd.xlane.f32.xlu0 %v1532_v53  ;;  %v1369_v40 = vpop.xlane.xlu1 %1368  ;;  %v1349_v53 = vadd.f32 %v681_v5, %v680_v7  ;;  %v866_v7 = vld [vmem:[%s4416_s26 + $0xfa0] sm:$0xff]  ;;  %v867_v5 = vld [vmem:[%s4416_s26 + $0xfa8] sm:$0xff] }
 0x21b   : > { %v5245_v46 = vsel %vm2223_vm3, %v2877_v34, %v5189_v59  ;;  %v1809_v41 = vmul.f32 0.00390625, %v1369_v40  ;;  %v1327_v47 = vpop.xlane.xlu0 %1326  ;;  %v1484_v34 = vadd.f32 %v771_v24, %v770_v54 }
 0x21c   : > { %v5251_v51 = vsel %vm2237_vm5, %v2808_v36, %v5195_v13  ;;  %v1795_v52 = vmul.f32 0.00390625, %v1327_v47  ;;  %v804_v47 = vld [vmem:[%s4416_s26 + $0xdb0] sm:$0xff] }
 0x21d   : > { %v3030_v56 = vrot.slane %v1809_v41, %v4600_v42  ;;  %1206 = vadd.xlane.f32.xlu1 %v1205_v28 }
 0x21e   : > { %v2961_v63 = vrot.slane %v1795_v52, %v4617_v57  ;;  %1626 = vadd.xlane.f32.xlu0 %v1625_v43  ;;  %v1462_v59 = vpop.xlane.xlu1 %1461 }
 0x21f   : > { %v5259_v4 = vsel %vm2216_vm2, %v3030_v56, %v5202_v29  ;;  %v1840_v13 = vmul.f32 0.00390625, %v1462_v59  ;;  %v1420_v6 = vpop.xlane.xlu0 %1419 }
 0x220   : > { %v5265_v12 = vsel %vm2230_vm4, %v2961_v63, %v5208_v33  ;;  %v1826_v17 = vmul.f32 0.00390625, %v1420_v6  ;;  %v742_v33 = vld [vmem:[%s4416_s26 + $0xbc0] sm:$0xff] }
 0x221   : > { %v3183_v19 = vrot.slane %v1840_v13, %v4608_v48  ;;  %1299 = vadd.xlane.f32.xlu1 %v1298_v60  ;;  %v1442_v43 = vadd.f32 %v743_v30, %v742_v33  ;;  %v620_v33 = vld [vmem:[%s4416_s26 + $0x7f0] sm:$0xff]  ;;  %v621_v30 = vld [vmem:[%s4416_s26 + $0x7f8] sm:$0xff] }
 0x222   : > { %v3114_v23 = vrot.slane %v1826_v17, %v4613_v55  ;;  %1257 = vadd.xlane.f32.xlu0 %v1256_v0  ;;  %v1552_v29 = vpop.xlane.xlu1 %1551  ;;  %v1535_v0 = vadd.f32 %v805_v49, %v804_v47  ;;  %v682_v47 = vld [vmem:[%s4416_s26 + $0x9e0] sm:$0xff]  ;;  %v683_v49 = vld [vmem:[%s4416_s26 + $0x9e8] sm:$0xff] }
 0x223   : > { %v5272_v26 = vsel %vm2209_vm1, %v3183_v19, %v3179_v11  ;;  %v1513_v27 = vpop.xlane.xlu0 %1512  ;;  %v1870_v28 = vmul.f32 0.00390625, %v1552_v29  ;;  %v832_v11 = vld [vmem:[%s4416_s26 + $0xe90] sm:$0xff]  ;;  %v1208_v19 = vadd.f32 %v587_v3, %v586_v1  ;;  %v1628_v29 = vadd.f32 %v867_v5, %v866_v7  ;;  %v773_v1 = vld [vmem:[%s4416_s26 + $0xcb8] sm:$0xff] }
 0x224   : > { %v5278_v61 = vsel %vm2223_vm3, %v3114_v23, %v5217_v2  ;;  %v1857_v20 = vmul.f32 0.00390625, %v1513_v27  ;;  %v1577_v56 = vadd.f32 %v833_v35, %v832_v11  ;;  %v710_v11 = vld [vmem:[%s4416_s26 + $0xac0] sm:$0xff]  ;;  %v711_v35 = vld [vmem:[%s4416_s26 + $0xac8] sm:$0xff]  ;;  %v745_v7 = vld [vmem:[%s4416_s26 + $0xbd8] sm:$0xff] }
 0x225   : > { %1392 = vadd.xlane.f32.xlu1 %v1391_v21  ;;  %v3332_v60 = vrot.slane %v1870_v28, %v4596_v38 }
 0x226   : > { %v3267_v36 = vrot.slane %v1857_v20, %v4600_v42  ;;  %1350 = vadd.xlane.f32.xlu0 %v1349_v53  ;;  %v1606_v40 = vpop.xlane.xlu1 %1605  ;;  %v649_v53 = vld [vmem:[%s4416_s26 + $0x8d8] sm:$0xff] }
 0x227   : > { %v1888_v45 = vmul.f32 0.00390625, %v1606_v40  ;;  %v1555_v41 = vpop.xlane.xlu0 %1554 }
 0x228   : > { %v5287_v2 = vsel %vm2216_vm2, %v3267_v36, %v5225_v15  ;;  %v1871_v50 = vmul.f32 0.00390625, %v1555_v41 }
 0x229   : > { %v3420_v52 = vrot.slane %v1888_v45, %v4608_v48  ;;  %1485 = vadd.xlane.f32.xlu1 %v1484_v34 }
 0x22a   : > { %v3336_v63 = vrot.slane %v1871_v50, %v4603_v44  ;;  %1443 = vadd.xlane.f32.xlu0 %v1442_v43  ;;  %v1279_v59 = vpop.xlane.xlu1 %1278 }
 0x22b   : > { %v5296_v15 = vsel %vm2209_vm1, %v3420_v52, %v5237_v32  ;;  %v1779_v13 = vmul.f32 0.00390625, %v1279_v59  ;;  %v1237_v6 = vpop.xlane.xlu0 %1236  ;;  %v648_v32 = vld [vmem:[%s4416_s26 + $0x8d0] sm:$0xff] }
 0x22c   : > { %v3337_v38 = vsel %vm2202_vm0, %v3336_v63, %v3332_v60  ;;  %v1765_v44 = vmul.f32 0.00390625, %v1237_v6  ;;  %v1301_v36 = vadd.f32 %v649_v53, %v648_v32  ;;  %v1394_v60 = vadd.f32 %v711_v35, %v710_v11  ;;  %v744_v6 = vld [vmem:[%s4416_s26 + $0xbd0] sm:$0xff]  ;;  %v835_v32 = vld [vmem:[%s4416_s26 + $0xea8] sm:$0xff] }
 0x22d   : > { %v2882_v17 = vrot.slane %v1779_v13, %v4617_v57  ;;  %1578 = vadd.xlane.f32.xlu1 %v1577_v56  ;;  %vm3491_vm0 = vcmask 1043459  }
 0x22e   : > { %v2813_v21 = vrot.slane %v1765_v44, %v4636_v14  ;;  %1536 = vadd.xlane.f32.xlu0 %v1535_v0  ;;  %v1372_v23 = vpop.xlane.xlu1 %1371  ;;  %v772_v0 = vld [vmem:[%s4416_s26 + $0xcb0] sm:$0xff] }
 0x22f   : > { %v5307_v54 = vsel %vm2230_vm4, %v2882_v17, %v5245_v46  ;;  %v1810_v24 = vmul.f32 0.00390625, %v1372_v23  ;;  %v1330_v27 = vpop.xlane.xlu0 %1329  ;;  %v1259_v46 = vadd.f32 %v621_v30, %v620_v33  ;;  %v807_v33 = vld [vmem:[%s4416_s26 + $0xdc8] sm:$0xff] }
 0x230   : > { %v2814_v20 = vsel %vm2244_vm6, %v2813_v21, %v5251_v51  ;;  %v1796_v34 = vmul.f32 0.00390625, %v1330_v27 }
 0x231   : > { %v3035_v28 = vrot.slane %v1810_v24, %v4613_v55  ;;  %1209 = vadd.xlane.f32.xlu1 %v1208_v19  ;;  %v1487_v19 = vadd.f32 %v773_v1, %v772_v0 }
 0x232   : > { %v2966_v40 = vrot.slane %v1796_v34, %v4630_v10  ;;  %1629 = vadd.xlane.f32.xlu0 %v1628_v29  ;;  %v1465_v43 = vpop.xlane.xlu1 %1464  ;;  %v834_v29 = vld [vmem:[%s4416_s26 + $0xea0] sm:$0xff] }
 0x233   : > { %v5319_v45 = vsel %vm2223_vm3, %v3035_v28, %v5259_v4  ;;  %v1841_v41 = vmul.f32 0.00390625, %v1465_v43  ;;  %v1423_v51 = vpop.xlane.xlu0 %1422  ;;  %v1352_v4 = vadd.f32 %v683_v49, %v682_v47  ;;  %v1580_v28 = vadd.f32 %v835_v32, %v834_v29  ;;  %v588_v43 = vld [vmem:[%s4416_s26 + $0x6f0] sm:$0xff] }
 0x234   : > { %v2967_v50 = vsel %vm2237_vm5, %v2966_v40, %v5265_v12  ;;  %v1827_v52 = vmul.f32 0.00390625, %v1423_v51  ;;  %v869_v51 = vld [vmem:[%s4416_s26 + $0xfb8] sm:$0xff] }
 0x235   : > { %v3188_v56 = vrot.slane %v1841_v41, %v4600_v42  ;;  %1302 = vadd.xlane.f32.xlu1 %v1301_v36 }
 0x236   : > { %v3119_v63 = vrot.slane %v1827_v52, %v4617_v57  ;;  %1260 = vadd.xlane.f32.xlu0 %v1259_v46  ;;  %v1558_v59 = vpop.xlane.xlu1 %1557  ;;  %v589_v46 = vld [vmem:[%s4416_s26 + $0x6f8] sm:$0xff] }
 0x237   : > { %v5331_v3 = vsel %vm2216_vm2, %v3188_v56, %v5272_v26  ;;  %v1872_v13 = vmul.f32 0.00390625, %v1558_v59  ;;  %v1516_v12 = vpop.xlane.xlu0 %1515  ;;  %v1445_v26 = vadd.f32 %v745_v7, %v744_v6  ;;  %v1211_v56 = vadd.f32 %v589_v46, %v588_v43  ;;  %v684_v59 = vld [vmem:[%s4416_s26 + $0x9f0] sm:$0xff] }
 0x238   : > { %v3120_v5 = vsel %vm2230_vm4, %v3119_v63, %v5278_v61  ;;  %v1858_v44 = vmul.f32 0.00390625, %v1516_v12  ;;  %v806_v61 = vld [vmem:[%s4416_s26 + $0xdc0] sm:$0xff]  ;;  %v651_v12 = vld [vmem:[%s4416_s26 + $0x8e8] sm:$0xff] }
 0x239   : > { %v3341_v17 = vrot.slane %v1872_v13, %v4608_v48  ;;  %1395 = vadd.xlane.f32.xlu1 %v1394_v60 }
 0x23a   : > { %v3272_v21 = vrot.slane %v1858_v44, %v4613_v55  ;;  %1353 = vadd.xlane.f32.xlu0 %v1352_v4  ;;  %v1240_v23 = vpop.xlane.xlu1 %1239  ;;  %v685_v4 = vld [vmem:[%s4416_s26 + $0x9f8] sm:$0xff] }
 0x23b   : > { %v5342_v53 = vsel %vm2209_vm1, %v3341_v17, %v3337_v38  ;;  %v1766_v24 = vmul.f32 0.00390625, %v1240_v23  ;;  %v1609_v27 = vpop.xlane.xlu0 %1608  ;;  %v1538_v38 = vadd.f32 %v807_v33, %v806_v61  ;;  %v1355_v17 = vadd.f32 %v685_v4, %v684_v59  ;;  %v746_v23 = vld [vmem:[%s4416_s26 + $0xbe0] sm:$0xff] }
 0x23c   : > { %v3273_v48 = vsel %vm2223_vm3, %v3272_v21, %v5287_v2  ;;  %v1889_v30 = vmul.f32 0.00390625, %v1609_v27  ;;  %v868_v2 = vld [vmem:[%s4416_s26 + $0xfb0] sm:$0xff]  ;;  %v713_v27 = vld [vmem:[%s4416_s26 + $0xad8] sm:$0xff]  ;;  %vm3493_vm1 = vcmask 1044484  }
 0x23d   : > { %v2818_v34 = vrot.slane %v1766_v24, %v4654_v39  ;;  %1488 = vadd.xlane.f32.xlu1 %v1487_v19 }
 0x23e   : > { %v3425_v36 = vrot.slane %v1889_v30, %v4600_v42  ;;  %1446 = vadd.xlane.f32.xlu0 %v1445_v26  ;;  %v1333_v40 = vpop.xlane.xlu1 %1332  ;;  %v747_v26 = vld [vmem:[%s4416_s26 + $0xbe8] sm:$0xff] }
 0x23f   : > { %v5353_v11 = vsel %vm2251_vm7, %v2818_v34, %v2814_v20  ;;  %v1797_v35 = vmul.f32 0.00390625, %v1333_v40  ;;  %v1282_v41 = vpop.xlane.xlu0 %1281  ;;  %v1631_v20 = vadd.f32 %v869_v51, %v868_v2  ;;  %v1448_v34 = vadd.f32 %v747_v26, %v746_v23  ;;  %v808_v40 = vld [vmem:[%s4416_s26 + $0xdd0] sm:$0xff] }
 0x240   : > { %v3426_v47 = vsel %vm2216_vm2, %v3425_v36, %v5296_v15  ;;  %v1780_v49 = vmul.f32 0.00390625, %v1282_v41  ;;  %v650_v15 = vld [vmem:[%s4416_s26 + $0x8e0] sm:$0xff]  ;;  %v775_v41 = vld [vmem:[%s4416_s26 + $0xcc8] sm:$0xff] }
 0x241   : > { %v2971_v52 = vrot.slane %v1797_v35, %v4636_v14  ;;  %1581 = vadd.xlane.f32.xlu1 %v1580_v28 }
 0x242   : > { %v2887_v60 = vrot.slane %v1780_v49, %v4630_v10  ;;  %1539 = vadd.xlane.f32.xlu0 %v1538_v38  ;;  %v1426_v63 = vpop.xlane.xlu1 %1425  ;;  %v809_v38 = vld [vmem:[%s4416_s26 + $0xdd8] sm:$0xff] }
 0x243   : > { %v5364_v0 = vsel %vm2244_vm6, %v2971_v52, %v2967_v50  ;;  %v1828_v1 = vmul.f32 0.00390625, %v1426_v63  ;;  %v1375_v13 = vpop.xlane.xlu0 %1374  ;;  %v1304_v50 = vadd.f32 %v651_v12, %v650_v15  ;;  %v1541_v52 = vadd.f32 %v809_v38, %v808_v40  ;;  %v870_v63 = vld [vmem:[%s4416_s26 + $0xfc0] sm:$0xff] }
 0x244   : > { %v2888_v6 = vsel %vm2237_vm5, %v2887_v60, %v5307_v54  ;;  %v1811_v7 = vmul.f32 0.00390625, %v1375_v13  ;;  %v712_v54 = vld [vmem:[%s4416_s26 + $0xad0] sm:$0xff]  ;;  %v837_v13 = vld [vmem:[%s4416_s26 + $0xeb8] sm:$0xff] }
 0x245   : > { %v3124_v44 = vrot.slane %v1828_v1, %v4630_v10  ;;  %1212 = vadd.xlane.f32.xlu1 %v1211_v56 }
 0x246   : > { %v3040_v19 = vrot.slane %v1811_v7, %v4617_v57  ;;  %1632 = vadd.xlane.f32.xlu0 %v1631_v20  ;;  %v1519_v21 = vpop.xlane.xlu1 %1518  ;;  %v871_v20 = vld [vmem:[%s4416_s26 + $0xfc8] sm:$0xff] }
 0x247   : > { %v5375_v29 = vsel %vm2237_vm5, %v3124_v44, %v3120_v5  ;;  %v1859_v32 = vmul.f32 0.00390625, %v1519_v21  ;;  %v1468_v24 = vpop.xlane.xlu0 %1467  ;;  %v1397_v5 = vadd.f32 %v713_v27, %v712_v54  ;;  %v1634_v7 = vadd.f32 %v871_v20, %v870_v63  ;;  %v715_v21 = vld [vmem:[%s4416_s26 + $0xae8] sm:$0xff] }
 0x248   : > { %v3041_v61 = vsel %vm2230_vm4, %v3040_v19, %v5319_v45  ;;  %v1842_v33 = vmul.f32 0.00390625, %v1468_v24  ;;  %v774_v45 = vld [vmem:[%s4416_s26 + $0xcc0] sm:$0xff] }
 0x249   : > { %v3277_v30 = vrot.slane %v1859_v32, %v4617_v57  ;;  %1356 = vadd.xlane.f32.xlu1 %v1355_v17  ;;  %v714_v19 = vld [vmem:[%s4416_s26 + $0xae0] sm:$0xff]  ;;  %v653_v32 = vld [vmem:[%s4416_s26 + $0x8f8] sm:$0xff] }
 0x24a   : > { %v3193_v28 = vrot.slane %v1842_v33, %v4613_v55  ;;  %1305 = vadd.xlane.f32.xlu0 %v1304_v50  ;;  %v1612_v36 = vpop.xlane.xlu1 %1611  ;;  %v1400_v33 = vadd.f32 %v715_v21, %v714_v19  ;;  %v872_v21 = vld [vmem:[%s4416_s26 + $0xfd0] sm:$0xff] }
 0x24b   : > { %v5386_v43 = vsel %vm2230_vm4, %v3277_v30, %v3273_v48  ;;  %v1890_v46 = vmul.f32 0.00390625, %v1612_v36  ;;  %v1561_v35 = vpop.xlane.xlu0 %1560  ;;  %v1490_v48 = vadd.f32 %v775_v41, %v774_v45  ;;  %v777_v36 = vld [vmem:[%s4416_s26 + $0xcd8] sm:$0xff] }
 0x24c   : > { %v3194_v2 = vsel %vm2223_vm3, %v3193_v28, %v5331_v3  ;;  %v1873_v51 = vmul.f32 0.00390625, %v1561_v35  ;;  %v836_v3 = vld [vmem:[%s4416_s26 + $0xeb0] sm:$0xff] }
 0x24d   : > { %v3430_v49 = vrot.slane %v1890_v46, %v4613_v55  ;;  %1449 = vadd.xlane.f32.xlu1 %v1448_v34  ;;  %v776_v28 = vld [vmem:[%s4416_s26 + $0xcd0] sm:$0xff]  ;;  %v749_v46 = vld [vmem:[%s4416_s26 + $0xbf8] sm:$0xff] }
 0x24e   : > { %v3346_v56 = vrot.slane %v1873_v51, %v4600_v42  ;;  %1398 = vadd.xlane.f32.xlu0 %v1397_v5  ;;  %v1285_v60 = vpop.xlane.xlu1 %1284  ;;  %v1493_v51 = vadd.f32 %v777_v36, %v776_v28  ;;  %v778_v28 = vld [vmem:[%s4416_s26 + $0xce0] sm:$0xff]  ;;  %v779_v36 = vld [vmem:[%s4416_s26 + $0xce8] sm:$0xff] }
 0x24f   : > { %v5397_v59 = vsel %vm2223_vm3, %v3430_v49, %v3426_v47  ;;  %v1781_v4 = vmul.f32 0.00390625, %v1285_v60  ;;  %v1243_v1 = vpop.xlane.xlu0 %1242  ;;  %v1583_v47 = vadd.f32 %v837_v13, %v836_v3  ;;  %v839_v60 = vld [vmem:[%s4416_s26 + $0xec8] sm:$0xff] }
 0x250   : > { %v3347_v15 = vsel %vm2216_vm2, %v3346_v56, %v5342_v53  ;;  %v1767_v42 = vmul.f32 0.00390625, %v1243_v1  ;;  %v652_v53 = vld [vmem:[%s4416_s26 + $0x8f0] sm:$0xff]  ;;  %v838_v56 = vld [vmem:[%s4416_s26 + $0xec0] sm:$0xff]  ;;  %vm3495_vm2 = vcmask 1045509  }
 0x251   : > { %v2892_v12 = vrot.slane %v1781_v4, %v4636_v14  ;;  %1542 = vadd.xlane.f32.xlu1 %v1541_v52  ;;  %v811_v4 = vld [vmem:[%s4416_s26 + $0xde8] sm:$0xff] }
 0x252   : > { %v2823_v44 = vrot.slane %v1767_v42, %v4647_v31  ;;  %1491 = vadd.xlane.f32.xlu0 %v1490_v48  ;;  %v1378_v17 = vpop.xlane.xlu1 %1377  ;;  %v1586_v42 = vadd.f32 %v839_v60, %v838_v56  ;;  %v840_v60 = vld [vmem:[%s4416_s26 + $0xed0] sm:$0xff] }
 0x253   : > { %v5408_v50 = vsel %vm2244_vm6, %v2892_v12, %v2888_v6  ;;  %v1812_v23 = vmul.f32 0.00390625, %v1378_v17  ;;  %v1336_v26 = vpop.xlane.xlu0 %1335  ;;  %v1307_v6 = vadd.f32 %v653_v32, %v652_v53  ;;  %v717_v17 = vld [vmem:[%s4416_s26 + $0xaf8] sm:$0xff] }
 0x254   : > { %v2824_v24 = vsel %vm2258_vm8, %v2823_v44, %v5353_v11  ;;  %v1798_v54 = vmul.f32 0.00390625, %v1336_v26  ;;  %v748_v11 = vld [vmem:[%s4416_s26 + $0xbf0] sm:$0xff] }
 0x255   : > { %v3045_v27 = vrot.slane %v1812_v23, %v4630_v10  ;;  %1635 = vadd.xlane.f32.xlu1 %v1634_v7  ;;  %v716_v44 = vld [vmem:[%s4416_s26 + $0xaf0] sm:$0xff]  ;;  %v873_v23 = vld [vmem:[%s4416_s26 + $0xfd8] sm:$0xff] }
 0x256   : > { %v2976_v30 = vrot.slane %v1798_v54, %v4654_v39  ;;  %1584 = vadd.xlane.f32.xlu0 %v1583_v47  ;;  %v1471_v34 = vpop.xlane.xlu1 %1470  ;;  %v1403_v32 = vadd.f32 %v717_v17, %v716_v44  ;;  %v843_v44 = vld [vmem:[%s4416_s26 + $0xee8] sm:$0xff] }
 0x257   : > { %v5419_v5 = vsel %vm2237_vm5, %v3045_v27, %v3041_v61  ;;  %v1843_v40 = vmul.f32 0.00390625, %v1471_v34  ;;  %v1429_v38 = vpop.xlane.xlu0 %1428  ;;  %v1451_v61 = vadd.f32 %v749_v46, %v748_v11  ;;  %v1637_v27 = vadd.f32 %v873_v23, %v872_v21  ;;  %v1932_v17 = vld [vmem:[%s4423_s10 + $0xe8] sm:$0xff]  ;;  %v780_v23 = vld [vmem:[%s4416_s26 + $0xcf0] sm:$0xff] }
 0x258   : > { %v2977_v35 = vsel %vm2251_vm7, %v2976_v30, %v5364_v0  ;;  %v1829_v45 = vmul.f32 0.00390625, %v1429_v38  ;;  %v810_v0 = vld [vmem:[%s4416_s26 + $0xde0] sm:$0xff]  ;;  %v813_v30 = vld [vmem:[%s4416_s26 + $0xdf8] sm:$0xff] }
 0x259   : > { %v3198_v41 = vrot.slane %v1843_v40, %v4617_v57  ;;  %1401 = vadd.xlane.f32.xlu1 %v1400_v33  ;;  %v1544_v7 = vadd.f32 %v811_v4, %v810_v0  ;;  %v812_v33 = vld [vmem:[%s4416_s26 + $0xdf0] sm:$0xff] }
 0x25a   : > { %v3129_v49 = vrot.slane %v1829_v45, %v4636_v14  ;;  %1308 = vadd.xlane.f32.xlu0 %v1307_v6  ;;  %v1564_v52 = vpop.xlane.xlu1 %1563  ;;  %v1547_v46 = vadd.f32 %v813_v30, %v812_v33  ;;  %v1915_v33 = vld [vmem:[%s4423_s10 + $0x60] sm:$0xff] }
 0x25b   : > { %v5430_v48 = vsel %vm2230_vm4, %v3198_v41, %v3194_v2  ;;  %v1874_v63 = vmul.f32 0.00390625, %v1564_v52  ;;  %v1522_v20 = vpop.xlane.xlu0 %1521  ;;  %v1496_v41 = vadd.f32 %v779_v36, %v778_v28  ;;  %v1934_v52 = vld [vmem:[%s4423_s10 + $0xf8] sm:$0xff] }
 0x25c   : > { %v5436_v1 = vsel %vm2244_vm6, %v3129_v49, %v5375_v29  ;;  %v1860_v3 = vmul.f32 0.00390625, %v1522_v20  ;;  %v875_v49 = vld [vmem:[%s4416_s26 + $0xfe8] sm:$0xff]  ;;  %3846 = vmatprep.subr.mxu0 %v1934_v52  ;;  %v1918_v20 = vld [vmem:[%s4423_s10 + $0x78] sm:$0xff]  ;;  %v1929_v52 = vld [vmem:[%s4423_s10 + $0xd0] sm:$0xff] }
 0x25d   : > { %v3351_v13 = vrot.slane %v1874_v63, %v4613_v55  ;;  %1494 = vadd.xlane.f32.xlu1 %v1493_v51  ;;  %v874_v51 = vld [vmem:[%s4416_s26 + $0xfe0] sm:$0xff]  ;;  %v841_v63 = vld [vmem:[%s4416_s26 + $0xed8] sm:$0xff]  ;;  %3847 = vmatpush3.msra.mxu0 %v1918_v20 }
 0x25e   : > { %v3282_v12 = vrot.slane %v1860_v3, %v4630_v10  ;;  %1452 = vadd.xlane.f32.xlu0 %v1451_v61  ;;  %v1246_v2 = vpop.xlane.xlu1 %1245  ;;  %v1933_v3 = vld [vmem:[%s4423_s10 + $0xf0] sm:$0xff]  ;;  %v845_v28 = vld [vmem:[%s4416_s26 + $0xef8] sm:$0xff] }
 0x25f   : > { %v5443_v47 = vsel %vm2223_vm3, %v3351_v13, %v3347_v15  ;;  %v1768_v19 = vmul.f32 0.00390625, %v1246_v2  ;;  %v1615_v29 = vpop.xlane.xlu0 %1614  ;;  %3848 = vmatprep.subr.mxu0 %v1933_v3  ;;  %v1930_v36 = vld [vmem:[%s4423_s10 + $0xd8] sm:$0xff]  ;;  %vm3497_vm3 = vcmask 1046534  }
 0x260   : > { %v5449_v55 = vsel %vm2237_vm5, %v3282_v12, %v5386_v43  ;;  %v1891_v26 = vmul.f32 0.00390625, %v1615_v29 }
 0x261   : > { %v2828_v53 = vrot.slane %v1768_v19, %v4670_v62  ;;  %1587 = vadd.xlane.f32.xlu1 %v1586_v42  ;;  %v1917_v42 = vld [vmem:[%s4423_s10 + $0x70] sm:$0xff] }
 0x262   : > { %v3435_v54 = vrot.slane %v1891_v26, %v4617_v57  ;;  %1545 = vadd.xlane.f32.xlu0 %v1544_v7  ;;  %v1339_v15 = vpop.xlane.xlu1 %1338  ;;  %v842_v7 = vld [vmem:[%s4416_s26 + $0xee0] sm:$0xff]  ;;  %3849 = vmatpush3.msra.mxu0 %v1917_v42  ;;  %v781_v26 = vld [vmem:[%s4416_s26 + $0xcf8] sm:$0xff] }
 0x263   : > { %v5456_v34 = vsel %vm2265_vm9, %v2828_v53, %v2824_v24  ;;  %v1799_v43 = vmul.f32 0.00390625, %v1339_v15  ;;  %v1288_v6 = vpop.xlane.xlu0 %1287  ;;  %3850 = vmatprep.subr.mxu0 %v1932_v17  ;;  %v1916_v53 = vld [vmem:[%s4423_s10 + $0x68] sm:$0xff]  ;;  %v1931_v15 = vld [vmem:[%s4423_s10 + $0xe0] sm:$0xff] }
 0x264   : > { %v5462_v40 = vsel %vm2230_vm4, %v3435_v54, %v5397_v59  ;;  %v1782_v38 = vmul.f32 0.00390625, %v1288_v6  ;;  %3851 = vmatpush3.msra.mxu0 %v1916_v53  ;;  %v844_v6 = vld [vmem:[%s4416_s26 + $0xef0] sm:$0xff] }
 0x265   : > { %v2981_v11 = vrot.slane %v1799_v43, %v4647_v31  ;;  %1404 = vadd.xlane.f32.xlu1 %v1403_v32  ;;  %3852 = vmatprep.subr.mxu0 %v1931_v15  ;;  %v1925_v53 = vld [vmem:[%s4423_s10 + $0xb0] sm:$0xff] }
 0x266   : > { %v2897_v24 = vrot.slane %v1782_v38, %v4654_v39  ;;  %1638 = vadd.xlane.f32.xlu0 %v1637_v27  ;;  %v1432_v45 = vpop.xlane.xlu1 %1431  ;;  %3853 = vmatpush3.msra.mxu0 %v1915_v33  ;;  %v1909_v15 = vld [vmem:[%s4423_s10 + $0x30] sm:$0xff] }
 0x267   : > { %v5470_v59 = vsel %vm2258_vm8, %v2981_v11, %v2977_v35  ;;  %v1830_v61 = vmul.f32 0.00390625, %v1432_v45  ;;  %v1381_v56 = vpop.xlane.xlu0 %1380  ;;  %v1640_v35 = vadd.f32 %v875_v49, %v874_v51  ;;  %v877_v45 = vld [vmem:[%s4416_s26 + $0xff8] sm:$0xff]  ;;  %3854 = vmatprep.subr.mxu0 %v1930_v36 }
 0x268   : > { %v5477_v0 = vsel %vm2251_vm7, %v2897_v24, %v5408_v50  ;;  %v1813_v4 = vmul.f32 0.00390625, %v1381_v56  ;;  %v1589_v50 = vadd.f32 %v841_v63, %v840_v60  ;;  %v876_v24 = vld [vmem:[%s4416_s26 + $0xff0] sm:$0xff] }
 0x269   : > { %v3134_v13 = vrot.slane %v1830_v61, %v4654_v39  ;;  %1548 = vadd.xlane.f32.xlu1 %v1547_v46  ;;  %v1913_v56 = vld [vmem:[%s4423_s10 + $0x50] sm:$0xff]  ;;  %v1643_v20 = vadd.f32 %v877_v45, %v876_v24  ;;  %v1922_v24 = vld [vmem:[%s4423_s10 + $0x98] sm:$0xff] }
 0x26a   : > { %v3050_v12 = vrot.slane %v1813_v4, %v4636_v14  ;;  %1497 = vadd.xlane.f32.xlu0 %v1496_v41  ;;  %v1525_v2 = vpop.xlane.xlu1 %1524  ;;  %v1914_v41 = vld [vmem:[%s4423_s10 + $0x58] sm:$0xff] }
 0x26b   : > { %v5488_v19 = vsel %vm2251_vm7, %v3134_v13, %v5436_v1  ;;  %v1861_v29 = vmul.f32 0.00390625, %v1525_v2  ;;  %v1474_v21 = vpop.xlane.xlu0 %1473  ;;  %v1592_v1 = vadd.f32 %v843_v44, %v842_v7  ;;  %3855 = vmatpush3.msra.mxu0 %v1914_v41  ;;  %v1926_v44 = vld [vmem:[%s4423_s10 + $0xb8] sm:$0xff] }
 0x26c   : > { %v5495_v32 = vsel %vm2244_vm6, %v3050_v12, %v5419_v5  ;;  %v1844_v54 = vmul.f32 0.00390625, %v1474_v21  ;;  %v1499_v5 = vadd.f32 %v781_v26, %v780_v23  ;;  %3856 = vmatprep.subr.mxu0 %v1929_v52  ;;  %v1927_v12 = vld [vmem:[%s4423_s10 + $0xc0] sm:$0xff]  ;;  %v1910_v21 = vld [vmem:[%s4423_s10 + $0x38] sm:$0xff] }
 0x26d   : > { %v3287_v27 = vrot.slane %v1861_v29, %v4636_v14  ;;  %1641 = vadd.xlane.f32.xlu1 %v1640_v35  ;;  %3857 = vmatpush3.msra.mxu0 %v1913_v56  ;;  %v1912_v35 = vld [vmem:[%s4423_s10 + $0x48] sm:$0xff] }
 0x26e   : > { %v3203_v30 = vrot.slane %v1844_v54, %v4630_v10  ;;  %1590 = vadd.xlane.f32.xlu0 %v1589_v50  ;;  %v1618_v43 = vpop.xlane.xlu1 %1617 }
 0x26f   : > { %v5506_v38 = vsel %vm2244_vm6, %v3287_v27, %v5449_v55  ;;  %v1892_v11 = vmul.f32 0.00390625, %v1618_v43  ;;  %v1567_v46 = vpop.xlane.xlu0 %1566  ;;  %v1595_v55 = vadd.f32 %v845_v28, %v844_v6  ;;  %v1908_v43 = vld [vmem:[%s4423_s10 + $0x28] sm:$0xff]  ;;  %v1923_v28 = vld [vmem:[%s4423_s10 + $0xa0] sm:$0xff] }
 0x270   : > { %v5513_v51 = vsel %vm2237_vm5, %v3203_v30, %v5430_v48  ;;  %v1875_v49 = vmul.f32 0.00390625, %v1567_v46  ;;  %v1928_v48 = vld [vmem:[%s4423_s10 + $0xc8] sm:$0xff] }
 0x271   : > { %v3440_v61 = vrot.slane %v1892_v11, %v4630_v10  ;;  %1593 = vadd.xlane.f32.xlu1 %v1592_v1  ;;  %3858 = vmatprep.subr.mxu0 %v1928_v48  ;;  %v1924_v1 = vld [vmem:[%s4423_s10 + $0xa8] sm:$0xff]  ;;  %v1907_v11 = vld [vmem:[%s4423_s10 + $0x20] sm:$0xff] }
 0x272   : > { %v3356_v60 = vrot.slane %v1875_v49, %v4617_v57  ;;  %1500 = vadd.xlane.f32.xlu0 %v1499_v5  ;;  %v1291_v63 = vpop.xlane.xlu1 %1290  ;;  %3859 = vmatpush3.msra.mxu0 %v1912_v35  ;;  %v1906_v49 = vld [vmem:[%s4423_s10 + $0x18] sm:$0xff]  ;;  %v1904_v48 = vld [vmem:[%s4423_s10 + $0x8] sm:$0xff] }
 0x273   : > { %v5522_v4 = vsel %vm2237_vm5, %v3440_v61, %v5462_v40  ;;  %v1783_v3 = vmul.f32 0.00390625, %v1291_v63  ;;  %v1249_v13 = vpop.xlane.xlu0 %1248  ;;  %3860 = vmatprep.subr.mxu0 %v1927_v12  ;;  %v1911_v40 = vld [vmem:[%s4423_s10 + $0x40] sm:$0xff] }
 0x274   : > { %v5527_v42 = vsel %vm2230_vm4, %v3356_v60, %v5443_v47  ;;  %v1769_v57 = vmul.f32 0.00390625, %v1249_v13  ;;  %3861 = vmatpush3.msra.mxu0 %v1911_v40  ;;  %v1905_v60 = vld [vmem:[%s4423_s10 + $0x10] sm:$0xff]  ;;  %vm3499_vm4 = vcmask 1047559  }
 0x275   : > { %v2902_v2 = vrot.slane %v1783_v3, %v4647_v31  ;;  %1596 = vadd.xlane.f32.xlu1 %v1595_v55  ;;  %3862 = vmatprep.subr.mxu0 %v1926_v44  ;;  %v1921_v55 = vld [vmem:[%s4423_s10 + $0x90] sm:$0xff]  ;;  %v1919_v3 = vld [vmem:[%s4423_s10 + $0x80] sm:$0xff] }
 0x276   : > { %v2833_v50 = vrot.slane %v1769_v57, %v4666_v58  ;;  %1644 = vadd.xlane.f32.xlu0 %v1643_v20  ;;  %v1384_v7 = vpop.xlane.xlu1 %1383  ;;  %3863 = vmatpush3.msra.mxu0 %v1910_v21  ;;  %v1920_v20 = vld [vmem:[%s4423_s10 + $0x88] sm:$0xff]  ;;  %v1903_v57 = vld [vmem:[%s4423_s10] sm:$0xff] }
 0x277   : > { %v5536_v47 = vsel %vm2258_vm8, %v2902_v2, %v5477_v0  ;;  %v1814_v17 = vmul.f32 0.00390625, %v1384_v7  ;;  %v1342_v29 = vpop.xlane.xlu0 %1341  ;;  %3864 = vmatprep.subr.mxu0 %v1925_v53 }
 0x278   : > { %v2834_v23 = vsel %vm2272_vm10, %v2833_v50, %v5456_v34  ;;  %v1800_v26 = vmul.f32 0.00390625, %v1342_v29  ;;  %3865 = vmatpush3.msra.mxu0 %v1909_v15 }
 0x279   : > { %v3055_v54 = vrot.slane %v1814_v17, %v4654_v39  ;;  %3866 = vmatprep.subr.mxu0 %v1924_v1 }
 0x27a   : > { %v2986_v0 = vrot.slane %v1800_v26, %v4670_v62  ;;  %v1477_v27 = vpop.xlane.xlu1 %1476  ;;  %3867 = vmatpush3.msra.mxu0 %v1908_v43 }
 0x27b   : > { %v5548_v33 = vsel %vm2251_vm7, %v3055_v54, %v5495_v32  ;;  %v1845_v34 = vmul.f32 0.00390625, %v1477_v27  ;;  %v1435_v30 = vpop.xlane.xlu0 %1434  ;;  %3868 = vmatprep.subr.mxu0 %v1923_v28 }
 0x27c   : > { %v2987_v5 = vsel %vm2265_vm9, %v2986_v0, %v5470_v59  ;;  %v1831_v6 = vmul.f32 0.00390625, %v1435_v30  ;;  %3869 = vmatpush3.msra.mxu0 %v1907_v11 }
 0x27d   : > { %v3208_v36 = vrot.slane %v1845_v34, %v4636_v14  ;;  %3870 = vmatprep.subr.mxu0 %v1922_v24 }
 0x27e   : > { %v3139_v32 = vrot.slane %v1831_v6, %v4647_v31  ;;  %v1570_v46 = vpop.xlane.xlu1 %1569  ;;  %3871 = vmatpush3.msra.mxu0 %v1906_v49 }
 0x27f   : > { %v3209_v45 = vsel %vm2244_vm6, %v3208_v36, %v5513_v51  ;;  %v1876_v59 = vmul.f32 0.00390625, %v1570_v46  ;;  %v1528_v41 = vpop.xlane.xlu0 %1527  ;;  %3872 = vmatprep.subr.mxu0 %v1921_v55 }
 0x280   : > { %v3140_v52 = vsel %vm2258_vm8, %v3139_v32, %v5488_v19  ;;  %v1862_v61 = vmul.f32 0.00390625, %v1528_v41  ;;  %3873 = vmatpush3.msra.mxu0 %v1905_v60 }
 0x281   : > { %v3361_v56 = vrot.slane %v1876_v59, %v4630_v10  ;;  %3874 = vmatprep.subr.mxu0 %v1920_v20 }
 0x282   : > { %v3292_v63 = vrot.slane %v1862_v61, %v4654_v39  ;;  %v1252_v51 = vpop.xlane.xlu1 %1251  ;;  %3875 = vmatpush3.msra.mxu0 %v1904_v48 }
 0x283   : > { %v3362_v13 = vsel %vm2237_vm5, %v3361_v56, %v5527_v42  ;;  %v1770_v35 = vmul.f32 0.00390625, %v1252_v51  ;;  %v1621_v19 = vpop.xlane.xlu0 %1620  ;;  %3876 = vmatprep.subr.mxu0 %v1919_v3 }
 0x284   : > { %v3293_v12 = vsel %vm2251_vm7, %v3292_v63, %v5506_v38  ;;  %v1893_v10 = vmul.f32 0.00390625, %v1621_v19  ;;  %3877 = vmatpush3.msra.mxu0 %v1903_v57 }
 0x285   : > { %v2838_v2 = vrot.slane %v1770_v35, %v4686_v18 }
 0x286   : > { %v3445_v40 = vrot.slane %v1893_v10, %v4636_v14  ;;  %v1345_v50 = vpop.xlane.xlu1 %1344 }
 0x287   : > { %v2839_v7 = vsel %vm2279_vm11, %v2838_v2, %v2834_v23  ;;  %v1801_v44 = vmul.f32 0.00390625, %v1345_v50  ;;  %v1294_v42 = vpop.xlane.xlu0 %1293 }
 0x288   : > { %v3446_v17 = vsel %vm2244_vm6, %v3445_v40, %v5522_v4  ;;  %v1784_v29 = vmul.f32 0.00390625, %v1294_v42 }
 0x289   : > { %v2991_v21 = vrot.slane %v1801_v44, %v4666_v58 }
 0x28a   : > { %v2907_v38 = vrot.slane %v1784_v29, %v4670_v62  ;;  %v1438_v26 = vpop.xlane.xlu1 %1437 }
 0x28b   : > { %v2992_v53 = vsel %vm2272_vm10, %v2991_v21, %v2987_v5  ;;  %v1832_v54 = vmul.f32 0.00390625, %v1438_v26  ;;  %v1387_v15 = vpop.xlane.xlu0 %1386 }
 0x28c   : > { %v2908_v0 = vsel %vm2265_vm9, %v2907_v38, %v5536_v47  ;;  %v1815_v27 = vmul.f32 0.00390625, %v1387_v15 }
 0x28d   : > { %v3144_v23 = vrot.slane %v1832_v54, %v4670_v62 }
 0x28e   : > { %v3060_v1 = vrot.slane %v1815_v27, %v4647_v31  ;;  %v1531_v34 = vpop.xlane.xlu1 %1530 }
 0x28f   : > { %v3145_v4 = vsel %vm2265_vm9, %v3144_v23, %v3140_v52  ;;  %v1863_v30 = vmul.f32 0.00390625, %v1531_v34  ;;  %v1480_v43 = vpop.xlane.xlu0 %1479 }
 0x290   : > { %v3061_v6 = vsel %vm2258_vm8, %v3060_v1, %v5548_v33  ;;  %v1846_v28 = vmul.f32 0.00390625, %v1480_v43 }
 0x291   : > { %v3297_v5 = vrot.slane %v1863_v30, %v4647_v31 }
 0x292   : > { %v3213_v36 = vrot.slane %v1846_v28, %v4654_v39  ;;  %v1624_v11 = vpop.xlane.xlu1 %1623 }
 0x293   : > { %v3298_v47 = vsel %vm2258_vm8, %v3297_v5, %v3293_v12  ;;  %v1894_v32 = vmul.f32 0.00390625, %v1624_v11  ;;  %v1573_v46 = vpop.xlane.xlu0 %1572 }
 0x294   : > { %v3214_v24 = vsel %vm2251_vm7, %v3213_v36, %v3209_v45  ;;  %v1877_v59 = vmul.f32 0.00390625, %v1573_v46 }
 0x295   : > { %v3450_v41 = vrot.slane %v1894_v32, %v4654_v39 }
 0x296   : > { %v3366_v49 = vrot.slane %v1877_v59, %v4636_v14  ;;  %v1297_v52 = vpop.xlane.xlu1 %1296 }
 0x297   : > { %v3451_v33 = vsel %vm2251_vm7, %v3450_v41, %v3446_v17  ;;  %v1785_v61 = vmul.f32 0.00390625, %v1297_v52  ;;  %v1255_v55 = vpop.xlane.xlu0 %1254 }
 0x298   : > { %v3367_v56 = vsel %vm2244_vm6, %v3366_v49, %v3362_v13  ;;  %v1771_v60 = vmul.f32 0.00390625, %v1255_v55 }
 0x299   : > { %v2912_v63 = vrot.slane %v1785_v61, %v4666_v58 }
 0x29a   : > { %v2843_v51 = vrot.slane %v1771_v60, %v4679_v9  ;;  %v1390_v20 = vpop.xlane.xlu1 %1389 }
 0x29b   : > { %v2913_v45 = vsel %vm2272_vm10, %v2912_v63, %v2908_v0  ;;  %v1816_v48 = vmul.f32 0.00390625, %v1390_v20  ;;  %v1348_v3 = vpop.xlane.xlu0 %1347 }
 0x29c   : > { %v2844_v35 = vsel %vm2286_vm12, %v2843_v51, %v2839_v7  ;;  %v1802_v14 = vmul.f32 0.00390625, %v1348_v3 }
 0x29d   : > { %v3065_v19 = vrot.slane %v1816_v48, %v4670_v62 }
 0x29e   : > { %v2996_v57 = vrot.slane %v1802_v14, %v4686_v18  ;;  %v1483_v12 = vpop.xlane.xlu1 %1482 }
 0x29f   : > { %v3066_v13 = vsel %vm2265_vm9, %v3065_v19, %v3061_v6  ;;  %v1847_v10 = vmul.f32 0.00390625, %v1483_v12  ;;  %v1441_v2 = vpop.xlane.xlu0 %1440 }
 0x2a0   : > { %v2997_v40 = vsel %vm2279_vm11, %v2996_v57, %v2992_v53  ;;  %v1833_v50 = vmul.f32 0.00390625, %v1441_v2 }
 0x2a1   : > { %v3218_v44 = vrot.slane %v1847_v10, %v4647_v31 }
 0x2a2   : > { %v3149_v42 = vrot.slane %v1833_v50, %v4666_v58  ;;  %v1576_v17 = vpop.xlane.xlu1 %1575 }
 0x2a3   : > { %v3219_v7 = vsel %vm2258_vm8, %v3218_v44, %v3214_v24  ;;  %v1878_v29 = vmul.f32 0.00390625, %v1576_v17  ;;  %v1534_v21 = vpop.xlane.xlu0 %1533 }
 0x2a4   : > { %v3150_v38 = vsel %vm2272_vm10, %v3149_v42, %v3145_v4  ;;  %v1864_v26 = vmul.f32 0.00390625, %v1534_v21 }
 0x2a5   : > { %v3371_v54 = vrot.slane %v1878_v29, %v4654_v39 }
 0x2a6   : > { %v3302_v15 = vrot.slane %v1864_v26, %v4670_v62  ;;  %v1207_v0 = vpop.xlane.xlu1 %1206 }
 0x2a7   : > { %v3372_v53 = vsel %vm2251_vm7, %v3371_v54, %v3367_v56  ;;  %v1755_v27 = vmul.f32 0.00390625, %v1207_v0  ;;  %v1627_v23 = vpop.xlane.xlu0 %1626 }
 0x2a8   : > { %v3303_v1 = vsel %vm2265_vm9, %v3302_v15, %v3298_v47  ;;  %v1895_v34 = vmul.f32 0.00390625, %v1627_v23 }
 0x2a9   : > { %v2764_v30 = vrot.slane %v1755_v27, %v4679_v9 }
 0x2aa   : > { %v3455_v43 = vrot.slane %v1895_v34, %v4647_v31  ;;  %v1300_v6 = vpop.xlane.xlu1 %1299 }
 0x2ab   : > { %v2765_v4 = vsel %vm2286_vm12, %v2764_v30, %v5105_v8  ;;  %v1786_v28 = vmul.f32 0.00390625, %v1300_v6  ;;  %v1258_v39 = vpop.xlane.xlu0 %1257 }
 0x2ac   : > { %v5619_v5 = vsel %vm2258_vm8, %v3455_v43, %v3451_v33  ;;  %v1772_v36 = vmul.f32 0.00390625, %v1258_v39 }
 0x2ad   : > { %v2917_v11 = vrot.slane %v1786_v28, %v4686_v18 }
 0x2ae   : > { %v2848_v32 = vrot.slane %v1772_v36, %v4701_v37  ;;  %v1393_v47 = vpop.xlane.xlu1 %1392 }
 0x2af   : > { %v5624_v46 = vsel %vm2279_vm11, %v2917_v11, %v2913_v45  ;;  %v1817_v24 = vmul.f32 0.00390625, %v1393_v47  ;;  %v1351_v59 = vpop.xlane.xlu0 %1350 }
 0x2b0   : > { %v2849_v41 = vsel %vm2293_vm13, %v2848_v32, %v2844_v35  ;;  %v1803_v49 = vmul.f32 0.00390625, %v1351_v59 }
 0x2b1   : > { %v3070_v8 = vrot.slane %v1817_v24, %v4666_v58 }
 0x2b2   : > { %v3001_v52 = vrot.slane %v1803_v49, %v4679_v9  ;;  %v1486_v33 = vpop.xlane.xlu1 %1485 }
 0x2b3   : > { %v5630_v61 = vsel %vm2272_vm10, %v3070_v8, %v3066_v13  ;;  %v1848_v55 = vmul.f32 0.00390625, %v1486_v33  ;;  %v1444_v56 = vpop.xlane.xlu0 %1443 }
 0x2b4   : > { %v3002_v60 = vsel %vm2286_vm12, %v3001_v52, %v2997_v40  ;;  %v1834_v63 = vmul.f32 0.00390625, %v1444_v56 }
 0x2b5   : > { %v3223_v51 = vrot.slane %v1848_v55, %v4670_v62 }
 0x2b6   : > { %v3154_v20 = vrot.slane %v1834_v63, %v4686_v18  ;;  %v1579_v45 = vpop.xlane.xlu1 %1578 }
 0x2b7   : > { %v5636_v48 = vsel %vm2265_vm9, %v3223_v51, %v3219_v7  ;;  %v1879_v3 = vmul.f32 0.00390625, %v1579_v45  ;;  %v1537_v35 = vpop.xlane.xlu0 %1536 }
 0x2b8   : > { %v5639_v14 = vsel %vm2279_vm11, %v3154_v20, %v3150_v38  ;;  %v1865_v19 = vmul.f32 0.00390625, %v1537_v35 }
 0x2b9   : > { %v3376_v57 = vrot.slane %v1879_v3, %v4647_v31 }
 0x2ba   : > { %v3307_v12 = vrot.slane %v1865_v19, %v4666_v58  ;;  %v1210_v13 = vpop.xlane.xlu1 %1209 }
 0x2bb   : > { %v5644_v10 = vsel %vm2258_vm8, %v3376_v57, %v3372_v53  ;;  %v5646_v2 = vpop.xlane.xlu0 %1629  ;;  %v1756_v54 = vmul.f32 0.00390625, %v1210_v13 }
 0x2bc   : > { %v5649_v40 = vsel %vm2272_vm10, %v3307_v12, %v3303_v1 }
 0x2bd   : > { %v2769_v53 = vrot.slane %v1756_v54, %v4701_v37 }
 0x2be   : > { %v1303_v50 = vpop.xlane.xlu1 %1302 }
 0x2bf   : > { %v1261_v44 = vpop.xlane.xlu0 %1260  ;;  %v2770_v43 = vsel %vm2293_vm13, %v2769_v53, %v2765_v4  ;;  %v1787_v52 = vmul.f32 0.00390625, %v1303_v50 }
 0x2c0   : > { %v1773_v42 = vmul.f32 0.00390625, %v1261_v44 }
 0x2c2   : > { %v2853_v17 = vrot.slane %v1773_v42, %v4697_v22  ;;  %v1396_v7 = vpop.xlane.xlu1 %1395 }
 0x2c3   : > { %v1354_v29 = vpop.xlane.xlu0 %1353  ;;  %v1818_v42 = vmul.f32 0.00390625, %v1396_v7 }
 0x2c4   : > { %v2854_v31 = vsel %vm2300_vm14, %v2853_v17, %v2849_v41  ;;  %v1804_v27 = vmul.f32 0.00390625, %v1354_v29 }
 0x2c5   : > { %v3503_v21 = vsel %vm3491_vm0, %v2854_v31, %v5054_v16 }
 0x2c6   : > { %v5655_v38 = vpop.xlane.xlu1 %1488  ;;  %v3006_v16 = vrot.slane %v1804_v27, %v4701_v37 }
 0x2c7   : > { %v1447_v26 = vpop.xlane.xlu0 %1446 }
 0x2c8   : > { %v3007_v47 = vsel %vm2293_vm13, %v3006_v16, %v3002_v60  ;;  %v1835_v63 = vmul.f32 0.00390625, %v1447_v26 }
 0x2ca   : > { %v5657_v15 = vpop.xlane.xlu1 %1581  ;;  %v3159_v19 = vrot.slane %v1835_v63, %v4679_v9 }
 0x2cb   : > { %v1540_v0 = vpop.xlane.xlu0 %1539 }
 0x2cc   : > { %v1866_v7 = vmul.f32 0.00390625, %v1540_v0 }
 0x2ce   : > { %v1213_v23 = vpop.xlane.xlu1 %1212 }
 0x2cf   : > { %v1757_v1 = vmul.f32 0.00390625, %v1213_v23  ;;  %v5660_v34 = vpop.xlane.xlu0 %1632 }
 0x2d1   : > { %v2774_v30 = vrot.slane %v1757_v1, %v4697_v22  ;;  %v3075_v1 = vrot.slane %v1818_v42, %v4686_v18 }
 0x2d2   : > { %v1357_v6 = vpop.xlane.xlu1 %1356 }
 0x2d3   : > { %v2775_v28 = vsel %vm2300_vm14, %v2774_v30, %v2770_v43  ;;  %v1805_v39 = vmul.f32 0.00390625, %v1357_v6  ;;  %v1306_v36 = vpop.xlane.xlu0 %1305 }
 0x2d4   : > { %v3492_v11 = vsel %vm3491_vm0, %v2775_v28, %v4987_v25  ;;  %v1788_v55 = vmul.f32 0.00390625, %v1306_v36  ;;  %v2922_v25 = vrot.slane %v1787_v52, %v4679_v9 }
 0x2d5   : > { %v3011_v32 = vrot.slane %v1805_v39, %v4697_v22 }
 0x2d6   : > { %v1450_v24 = vpop.xlane.xlu1 %1449  ;;  %v2927_v60 = vrot.slane %v1788_v55, %v4701_v37  ;;  %v2923_v35 = vsel %vm2286_vm12, %v2922_v25, %v5624_v46  ;;  %v3160_v46 = vsel %vm2286_vm12, %v3159_v19, %v5639_v14 }
 0x2d7   : > { %v3012_v59 = vsel %vm2300_vm14, %v3011_v32, %v3007_v47  ;;  %v1399_v41 = vpop.xlane.xlu0 %1398  ;;  %v1836_v20 = vmul.f32 0.00390625, %v1450_v24  ;;  %v3076_v32 = vsel %vm2279_vm11, %v3075_v1, %v5630_v61  ;;  %v3312_v47 = vrot.slane %v1866_v7, %v4686_v18 }
 0x2d8   : > { %v3504_v4 = vsel %vm3493_vm1, %v3012_v59, %v3503_v21  ;;  %v2928_v13 = vsel %vm2293_vm13, %v2927_v60, %v2923_v35  ;;  %v1819_v31 = vmul.f32 0.00390625, %v1399_v41  ;;  %v1896_v41 = vmul.f32 0.00390625, %v5646_v2 }
 0x2d9   : > { %v3164_v50 = vrot.slane %v1836_v20, %v4701_v37  ;;  %v1849_v61 = vmul.f32 0.00390625, %v5655_v38  ;;  %v1880_v20 = vmul.f32 0.00390625, %v5657_v15  ;;  %v1897_v15 = vmul.f32 0.00390625, %v5660_v34 }
 0x2da   : > { %v1543_v49 = vpop.xlane.xlu1 %1542  ;;  %v3080_v43 = vrot.slane %v1819_v31, %v4679_v9  ;;  %v3460_v35 = vrot.slane %v1896_v41, %v4670_v62 }
 0x2db   : > { %v1492_v8 = vpop.xlane.xlu0 %1491  ;;  %v3165_v27 = vsel %vm2293_vm13, %v3164_v50, %v3160_v46  ;;  %v1867_v16 = vmul.f32 0.00390625, %v1543_v49  ;;  %v3228_v42 = vrot.slane %v1849_v61, %v4666_v58 }
 0x2dc   : > { %v3081_v0 = vsel %vm2286_vm12, %v3080_v43, %v3076_v32 }
 0x2dd   : > { %v3317_v24 = vrot.slane %v1867_v16, %v4679_v9  ;;  %v3229_v1 = vsel %vm2272_vm10, %v3228_v42, %v5636_v48 }
 0x2de   : > { %v5672_v33 = vpop.xlane.xlu1 %1635 }
 0x2df   : > { %v5674_v56 = vpop.xlane.xlu0 %1584  ;;  %v1898_v31 = vmul.f32 0.00390625, %v5672_v33  ;;  %v3465_v33 = vrot.slane %v1897_v15, %v4666_v58 }
 0x2e0   : > { %v1881_v38 = vmul.f32 0.00390625, %v5674_v56  ;;  %v3461_v56 = vsel %vm2265_vm9, %v3460_v35, %v5619_v5 }
 0x2e1   : > { %v3470_v16 = vrot.slane %v1898_v31, %v4686_v18 }
 0x2e2   : > { %v1402_v51 = vpop.xlane.xlu1 %1401  ;;  %v3386_v34 = vrot.slane %v1881_v38, %v4666_v58 }
 0x2e3   : > { %v1309_v45 = vpop.xlane.xlu0 %1308  ;;  %v1820_v26 = vmul.f32 0.00390625, %v1402_v51  ;;  %v3313_v51 = vsel %vm2279_vm11, %v3312_v47, %v5649_v40 }
 0x2e4   : > { %v1789_v3 = vmul.f32 0.00390625, %v1309_v45  ;;  %v3318_v2 = vsel %vm2286_vm12, %v3317_v24, %v3313_v51  ;;  %v1850_v45 = vmul.f32 0.00390625, %v1492_v8 }
 0x2e5   : > { %v3085_v14 = vrot.slane %v1820_v26, %v4701_v37 }
 0x2e6   : > { %v2932_v57 = vrot.slane %v1789_v3, %v4697_v22  ;;  %v1495_v12 = vpop.xlane.xlu1 %1494 }
 0x2e7   : > { %v1453_v44 = vpop.xlane.xlu0 %1452  ;;  %v1851_v19 = vmul.f32 0.00390625, %v1495_v12  ;;  %v3233_v12 = vrot.slane %v1850_v45, %v4686_v18 }
 0x2e8   : > { %v2933_v17 = vsel %vm2300_vm14, %v2932_v57, %v2928_v13  ;;  %v1837_v29 = vmul.f32 0.00390625, %v1453_v44 }
 0x2e9   : > { %v3494_v21 = vsel %vm3493_vm1, %v2933_v17, %v3492_v11  ;;  %v3238_v46 = vrot.slane %v1851_v19, %v4679_v9  ;;  %v3234_v43 = vsel %vm2279_vm11, %v3233_v12, %v3229_v1 }
 0x2ea   : > { %v3169_v54 = vrot.slane %v1837_v29, %v4697_v22  ;;  %v1588_v53 = vpop.xlane.xlu1 %1587  ;;  %v3381_v29 = vrot.slane %v1880_v20, %v4670_v62 }
 0x2eb   : > { %v1546_v23 = vpop.xlane.xlu0 %1545  ;;  %v1882_v17 = vmul.f32 0.00390625, %v1588_v53 }
 0x2ec   : > { %v3170_v30 = vsel %vm2300_vm14, %v3169_v54, %v3165_v27  ;;  %v1868_v28 = vmul.f32 0.00390625, %v1546_v23 }
 0x2ed   : > { %v3505_v6 = vsel %vm3495_vm2, %v3170_v30, %v3504_v4  ;;  %v3086_v4 = vsel %vm2293_vm13, %v3085_v14, %v3081_v0  ;;  %v3391_v7 = vrot.slane %v1882_v17, %v4686_v18  ;;  %v3382_v30 = vsel %vm2265_vm9, %v3381_v29, %v5644_v10 }
 0x2ee   : > { %v1405_v39 = vpop.xlane.xlu1 %1404  ;;  %v3322_v49 = vrot.slane %v1868_v28, %v4701_v37  ;;  %v3239_v14 = vsel %vm2286_vm12, %v3238_v46, %v3234_v43  ;;  %v3466_v18 = vsel %vm2272_vm10, %v3465_v33, %v3461_v56 }
 0x2ef   : > { %v1821_v36 = vmul.f32 0.00390625, %v1405_v39  ;;  %v1639_v11 = vpop.xlane.xlu0 %1638 }
 0x2f0   : > { %v3323_v13 = vsel %vm2293_vm13, %v3322_v49, %v3318_v2  ;;  %v1899_v26 = vmul.f32 0.00390625, %v1639_v11 }
 0x2f1   : > { %v3090_v59 = vrot.slane %v1821_v36, %v4697_v22  ;;  %v3387_v36 = vsel %vm2272_vm10, %v3386_v34, %v3382_v30 }
 0x2f2   : > { %v1549_v52 = vpop.xlane.xlu1 %1548  ;;  %v3475_v28 = vrot.slane %v1899_v26, %v4679_v9  ;;  %v3392_v0 = vsel %vm2279_vm11, %v3391_v7, %v3387_v36 }
 0x2f3   : > { %v3091_v55 = vsel %vm2300_vm14, %v3090_v59, %v3086_v4  ;;  %v1869_v25 = vmul.f32 0.00390625, %v1549_v52  ;;  %v1498_v63 = vpop.xlane.xlu0 %1497  ;;  %v3471_v59 = vsel %vm2279_vm11, %v3470_v16, %v3466_v18 }
 0x2f4   : > { %v3496_v60 = vsel %vm3495_vm2, %v3091_v55, %v3494_v21  ;;  %v1852_v50 = vmul.f32 0.00390625, %v1498_v63 }
 0x2f5   : > { %v3327_v3 = vrot.slane %v1869_v25, %v4697_v22 }
 0x2f6   : > { %v1642_v57 = vpop.xlane.xlu1 %1641  ;;  %v3243_v53 = vrot.slane %v1852_v50, %v4701_v37 }
 0x2f7   : > { %v1591_v40 = vpop.xlane.xlu0 %1590  ;;  %v3328_v44 = vsel %vm2300_vm14, %v3327_v3, %v3323_v13  ;;  %v1900_v27 = vmul.f32 0.00390625, %v1642_v57 }
 0x2f8   : > { %v3506_v8 = vsel %vm3497_vm3, %v3328_v44, %v3505_v6  ;;  %v1883_v21 = vmul.f32 0.00390625, %v1591_v40  ;;  %v3244_v11 = vsel %vm2293_vm13, %v3243_v53, %v3239_v14 }
 0x2f9   : > { %v3480_v10 = vrot.slane %v1900_v27, %v4701_v37 }
 0x2fa   : > { %v1594_v54 = vpop.xlane.xlu1 %1593  ;;  %v3396_v6 = vrot.slane %v1883_v21, %v4679_v9 }
 0x2fb   : > { %v1884_v23 = vmul.f32 0.00390625, %v1594_v54  ;;  %v1501_v62 = vpop.xlane.xlu0 %1500 }
 0x2fc   : > { %v1853_v5 = vmul.f32 0.00390625, %v1501_v62  ;;  %v3397_v41 = vsel %vm2286_vm12, %v3396_v6, %v3392_v0 }
 0x2fd   : > { %v3401_v48 = vrot.slane %v1884_v23, %v4701_v37  ;;  %v3476_v37 = vsel %vm2286_vm12, %v3475_v28, %v3471_v59 }
 0x2fe   : > { %v3248_v58 = vrot.slane %v1853_v5, %v4697_v22  ;;  %v1597_v39 = vpop.xlane.xlu1 %1596  ;;  %v3481_v25 = vsel %vm2293_vm13, %v3480_v10, %v3476_v37 }
 0x2ff   : > { %v1885_v32 = vmul.f32 0.00390625, %v1597_v39  ;;  %v1645_v47 = vpop.xlane.xlu0 %1644  ;;  %v3402_v55 = vsel %vm2293_vm13, %v3401_v48, %v3397_v41 }
 0x300   : > { %v1901_v24 = vmul.f32 0.00390625, %v1645_v47  ;;  %v3249_v9 = vsel %vm2300_vm14, %v3248_v58, %v3244_v11 }
 0x301   : > { %v3406_v4 = vrot.slane %v1885_v32, %v4697_v22  ;;  %v3498_v49 = vsel %vm3497_vm3, %v3249_v9, %v3496_v60  ;;  %v1902_v60 = vld [vmem:[#allocation2] sm:$0xff] }
 0x302   : > { %v3485_v52 = vrot.slane %v1901_v24, %v4697_v22 }
 0x303   : > { %v3407_v63 = vsel %vm2300_vm14, %v3406_v4, %v3402_v55 }
 0x304   : > { %v3486_v61 = vsel %vm2300_vm14, %v3485_v52, %v3481_v25  ;;  %v3500_v51 = vsel %vm3499_vm4, %v3407_v63, %v3498_v49 }
 0x305   : > { %v3507_v20 = vsel %vm3499_vm4, %v3486_v61, %v3506_v8 }
 0x306   : > { %3574 = vmatprep.mubr.f32.mxu0 %v3507_v20 }
 0x307   : > { %3575 = vmatmul.mubr.f32.vlgmr.msra.gmra.mxu0 %v3500_v51 }
 0x3c7   : > { %v3878_v2 = vpop.f32.mrf.mxu0 }
 0x3c9   : > { %v3879_v45 = vpop.f32.mrf.mxu0 }
 0x3ca   : > { %v3880_v22 = vadd.f32 %v3879_v45, %v3878_v2  ;;  %3585 = sbr.rel (%p3836_p5) target bundleno = 1204 (0x4b4), region = 68 }
 0x3cc   : > { %v3580_v3 = vadd.f32 %v3880_v22, %v1902_v60 }
 0x3ce   : > { %3581 = vst [vmem:[#allocation2] sm:$0xff] %v3580_v3 }
 0x3cf   : > { %v3611_v35 = vld [vmem:[#allocation9 + $0x78] sm:$0xff]  ;;  %v4254_v19 = vmov 0.0   ;;  %v3610_v57 = vld [vmem:[#allocation9 + $0x70] sm:$0xff]  ;;  %vm4255_vm5 = vmmov 0   ;;  %v3609_v13 = vld [vmem:[#allocation9 + $0x68] sm:$0xff] }
 0x3d0   : > { %3898 = vmatprep.subr.mxu0 %v4254_v19  ;;  %3930 = vmatprep.mubr.msk.f32.mxu0 %vm4255_vm5, %v4254_v19  ;;  %v3608_v38 = vld [vmem:[#allocation9 + $0x60] sm:$0xff]  ;;  %v3607_v50 = vld [vmem:[#allocation9 + $0x58] sm:$0xff]  ;;  %v3606_v40 = vld [vmem:[#allocation9 + $0x50] sm:$0xff] }
 0x3d1   : > { %3899 = vmatpush3.msra.mxu0 %v3611_v35  ;;  %v3605_v44 = vld [vmem:[#allocation9 + $0x48] sm:$0xff]  ;;  %v3604_v42 = vld [vmem:[#allocation9 + $0x40] sm:$0xff]  ;;  %v3603_v15 = vld [vmem:[#allocation9 + $0x38] sm:$0xff] }
 0x3d2   : > { %3900 = vmatprep.subr.mxu0 %v4254_v19  ;;  %v3602_v17 = vld [vmem:[#allocation9 + $0x30] sm:$0xff]  ;;  %v3601_v8 = vld [vmem:[#allocation9 + $0x28] sm:$0xff]  ;;  %v3600_v29 = vld [vmem:[#allocation9 + $0x20] sm:$0xff] }
 0x3d3   : > { %3901 = vmatpush3.msra.mxu0 %v3610_v57  ;;  %v3837_v31 = vld [vmem:[#allocation8] ss:$0 sm:$0xff]  ;;  %v3598_v56 = vld [vmem:[#allocation9 + $0x10] sm:$0xff]  ;;  %v3597_v26 = vld [vmem:[#allocation9 + $0x8] sm:$0xff] }
 0x3d4   : > { %3902 = vmatprep.subr.mxu0 %v4254_v19  ;;  %v3599_v21 = vld [vmem:[#allocation9 + $0x18] sm:$0xff]  ;;  %v3596_v54 = vld [vmem:[#allocation9] sm:$0xff] }
 0x3d5   : > { %3903 = vmatpush3.msra.mxu0 %v3609_v13  ;;  %v3586_v12 = vld [vmem:[#allocation2] sm:$0xff]  ;;  %v3838_v53 = vld [vmem:[#allocation11] ss:$0 sm:$0xff] }
 0x3d6   : > { %3904 = vmatprep.subr.mxu0 %v4254_v19  ;;  %v3594_v46 = vadd.f32 %v3837_v31, %v3586_v12 }
 0x3d7   : > { %3905 = vmatpush3.msra.mxu0 %v3608_v38 }
 0x3d8   : > { %3906 = vmatprep.subr.mxu0 %v4254_v19  ;;  %v3595_v34 = vmax.f32 %v3594_v46, 0.0 }
 0x3d9   : > { %3907 = vmatpush3.msra.mxu0 %v3607_v50 }
 0x3da   : > { %3908 = vmatprep.subr.mxu0 %v4254_v19 }
 0x3db   : > { %3909 = vmatpush3.msra.mxu0 %v3606_v40 }
 0x3dc   : > { %3910 = vmatprep.subr.mxu0 %v4254_v19 }
 0x3dd   : > { %3911 = vmatpush3.msra.mxu0 %v3605_v44 }
 0x3de   : > { %3912 = vmatprep.subr.mxu0 %v4254_v19 }
 0x3df   : > { %3913 = vmatpush3.msra.mxu0 %v3604_v42 }
 0x3e0   : > { %3914 = vmatprep.subr.mxu0 %v4254_v19 }
 0x3e1   : > { %3915 = vmatpush3.msra.mxu0 %v3603_v15 }
 0x3e2   : > { %3916 = vmatprep.subr.mxu0 %v4254_v19 }
 0x3e3   : > { %3917 = vmatpush3.msra.mxu0 %v3602_v17 }
 0x3e4   : > { %3918 = vmatprep.subr.mxu0 %v4254_v19 }
 0x3e5   : > { %3919 = vmatpush3.msra.mxu0 %v3601_v8 }
 0x3e6   : > { %3920 = vmatprep.subr.mxu0 %v4254_v19 }
 0x3e7   : > { %3921 = vmatpush3.msra.mxu0 %v3600_v29 }
 0x3e8   : > { %3922 = vmatprep.subr.mxu0 %v4254_v19 }
 0x3e9   : > { %3923 = vmatpush3.msra.mxu0 %v3599_v21 }
 0x3ea   : > { %3924 = vmatprep.subr.mxu0 %v4254_v19 }
 0x3eb   : > { %3925 = vmatpush3.msra.mxu0 %v3598_v56 }
 0x3ec   : > { %3926 = vmatprep.subr.mxu0 %v4254_v19 }
 0x3ed   : > { %3927 = vmatpush3.msra.mxu0 %v3597_v26 }
 0x3ee   : > { %3928 = vmatprep.subr.mxu0 %v4254_v19 }
 0x3ef   : > { %3929 = vmatpush3.msra.mxu0 %v3596_v54 }
 0x3f0   : > { %3931 = vmatmul.mubr.f32.vlgmr.msra.gmra.mxu0 %v3595_v34 }
 0x4b0   : > { %v3685_v27 = vpop.f32.mrf.mxu0 }
 0x4b1   : > { %v3686_v23 = vadd.f32 %v3838_v53, %v3685_v27 }
 0x4b2   : > { %v3932_v62 = vpop.f32.mrf.mxu0 }
 0x4b3   : > { %3689 = vst [vmem:[#allocation12] sm:$0xff] %v3686_v23 }
 0x4b4 PF: > { %p3976_p8 = scmp.eq.s32.totalorder %s4316_s24, 1  ;;  %s4256_s21 = smov [#allocation12]  }
 0x4b5   : > { %s3699_s29 = sshll.u32 %s4256_s21, 4  ;;  %s3700_s29 = int_to_ptr.vmem [resolvable:$true] %s3699_s29 }
 0x4b6   : > { %s4147_s6 = scalar_lea.vmem %s3700_s29, 128  ;;  %p4154_p7 = scmp.lt.s32.totalorder %s3700_s29, %s3700_s29 }
 0x4b7   : > { %p4148_p10 = scmp.ne.s32.totalorder %s3700_s29, %s4147_s6  ;;  %p4155_p12 = scmp.lt.s32.totalorder %s4147_s6, %s4147_s6 }
 0x4b9   : > { %p4149_p2 = pnand %p4148_p10, %p3976_p8  ;;  %p4156_p13 = por %p4155_p12, %p4154_p7 }
 0x4bb   : > { %p4150_p6 = pneg %p4149_p2 }
 0x4bd   : > { %p4157_p9 = pnand %p4156_p13, %p4150_p6 }
 0x4bf   : > { %4160 = shalt.err (!%p4157_p9)
}
 0x4c0   : > { %3957 = dma.vmem_to_hbm [thread:$0]  (%p3976_p8), %s3700_s29, 128, %s5794_s5, [#allocation5]  }
 0x4c1   : > { %4212 = dma.done.wait (%p3976_p8), [#allocation5], 128  }
 0x4c2   : > { %4214 = vsyncadd (%p3976_p8), [#allocation5], 4294967168 }
 0x4c3 PF: > { %s23_s23 = sadd.s32 1, %s4237_s23   ;;  %s5805_s18 = smov %s4221_s19 }
 0x4c4   : > { %p20_p11 = scmp.ge.s32.totalorder %s23_s23, 4   ;;  %s5806_s19 = smov %s4225_s20 }
 0x4c5   : > { %s5807_s20 = smov %s4342_s30  ;;  %s5808_s21 = smov %s4233_s22 }
 0x4c6   : > { %s5809_s22 = smov %s5811_s25  ;;  %22 = sbr.rel (!%p20_p11) target bundleno = 12 (0xc), region = 116 }
 0x4cb   :  { %3712 = vsyncpa [#allocation4], 1 }
 0x4cc   :  { %3714 = vsyncpa [#allocation4 + $0x1], 1 }
 0x4cd   :  { %3715 = vsyncpa [#allocation7], 1 }
 0x4ce   :  { %3717 = vsyncpa [#allocation7 + $0x1], 1 }
 0x4cf   :  { %3718 = vsyncpa [#allocation10], 1 }
 0x4d0   :  { %3719 = vsyncpa [#allocation5], 1 }
 0x4d1   :  { %3721 = vsyncpa [#allocation5 + $0x1], 1 }

</bundles_post_ra>
